<compile_context>
chip_gen: v7x
topology: tpu7x:2x2x1
jax: 0.10.0
libtpu: 0.0.40
codegen_flags: <defaults>
</compile_context>

<pallas_src>
import functools

import jax
import jax.numpy as jnp
from jax.experimental import pallas as pl
from jax.experimental.pallas import tpu as pltpu

EPS = 1e-5
VMEM_LIMIT = 40 * 1024 * 1024   # safe on v7x (64 MiB physical) and v5e/v6e


def _round_up_lanes(c):
    return ((c + 127) // 128) * 128


# ----------------------------- Pallas kernel -------------------------------

def _fused_conv_kernel(x_ref, w_ref, s_ref, b_ref, o_ref, stat_ref,
                       patch_scr, *, apply_act):
    # x_ref    : (1, H, W, Cpi)    un-normalized activation (or raw input) tile
    # w_ref    : (3, 3*Cpi, Cpo)   conv weights, dx taps merged into K (dx-major)
    # s_ref    : (1, Cpi)          folded BN scale of the *input* (used iff apply_act)
    # b_ref    : (1, Cpi)          folded BN bias  of the *input* (used iff apply_act)
    # o_ref    : (1, H, W, Cpo)    un-normalized conv output (pre-BN)
    # stat_ref : (1, 2, Cpo)       per-batch-element [sum, sum-of-squares] of o
    # patch_scr: VMEM (H+2, W, 3*Cpi)  dx-merged im2col rows, built ONCE per tile
    H = o_ref.shape[1]
    W = o_ref.shape[2]
    cpi = x_ref.shape[3]
    cpo = o_ref.shape[3]
    cdt = patch_scr.dtype

    x = x_ref[0].astype(jnp.float32)                     # (H, W, Cpi)
    if apply_act:
        # Previous layer's BatchNorm + ReLU, fused into this conv's prologue.
        s = s_ref[...].reshape(1, 1, cpi)
        b = b_ref[...].reshape(1, 1, cpi)
        x = jnp.maximum(x * s + b, 0.0)
    xd = x.astype(cdt)

    # Zero only the fixed border slabs of the patch buffer (the conv's zero
    # padding).  Done every step — cheap, and correct regardless of how the
    # parallel batch axis is sharded across TensorCores.
    zrow = jnp.zeros((1, W, 3 * cpi), cdt)
    patch_scr[0:1] = zrow                                 # top padding row
    patch_scr[H + 1:H + 2] = zrow                         # bottom padding row
    zcol = jnp.zeros((H, 1, cpi), cdt)
    patch_scr[1:H + 1, 0:1, 0:cpi] = zcol                 # left pad of dx=0 tap
    patch_scr[1:H + 1, W - 1:W, 2 * cpi:3 * cpi] = zcol   # right pad of dx=2 tap

    # Build the dx-merged patch once per tile (3 big stores, vs. the previous
    # per-dy slice + concatenate marshalling).  dx=1 is fully aligned; dx=0 is
    # the single sublane-shifted store (the spatial shift has to live
    # somewhere); dx=2 is start-aligned.
    patch_scr[1:H + 1, :, cpi:2 * cpi] = xd                        # dx = 1
    patch_scr[1:H + 1, 1:W, 0:cpi] = xd[:, 0:W - 1, :]             # dx = 0
    patch_scr[1:H + 1, 0:W - 1, 2 * cpi:3 * cpi] = xd[:, 1:W, :]   # dx = 2

    # Three MXU dots (K = 3*Cpi), accumulated in registers; one store to o.
    acc = None
    for dy in range(3):                                   # static tap-row loop
        contrib = jax.lax.dot_general(                     # MXU
            patch_scr[dy:dy + H, :, :], w_ref[dy],
            dimension_numbers=(((2,), (0,)), ((), ())),
            preferred_element_type=jnp.float32)            # (H, W, Cpo)
        acc = contrib if dy == 0 else acc + contrib
    o_ref[0] = acc.astype(o_ref.dtype)

    # Fused BatchNorm statistics (partial; reduced over N in the wrapper), so
    # BN never re-reads the conv output from HBM.
    ssum = jnp.sum(acc, axis=(0, 1)).reshape(1, cpo)
    ssq = jnp.sum(acc * acc, axis=(0, 1)).reshape(1, cpo)
    stat_ref[0] = jnp.concatenate([ssum, ssq], axis=0)     # (2, Cpo)


# ------------------------------ wrappers ------------------------------------

def _fused_conv(x, w, scale, bias, *, apply_act, out_dtype, compute_dtype):
    N, H, W, cpi = x.shape
    cpo = w.shape[-1]
    kernel = functools.partial(_fused_conv_kernel, apply_act=apply_act)
    return pl.pallas_call(
        kernel,
        out_shape=(jax.ShapeDtypeStruct((N, H, W, cpo), out_dtype),
                   jax.ShapeDtypeStruct((N, 2, cpo), jnp.float32)),
        grid_spec=pltpu.PrefetchScalarGridSpec(
            num_scalar_prefetch=0,
            grid=(N,),
            in_specs=[
                pl.BlockSpec((1, H, W, cpi), lambda n: (n, 0, 0, 0)),
                pl.BlockSpec((3, 3 * cpi, cpo), lambda n: (0, 0, 0)),
                pl.BlockSpec((1, cpi), lambda n: (0, 0)),
                pl.BlockSpec((1, cpi), lambda n: (0, 0)),
            ],
            out_specs=[
                pl.BlockSpec((1, H, W, cpo), lambda n: (n, 0, 0, 0)),
                pl.BlockSpec((1, 2, cpo), lambda n: (n, 0, 0)),
            ],
            scratch_shapes=[
                pltpu.VMEM((H + 2, W, 3 * cpi), compute_dtype),
            ],
        ),
        compiler_params=pltpu.CompilerParams(
            dimension_semantics=("parallel",),
            vmem_limit_bytes=VMEM_LIMIT),
    )(x, w, scale, bias)


def _prep_weight(w_oihw, cpi, cpo, dtype):
    # OIHW -> HWIO, pad channels to lane width, merge dx into the K dim:
    # (3, 3, Cin, Cout) -> (3, 3*Cpi, Cpo) with (dx, ci) flattened dx-major.
    w = jnp.transpose(w_oihw, (2, 3, 1, 0)).astype(jnp.float32)
    w = jnp.pad(w, ((0, 0), (0, 0),
                    (0, cpi - w.shape[2]), (0, cpo - w.shape[3])))
    return w.reshape(3, 3 * cpi, cpo).astype(dtype)


def _pad_vec(v, cp):
    v = v.astype(jnp.float32)
    return jnp.pad(v, (0, cp - v.shape[0]))


def _fold_bn(stats, gamma, beta, count):
    # stats: (N, 2, Cp) per-batch-element [sum, sum_sq] from the conv kernel.
    # Training-mode BatchNorm2d: batch statistics, biased variance.
    # NOTE: single-pass E[x^2]-E[x]^2 in f32; fine at these magnitudes.
    ssum = jnp.sum(stats[:, 0, :], axis=0)
    ssq = jnp.sum(stats[:, 1, :], axis=0)
    mean = ssum / count
    var = jnp.maximum(ssq / count - mean * mean, 0.0)
    scale = gamma * jax.lax.rsqrt(var + EPS)
    bias = beta - mean * scale
    return scale, bias


def double_conv(x_nchw, params, act_dtype=jnp.float32,
                compute_dtype=jnp.float32):
    """params = ((w1_oihw, gamma1, beta1), (w2_oihw, gamma2, beta2)).

    Set act_dtype=compute_dtype=jnp.bfloat16 on v6e/v7x for native-rate MXU
    and half the HBM traffic; f32 default keeps validation tight.
    """
    (w1, g1, b1), (w2, g2, b2) = params
    N, Cin, H, W = x_nchw.shape
    C1 = w1.shape[0]
    C2 = w2.shape[0]
    cpi = _round_up_lanes(Cin)
    cp1 = _round_up_lanes(C1)
    cp2 = _round_up_lanes(C2)
    count = N * H * W

    # NCHW -> NHWC, channels padded to the 128-lane width (one cheap XLA op).
    x = jnp.transpose(x_nchw, (0, 2, 3, 1)).astype(act_dtype)
    x = jnp.pad(x, ((0, 0), (0, 0), (0, 0), (0, cpi - Cin)))

    w1p = _prep_weight(w1, cpi, cp1, compute_dtype)
    w2p = _prep_weight(w2, cp1, cp2, compute_dtype)

    # ---- layer 1: conv + fused BN statistics (no input activation) ----
    ident_s = jnp.ones((1, cpi), jnp.float32)
    ident_b = jnp.zeros((1, cpi), jnp.float32)
    y1, st1 = _fused_conv(x, w1p, ident_s, ident_b, apply_act=False,
                          out_dtype=act_dtype, compute_dtype=compute_dtype)
    s1, o1 = _fold_bn(st1, _pad_vec(g1, cp1), _pad_vec(b1, cp1), count)

    # ---- layer 2: BN1+ReLU folded into conv2's prologue, + fused stats ----
    y2, st2 = _fused_conv(y1, w2p, s1.reshape(1, cp1), o1.reshape(1, cp1),
                          apply_act=True,
                          out_dtype=act_dtype, compute_dtype=compute_dtype)
    s2, o2 = _fold_bn(st2, _pad_vec(g2, cp2), _pad_vec(b2, cp2), count)

    # ---- final BN2 + ReLU, fused by XLA with the slice + NCHW transpose ----
    out = jnp.maximum(y2.astype(jnp.float32) * s2 + o2, 0.0)
    out = out[..., :C2]                                    # drop lane padding
    return jnp.transpose(out, (0, 3, 1, 2))                # -> NCHW, f32


# ------------------------- pure-JAX reference -------------------------------

def ref_double_conv(x_nchw, params):
    x = x_nchw.astype(jnp.float32)
    for w_oihw, gamma, beta in params:
        y = jax.lax.conv_general_dilated(
            x, w_oihw.astype(jnp.float32), window_strides=(1, 1),
            padding=((1, 1), (1, 1)),
            dimension_numbers=("NCHW", "OIHW", "NCHW"))
        mean = jnp.mean(y, axis=(0, 2, 3), keepdims=True)
        var = jnp.var(y, axis=(0, 2, 3), keepdims=True)
        y = (y - mean) / jnp.sqrt(var + EPS)
        y = y * gamma.reshape(1, -1, 1, 1) + beta.reshape(1, -1, 1, 1)
        x = jnp.maximum(y, 0.0)
    return x


# --------------------------------- main --------------------------------------

if __name__ == "__main__":
    in_channels, out_channels = 4, 8
    N, H, W = 2, 16, 16

    key = jax.random.PRNGKey(0)
    kx, kw1, kw2, kg1, kb1, kg2, kb2 = jax.random.split(key, 7)

    x = jax.random.normal(kx, (N, in_channels, H, W), dtype=jnp.float32)

    w1 = 0.1 * jax.random.normal(kw1, (out_channels, in_channels, 3, 3),
                                 dtype=jnp.float32)
    w2 = 0.1 * jax.random.normal(kw2, (out_channels, out_channels, 3, 3),
                                 dtype=jnp.float32)
    # Non-trivial BN affine parameters to exercise the fused scale/bias paths.
    g1 = 1.0 + 0.1 * jax.random.normal(kg1, (out_channels,), dtype=jnp.float32)
    b1 = 0.1 * jax.random.normal(kb1, (out_channels,), dtype=jnp.float32)
    g2 = 1.0 + 0.1 * jax.random.normal(kg2, (out_channels,), dtype=jnp.float32)
    b2 = 0.1 * jax.random.normal(kb2, (out_channels,), dtype=jnp.float32)

    params = ((w1, g1, b1), (w2, g2, b2))

    out = jax.block_until_ready(jax.jit(double_conv)(x, params))
    ref = jax.block_until_ready(ref_double_conv(x, params))

    assert out.shape == (N, out_channels, H, W), out.shape
    assert jnp.allclose(out, ref, atol=2e-3, rtol=2e-3), (
        float(jnp.max(jnp.abs(out - ref))))

    print("KERNEL_OK")
</pallas_src>

<mosaic_0001>
module attributes {stable_mosaic.version = 11 : i64} {
  func.func @_fused_conv_kernel(%arg0: i32, %arg1: memref<1x16x16x128xf32, #tpu.memory_space<vmem>>, %arg2: memref<3x384x128xf32, #tpu.memory_space<vmem>>, %arg3: memref<1x128xf32, #tpu.memory_space<vmem>>, %arg4: memref<1x128xf32, #tpu.memory_space<vmem>>, %arg5: memref<1x16x16x128xf32, #tpu.memory_space<vmem>>, %arg6: memref<1x2x128xf32, #tpu.memory_space<vmem>>, %arg7: memref<18x16x384xf32, #tpu.memory_space<vmem>>) attributes {dimension_semantics = [#tpu.dimension_semantics<parallel>], iteration_bounds = array<i64: 2>, scalar_prefetch = 0 : i64, scratch_operands = 1 : i64, tpu.core_type = #tpu.core_type<tc>, window_params = [{transform_indices = @transform_0, window_bounds = array<i64: 1, 16, 16, 128>}, {pipeline_mode = #tpu.pipeline_mode<synchronous>, transform_indices = @transform_1, window_bounds = array<i64: 3, 384, 128>}, {pipeline_mode = #tpu.pipeline_mode<synchronous>, transform_indices = @transform_2, window_bounds = array<i64: 1, 128>}, {pipeline_mode = #tpu.pipeline_mode<synchronous>, transform_indices = @transform_3, window_bounds = array<i64: 1, 128>}, {transform_indices = @transform_4, window_bounds = array<i64: 1, 16, 16, 128>}, {transform_indices = @transform_5, window_bounds = array<i64: 1, 2, 128>}]} {
    %c0 = arith.constant 0 : index
    %c0_0 = arith.constant 0 : index
    %c0_1 = arith.constant 0 : index
    %c0_2 = arith.constant 0 : index
    %0 = vector.load %arg1[%c0, %c0_0, %c0_1, %c0_2] : memref<1x16x16x128xf32, #tpu.memory_space<vmem>>, vector<1x16x16x128xf32>
    %1 = vector.shape_cast %0 : vector<1x16x16x128xf32> to vector<16x16x128xf32>
    %cst = arith.constant 0.000000e+00 : f32
    %2 = vector.broadcast %cst : f32 to vector<1x16x384xf32>
    %c0_3 = arith.constant 0 : index
    %c0_4 = arith.constant 0 : index
    %c0_5 = arith.constant 0 : index
    %3 = vector.load %arg7[%c0_3, %c0_4, %c0_5] : memref<18x16x384xf32, #tpu.memory_space<vmem>>, vector<1x16x384xf32>
    tpu.vector_store %arg7[%c0_3, %c0_4, %c0_5], %2 {strides = array<i32>} : memref<18x16x384xf32, #tpu.memory_space<vmem>>, vector<1x16x384xf32>,
    %c17 = arith.constant 17 : index
    %c0_6 = arith.constant 0 : index
    %c0_7 = arith.constant 0 : index
    %4 = vector.load %arg7[%c17, %c0_6, %c0_7] : memref<18x16x384xf32, #tpu.memory_space<vmem>>, vector<1x16x384xf32>
    tpu.vector_store %arg7[%c17, %c0_6, %c0_7], %2 {strides = array<i32>} : memref<18x16x384xf32, #tpu.memory_space<vmem>>, vector<1x16x384xf32>,
    %cst_8 = arith.constant 0.000000e+00 : f32
    %5 = vector.broadcast %cst_8 : f32 to vector<16x1x128xf32>
    %c1 = arith.constant 1 : index
    %c0_9 = arith.constant 0 : index
    %c0_10 = arith.constant 0 : index
    %6 = vector.load %arg7[%c1, %c0_9, %c0_10] : memref<18x16x384xf32, #tpu.memory_space<vmem>>, vector<16x1x128xf32>
    tpu.vector_store %arg7[%c1, %c0_9, %c0_10], %5 {strides = array<i32>} : memref<18x16x384xf32, #tpu.memory_space<vmem>>, vector<16x1x128xf32>,
    %c1_11 = arith.constant 1 : index
    %c15 = arith.constant 15 : index
    %c256 = arith.constant 256 : index
    %7 = vector.load %arg7[%c1_11, %c15, %c256] : memref<18x16x384xf32, #tpu.memory_space<vmem>>, vector<16x1x128xf32>
    tpu.vector_store %arg7[%c1_11, %c15, %c256], %5 {strides = array<i32>} : memref<18x16x384xf32, #tpu.memory_space<vmem>>, vector<16x1x128xf32>,
    %c1_12 = arith.constant 1 : index
    %c0_13 = arith.constant 0 : index
    %c128 = arith.constant 128 : index
    %8 = vector.load %arg7[%c1_12, %c0_13, %c128] : memref<18x16x384xf32, #tpu.memory_space<vmem>>, vector<16x16x128xf32>
    tpu.vector_store %arg7[%c1_12, %c0_13, %c128], %1 {strides = array<i32>} : memref<18x16x384xf32, #tpu.memory_space<vmem>>, vector<16x16x128xf32>,
    %9 = vector.extract_strided_slice %1 {offsets = [0, 0, 0], sizes = [16, 15, 128], strides = [1, 1, 1]} : vector<16x16x128xf32> to vector<16x15x128xf32>
    %c1_14 = arith.constant 1 : index
    %c1_15 = arith.constant 1 : index
    %c0_16 = arith.constant 0 : index
    %10 = vector.load %arg7[%c1_14, %c1_15, %c0_16] : memref<18x16x384xf32, #tpu.memory_space<vmem>>, vector<16x15x128xf32>
    tpu.vector_store %arg7[%c1_14, %c1_15, %c0_16], %9 {strides = array<i32>} : memref<18x16x384xf32, #tpu.memory_space<vmem>>, vector<16x15x128xf32>,
    %11 = vector.extract_strided_slice %1 {offsets = [0, 1, 0], sizes = [16, 15, 128], strides = [1, 1, 1]} : vector<16x16x128xf32> to vector<16x15x128xf32>
    %c1_17 = arith.constant 1 : index
    %c0_18 = arith.constant 0 : index
    %c256_19 = arith.constant 256 : index
    %12 = vector.load %arg7[%c1_17, %c0_18, %c256_19] : memref<18x16x384xf32, #tpu.memory_space<vmem>>, vector<16x15x128xf32>
    tpu.vector_store %arg7[%c1_17, %c0_18, %c256_19], %11 {strides = array<i32>} : memref<18x16x384xf32, #tpu.memory_space<vmem>>, vector<16x15x128xf32>,
    %c0_20 = arith.constant 0 : index
    %c0_21 = arith.constant 0 : index
    %c0_22 = arith.constant 0 : index
    %13 = vector.load %arg7[%c0_20, %c0_21, %c0_22] : memref<18x16x384xf32, #tpu.memory_space<vmem>>, vector<16x16x384xf32>
    %c0_23 = arith.constant 0 : index
    %c0_24 = arith.constant 0 : index
    %c0_25 = arith.constant 0 : index
    %14 = vector.load %arg2[%c0_23, %c0_24, %c0_25] : memref<3x384x128xf32, #tpu.memory_space<vmem>>, vector<1x384x128xf32>
    %15 = vector.shape_cast %14 : vector<1x384x128xf32> to vector<384x128xf32>
    %cst_26 = arith.constant dense<0.000000e+00> : vector<16x16x128xf32>
    %16 = tpu.matmul %13, %15, %cst_26 {dimension_numbers = #tpu.dot_dimension_numbers<[2], [0], [0, 1], [1], [0, 0, 0, 1, 1, 1], [], []>} : vector<16x16x384xf32>, vector<384x128xf32>, vector<16x16x128xf32> -> vector<16x16x128xf32>
    %c1_27 = arith.constant 1 : index
    %c0_28 = arith.constant 0 : index
    %c0_29 = arith.constant 0 : index
    %17 = vector.load %arg7[%c1_27, %c0_28, %c0_29] : memref<18x16x384xf32, #tpu.memory_space<vmem>>, vector<16x16x384xf32>
    %c1_30 = arith.constant 1 : index
    %c0_31 = arith.constant 0 : index
    %c0_32 = arith.constant 0 : index
    %18 = vector.load %arg2[%c1_30, %c0_31, %c0_32] : memref<3x384x128xf32, #tpu.memory_space<vmem>>, vector<1x384x128xf32>
    %19 = vector.shape_cast %18 : vector<1x384x128xf32> to vector<384x128xf32>
    %cst_33 = arith.constant dense<0.000000e+00> : vector<16x16x128xf32>
    %20 = tpu.matmul %17, %19, %cst_33 {dimension_numbers = #tpu.dot_dimension_numbers<[2], [0], [0, 1], [1], [0, 0, 0, 1, 1, 1], [], []>} : vector<16x16x384xf32>, vector<384x128xf32>, vector<16x16x128xf32> -> vector<16x16x128xf32>
    %21 = arith.addf %16, %20 : vector<16x16x128xf32>
    %c2 = arith.constant 2 : index
    %c0_34 = arith.constant 0 : index
    %c0_35 = arith.constant 0 : index
    %22 = vector.load %arg7[%c2, %c0_34, %c0_35] : memref<18x16x384xf32, #tpu.memory_space<vmem>>, vector<16x16x384xf32>
    %c2_36 = arith.constant 2 : index
    %c0_37 = arith.constant 0 : index
    %c0_38 = arith.constant 0 : index
    %23 = vector.load %arg2[%c2_36, %c0_37, %c0_38] : memref<3x384x128xf32, #tpu.memory_space<vmem>>, vector<1x384x128xf32>
    %24 = vector.shape_cast %23 : vector<1x384x128xf32> to vector<384x128xf32>
    %cst_39 = arith.constant dense<0.000000e+00> : vector<16x16x128xf32>
    %25 = tpu.matmul %22, %24, %cst_39 {dimension_numbers = #tpu.dot_dimension_numbers<[2], [0], [0, 1], [1], [0, 0, 0, 1, 1, 1], [], []>} : vector<16x16x384xf32>, vector<384x128xf32>, vector<16x16x128xf32> -> vector<16x16x128xf32>
    %26 = arith.addf %21, %25 : vector<16x16x128xf32>
    %c0_40 = arith.constant 0 : index
    %c0_41 = arith.constant 0 : index
    %c0_42 = arith.constant 0 : index
    %c0_43 = arith.constant 0 : index
    %27 = vector.load %arg5[%c0_40, %c0_41, %c0_42, %c0_43] : memref<1x16x16x128xf32, #tpu.memory_space<vmem>>, vector<1x16x16x128xf32>
    %28 = vector.shape_cast %27 : vector<1x16x16x128xf32> to vector<16x16x128xf32>
    %29 = vector.shape_cast %26 : vector<16x16x128xf32> to vector<1x16x16x128xf32>
    tpu.vector_store %arg5[%c0_40, %c0_41, %c0_42, %c0_43], %29 {strides = array<i32>} : memref<1x16x16x128xf32, #tpu.memory_space<vmem>>, vector<1x16x16x128xf32>,
    %cst_44 = arith.constant dense<0.000000e+00> : vector<128xf32>
    %30 = vector.multi_reduction <add>, %26, %cst_44 [0, 1] : vector<16x16x128xf32> to vector<128xf32>
    %31 = vector.shape_cast %30 : vector<128xf32> to vector<1x128xf32>
    %32 = arith.mulf %26, %26 : vector<16x16x128xf32>
    %cst_45 = arith.constant dense<0.000000e+00> : vector<128xf32>
    %33 = vector.multi_reduction <add>, %32, %cst_45 [0, 1] : vector<16x16x128xf32> to vector<128xf32>
    %34 = vector.shape_cast %33 : vector<128xf32> to vector<1x128xf32>
    %35 = tpu.concatenate %31, %34 in 0 : vector<1x128xf32>, vector<1x128xf32> -> vector<2x128xf32>
    %c0_46 = arith.constant 0 : index
    %c0_47 = arith.constant 0 : index
    %c0_48 = arith.constant 0 : index
    %36 = vector.load %arg6[%c0_46, %c0_47, %c0_48] : memref<1x2x128xf32, #tpu.memory_space<vmem>>, vector<1x2x128xf32>
    %37 = vector.shape_cast %36 : vector<1x2x128xf32> to vector<2x128xf32>
    %38 = vector.shape_cast %35 : vector<2x128xf32> to vector<1x2x128xf32>
    tpu.vector_store %arg6[%c0_46, %c0_47, %c0_48], %38 {strides = array<i32>} : memref<1x2x128xf32, #tpu.memory_space<vmem>>, vector<1x2x128xf32>,
    return
  }
  func.func @transform_0(%arg0: i32) -> (i32, i32, i32, i32) {
    %c0_i32 = arith.constant 0 : i32
    %c0_i32_0 = arith.constant 0 : i32
    %c0_i32_1 = arith.constant 0 : i32
    %c0_i32_2 = arith.constant 0 : i32
    return %arg0, %c0_i32, %c0_i32_0, %c0_i32_1 : i32, i32, i32, i32
  }
  func.func @transform_1(%arg0: i32) -> (i32, i32, i32) {
    %c0_i32 = arith.constant 0 : i32
    %c0_i32_0 = arith.constant 0 : i32
    %c0_i32_1 = arith.constant 0 : i32
    %c0_i32_2 = arith.constant 0 : i32
    return %c0_i32, %c0_i32_0, %c0_i32_1 : i32, i32, i32
  }
  func.func @transform_2(%arg0: i32) -> (i32, i32) {
    %c0_i32 = arith.constant 0 : i32
    %c0_i32_0 = arith.constant 0 : i32
    %c0_i32_1 = arith.constant 0 : i32
    return %c0_i32, %c0_i32_0 : i32, i32
  }
  func.func @transform_3(%arg0: i32) -> (i32, i32) {
    %c0_i32 = arith.constant 0 : i32
    %c0_i32_0 = arith.constant 0 : i32
    %c0_i32_1 = arith.constant 0 : i32
    return %c0_i32, %c0_i32_0 : i32, i32
  }
  func.func @transform_4(%arg0: i32) -> (i32, i32, i32, i32) {
    %c0_i32 = arith.constant 0 : i32
    %c0_i32_0 = arith.constant 0 : i32
    %c0_i32_1 = arith.constant 0 : i32
    %c0_i32_2 = arith.constant 0 : i32
    return %arg0, %c0_i32, %c0_i32_0, %c0_i32_1 : i32, i32, i32, i32
  }
  func.func @transform_5(%arg0: i32) -> (i32, i32, i32) {
    %c0_i32 = arith.constant 0 : i32
    %c0_i32_0 = arith.constant 0 : i32
    %c0_i32_1 = arith.constant 0 : i32
    return %arg0, %c0_i32, %c0_i32_0 : i32, i32, i32
  }
}

module attributes {stable_mosaic.version = 11 : i64} {
  func.func @_fused_conv_kernel(%arg0: i32, %arg1: memref<1x16x16x128xf32, #tpu.memory_space<vmem>>, %arg2: memref<3x384x128xf32, #tpu.memory_space<vmem>>, %arg3: memref<1x128xf32, #tpu.memory_space<vmem>>, %arg4: memref<1x128xf32, #tpu.memory_space<vmem>>, %arg5: memref<1x16x16x128xf32, #tpu.memory_space<vmem>>, %arg6: memref<1x2x128xf32, #tpu.memory_space<vmem>>, %arg7: memref<18x16x384xf32, #tpu.memory_space<vmem>>) attributes {dimension_semantics = [#tpu.dimension_semantics<parallel>], iteration_bounds = array<i64: 2>, scalar_prefetch = 0 : i64, scratch_operands = 1 : i64, tpu.core_type = #tpu.core_type<tc>, window_params = [{transform_indices = @transform_0, window_bounds = array<i64: 1, 16, 16, 128>}, {pipeline_mode = #tpu.pipeline_mode<synchronous>, transform_indices = @transform_1, window_bounds = array<i64: 3, 384, 128>}, {pipeline_mode = #tpu.pipeline_mode<synchronous>, transform_indices = @transform_2, window_bounds = array<i64: 1, 128>}, {pipeline_mode = #tpu.pipeline_mode<synchronous>, transform_indices = @transform_3, window_bounds = array<i64: 1, 128>}, {transform_indices = @transform_4, window_bounds = array<i64: 1, 16, 16, 128>}, {transform_indices = @transform_5, window_bounds = array<i64: 1, 2, 128>}]} {
    %c0 = arith.constant 0 : index
    %c0_0 = arith.constant 0 : index
    %c0_1 = arith.constant 0 : index
    %c0_2 = arith.constant 0 : index
    %0 = vector.load %arg1[%c0, %c0_0, %c0_1, %c0_2] : memref<1x16x16x128xf32, #tpu.memory_space<vmem>>, vector<1x16x16x128xf32>
    %1 = vector.shape_cast %0 : vector<1x16x16x128xf32> to vector<16x16x128xf32>
    %c0_3 = arith.constant 0 : index
    %c0_4 = arith.constant 0 : index
    %2 = vector.load %arg3[%c0_3, %c0_4] : memref<1x128xf32, #tpu.memory_space<vmem>>, vector<1x128xf32>
    %3 = vector.shape_cast %2 : vector<1x128xf32> to vector<1x1x128xf32>
    %c0_5 = arith.constant 0 : index
    %c0_6 = arith.constant 0 : index
    %4 = vector.load %arg4[%c0_5, %c0_6] : memref<1x128xf32, #tpu.memory_space<vmem>>, vector<1x128xf32>
    %5 = vector.shape_cast %4 : vector<1x128xf32> to vector<1x1x128xf32>
    %6 = vector.broadcast %3 : vector<1x1x128xf32> to vector<16x16x128xf32>
    %7 = arith.mulf %1, %6 : vector<16x16x128xf32>
    %8 = vector.broadcast %5 : vector<1x1x128xf32> to vector<16x16x128xf32>
    %9 = arith.addf %7, %8 : vector<16x16x128xf32>
    %cst = arith.constant 0.000000e+00 : f32
    %10 = vector.broadcast %cst : f32 to vector<16x16x128xf32>
    %11 = arith.maximumf %9, %10 : vector<16x16x128xf32>
    %cst_7 = arith.constant 0.000000e+00 : f32
    %12 = vector.broadcast %cst_7 : f32 to vector<1x16x384xf32>
    %c0_8 = arith.constant 0 : index
    %c0_9 = arith.constant 0 : index
    %c0_10 = arith.constant 0 : index
    %13 = vector.load %arg7[%c0_8, %c0_9, %c0_10] : memref<18x16x384xf32, #tpu.memory_space<vmem>>, vector<1x16x384xf32>
    tpu.vector_store %arg7[%c0_8, %c0_9, %c0_10], %12 {strides = array<i32>} : memref<18x16x384xf32, #tpu.memory_space<vmem>>, vector<1x16x384xf32>,
    %c17 = arith.constant 17 : index
    %c0_11 = arith.constant 0 : index
    %c0_12 = arith.constant 0 : index
    %14 = vector.load %arg7[%c17, %c0_11, %c0_12] : memref<18x16x384xf32, #tpu.memory_space<vmem>>, vector<1x16x384xf32>
    tpu.vector_store %arg7[%c17, %c0_11, %c0_12], %12 {strides = array<i32>} : memref<18x16x384xf32, #tpu.memory_space<vmem>>, vector<1x16x384xf32>,
    %cst_13 = arith.constant 0.000000e+00 : f32
    %15 = vector.broadcast %cst_13 : f32 to vector<16x1x128xf32>
    %c1 = arith.constant 1 : index
    %c0_14 = arith.constant 0 : index
    %c0_15 = arith.constant 0 : index
    %16 = vector.load %arg7[%c1, %c0_14, %c0_15] : memref<18x16x384xf32, #tpu.memory_space<vmem>>, vector<16x1x128xf32>
    tpu.vector_store %arg7[%c1, %c0_14, %c0_15], %15 {strides = array<i32>} : memref<18x16x384xf32, #tpu.memory_space<vmem>>, vector<16x1x128xf32>,
    %c1_16 = arith.constant 1 : index
    %c15 = arith.constant 15 : index
    %c256 = arith.constant 256 : index
    %17 = vector.load %arg7[%c1_16, %c15, %c256] : memref<18x16x384xf32, #tpu.memory_space<vmem>>, vector<16x1x128xf32>
    tpu.vector_store %arg7[%c1_16, %c15, %c256], %15 {strides = array<i32>} : memref<18x16x384xf32, #tpu.memory_space<vmem>>, vector<16x1x128xf32>,
    %c1_17 = arith.constant 1 : index
    %c0_18 = arith.constant 0 : index
    %c128 = arith.constant 128 : index
    %18 = vector.load %arg7[%c1_17, %c0_18, %c128] : memref<18x16x384xf32, #tpu.memory_space<vmem>>, vector<16x16x128xf32>
    tpu.vector_store %arg7[%c1_17, %c0_18, %c128], %11 {strides = array<i32>} : memref<18x16x384xf32, #tpu.memory_space<vmem>>, vector<16x16x128xf32>,
    %19 = vector.extract_strided_slice %11 {offsets = [0, 0, 0], sizes = [16, 15, 128], strides = [1, 1, 1]} : vector<16x16x128xf32> to vector<16x15x128xf32>
    %c1_19 = arith.constant 1 : index
    %c1_20 = arith.constant 1 : index
    %c0_21 = arith.constant 0 : index
    %20 = vector.load %arg7[%c1_19, %c1_20, %c0_21] : memref<18x16x384xf32, #tpu.memory_space<vmem>>, vector<16x15x128xf32>
    tpu.vector_store %arg7[%c1_19, %c1_20, %c0_21], %19 {strides = array<i32>} : memref<18x16x384xf32, #tpu.memory_space<vmem>>, vector<16x15x128xf32>,
    %21 = vector.extract_strided_slice %11 {offsets = [0, 1, 0], sizes = [16, 15, 128], strides = [1, 1, 1]} : vector<16x16x128xf32> to vector<16x15x128xf32>
    %c1_22 = arith.constant 1 : index
    %c0_23 = arith.constant 0 : index
    %c256_24 = arith.constant 256 : index
    %22 = vector.load %arg7[%c1_22, %c0_23, %c256_24] : memref<18x16x384xf32, #tpu.memory_space<vmem>>, vector<16x15x128xf32>
    tpu.vector_store %arg7[%c1_22, %c0_23, %c256_24], %21 {strides = array<i32>} : memref<18x16x384xf32, #tpu.memory_space<vmem>>, vector<16x15x128xf32>,
    %c0_25 = arith.constant 0 : index
    %c0_26 = arith.constant 0 : index
    %c0_27 = arith.constant 0 : index
    %23 = vector.load %arg7[%c0_25, %c0_26, %c0_27] : memref<18x16x384xf32, #tpu.memory_space<vmem>>, vector<16x16x384xf32>
    %c0_28 = arith.constant 0 : index
    %c0_29 = arith.constant 0 : index
    %c0_30 = arith.constant 0 : index
    %24 = vector.load %arg2[%c0_28, %c0_29, %c0_30] : memref<3x384x128xf32, #tpu.memory_space<vmem>>, vector<1x384x128xf32>
    %25 = vector.shape_cast %24 : vector<1x384x128xf32> to vector<384x128xf32>
    %cst_31 = arith.constant dense<0.000000e+00> : vector<16x16x128xf32>
    %26 = tpu.matmul %23, %25, %cst_31 {dimension_numbers = #tpu.dot_dimension_numbers<[2], [0], [0, 1], [1], [0, 0, 0, 1, 1, 1], [], []>} : vector<16x16x384xf32>, vector<384x128xf32>, vector<16x16x128xf32> -> vector<16x16x128xf32>
    %c1_32 = arith.constant 1 : index
    %c0_33 = arith.constant 0 : index
    %c0_34 = arith.constant 0 : index
    %27 = vector.load %arg7[%c1_32, %c0_33, %c0_34] : memref<18x16x384xf32, #tpu.memory_space<vmem>>, vector<16x16x384xf32>
    %c1_35 = arith.constant 1 : index
    %c0_36 = arith.constant 0 : index
    %c0_37 = arith.constant 0 : index
    %28 = vector.load %arg2[%c1_35, %c0_36, %c0_37] : memref<3x384x128xf32, #tpu.memory_space<vmem>>, vector<1x384x128xf32>
    %29 = vector.shape_cast %28 : vector<1x384x128xf32> to vector<384x128xf32>
    %cst_38 = arith.constant dense<0.000000e+00> : vector<16x16x128xf32>
    %30 = tpu.matmul %27, %29, %cst_38 {dimension_numbers = #tpu.dot_dimension_numbers<[2], [0], [0, 1], [1], [0, 0, 0, 1, 1, 1], [], []>} : vector<16x16x384xf32>, vector<384x128xf32>, vector<16x16x128xf32> -> vector<16x16x128xf32>
    %31 = arith.addf %26, %30 : vector<16x16x128xf32>
    %c2 = arith.constant 2 : index
    %c0_39 = arith.constant 0 : index
    %c0_40 = arith.constant 0 : index
    %32 = vector.load %arg7[%c2, %c0_39, %c0_40] : memref<18x16x384xf32, #tpu.memory_space<vmem>>, vector<16x16x384xf32>
    %c2_41 = arith.constant 2 : index
    %c0_42 = arith.constant 0 : index
    %c0_43 = arith.constant 0 : index
    %33 = vector.load %arg2[%c2_41, %c0_42, %c0_43] : memref<3x384x128xf32, #tpu.memory_space<vmem>>, vector<1x384x128xf32>
    %34 = vector.shape_cast %33 : vector<1x384x128xf32> to vector<384x128xf32>
    %cst_44 = arith.constant dense<0.000000e+00> : vector<16x16x128xf32>
    %35 = tpu.matmul %32, %34, %cst_44 {dimension_numbers = #tpu.dot_dimension_numbers<[2], [0], [0, 1], [1], [0, 0, 0, 1, 1, 1], [], []>} : vector<16x16x384xf32>, vector<384x128xf32>, vector<16x16x128xf32> -> vector<16x16x128xf32>
    %36 = arith.addf %31, %35 : vector<16x16x128xf32>
    %c0_45 = arith.constant 0 : index
    %c0_46 = arith.constant 0 : index
    %c0_47 = arith.constant 0 : index
    %c0_48 = arith.constant 0 : index
    %37 = vector.load %arg5[%c0_45, %c0_46, %c0_47, %c0_48] : memref<1x16x16x128xf32, #tpu.memory_space<vmem>>, vector<1x16x16x128xf32>
    %38 = vector.shape_cast %37 : vector<1x16x16x128xf32> to vector<16x16x128xf32>
    %39 = vector.shape_cast %36 : vector<16x16x128xf32> to vector<1x16x16x128xf32>
    tpu.vector_store %arg5[%c0_45, %c0_46, %c0_47, %c0_48], %39 {strides = array<i32>} : memref<1x16x16x128xf32, #tpu.memory_space<vmem>>, vector<1x16x16x128xf32>,
    %cst_49 = arith.constant dense<0.000000e+00> : vector<128xf32>
    %40 = vector.multi_reduction <add>, %36, %cst_49 [0, 1] : vector<16x16x128xf32> to vector<128xf32>
    %41 = vector.shape_cast %40 : vector<128xf32> to vector<1x128xf32>
    %42 = arith.mulf %36, %36 : vector<16x16x128xf32>
    %cst_50 = arith.constant dense<0.000000e+00> : vector<128xf32>
    %43 = vector.multi_reduction <add>, %42, %cst_50 [0, 1] : vector<16x16x128xf32> to vector<128xf32>
    %44 = vector.shape_cast %43 : vector<128xf32> to vector<1x128xf32>
    %45 = tpu.concatenate %41, %44 in 0 : vector<1x128xf32>, vector<1x128xf32> -> vector<2x128xf32>
    %c0_51 = arith.constant 0 : index
    %c0_52 = arith.constant 0 : index
    %c0_53 = arith.constant 0 : index
    %46 = vector.load %arg6[%c0_51, %c0_52, %c0_53] : memref<1x2x128xf32, #tpu.memory_space<vmem>>, vector<1x2x128xf32>
    %47 = vector.shape_cast %46 : vector<1x2x128xf32> to vector<2x128xf32>
    %48 = vector.shape_cast %45 : vector<2x128xf32> to vector<1x2x128xf32>
    tpu.vector_store %arg6[%c0_51, %c0_52, %c0_53], %48 {strides = array<i32>} : memref<1x2x128xf32, #tpu.memory_space<vmem>>, vector<1x2x128xf32>,
    return
  }
  func.func @transform_0(%arg0: i32) -> (i32, i32, i32, i32) {
    %c0_i32 = arith.constant 0 : i32
    %c0_i32_0 = arith.constant 0 : i32
    %c0_i32_1 = arith.constant 0 : i32
    %c0_i32_2 = arith.constant 0 : i32
    return %arg0, %c0_i32, %c0_i32_0, %c0_i32_1 : i32, i32, i32, i32
  }
  func.func @transform_1(%arg0: i32) -> (i32, i32, i32) {
    %c0_i32 = arith.constant 0 : i32
    %c0_i32_0 = arith.constant 0 : i32
    %c0_i32_1 = arith.constant 0 : i32
    %c0_i32_2 = arith.constant 0 : i32
    return %c0_i32, %c0_i32_0, %c0_i32_1 : i32, i32, i32
  }
  func.func @transform_2(%arg0: i32) -> (i32, i32) {
    %c0_i32 = arith.constant 0 : i32
    %c0_i32_0 = arith.constant 0 : i32
    %c0_i32_1 = arith.constant 0 : i32
    return %c0_i32, %c0_i32_0 : i32, i32
  }
  func.func @transform_3(%arg0: i32) -> (i32, i32) {
    %c0_i32 = arith.constant 0 : i32
    %c0_i32_0 = arith.constant 0 : i32
    %c0_i32_1 = arith.constant 0 : i32
    return %c0_i32, %c0_i32_0 : i32, i32
  }
  func.func @transform_4(%arg0: i32) -> (i32, i32, i32, i32) {
    %c0_i32 = arith.constant 0 : i32
    %c0_i32_0 = arith.constant 0 : i32
    %c0_i32_1 = arith.constant 0 : i32
    %c0_i32_2 = arith.constant 0 : i32
    return %arg0, %c0_i32, %c0_i32_0, %c0_i32_1 : i32, i32, i32, i32
  }
  func.func @transform_5(%arg0: i32) -> (i32, i32, i32) {
    %c0_i32 = arith.constant 0 : i32
    %c0_i32_0 = arith.constant 0 : i32
    %c0_i32_1 = arith.constant 0 : i32
    return %arg0, %c0_i32, %c0_i32_0 : i32, i32, i32
  }
}

</mosaic_0001>

<bundles_post_ra>
// kernel: double_conv.2
= control target key start
LH: loop header
LB: loop body
LE: loop exit
PB: predicated region body
PF: predicated region fallthrough
CT: control target
= control target key end

     0   :  { %s3459_s18 = smov 0   ;;  %s4974_s0 = inlined_call_operand.vmem [shape: f32[2,16,16,128], index: 0, kind: input, shape index: {}]   ;;  %s4975_s1 = inlined_call_operand.vmem [shape: f32[3,384,128], index: 1, kind: input, shape index: {}]   ;;  %s4976_s2 = inlined_call_operand.vmem [shape: f32[1,128], index: 2, kind: input, shape index: {}]   ;;  %s4977_s3 = inlined_call_operand.vmem [shape: f32[1,128], index: 3, kind: input, shape index: {}]   ;;  %s4978_s4 = inlined_call_operand.vmem [shape: f32[2,16,16,128], index: 4, kind: output, shape index: {0}]   ;;  %s4979_s5 = inlined_call_operand.vmem [shape: f32[2,2,128], index: 5, kind: output, shape index: {1}]  }
   0x1 LB: > { %s2647_s2 = sadd.s32 4294967295, %s3425_s18   ;;  %p2651_p0 = scmp.ge.s32.totalorder %s3425_s18, 1  ;;  %s3425_s18 = sphi %s3459_s18, %s16_s18  }
   0x2   : > { %p190_p1 = scmp.lt.s32.totalorder %s3425_s18, 3 }
   0x4   : > { %p191_p2 = pnand %p2651_p0, %p190_p1 }
   0x6   : > { %194 = sbr.rel (%p191_p2) target bundleno = 615 (0x267), region = 36 }
   0xd   : > { %v2657_v0 = vld [vmem:[%s4975_s1 + $0x180] sm:$0xff]  ;;  %v2658_v1 = vld [vmem:[%s4975_s1 + $0x188] sm:$0xff]  ;;  %p222_p3 = scmp.lt.s32.totalorder %s2647_s2, 1  ;;  %v4980_v3 = vmov 0.0|0.0   ;;  %v2659_v6 = vld [vmem:[%s4975_s1 + $0x190] sm:$0xff]  ;;  %v3428_v11 = vmov 0.0  }
   0xe   : > { %v2689_v2 = vld [vmem:[%s4975_s1 + $0x280] sm:$0xff]  ;;  %3141 = vmatprep.subr.bf16.mxu0 %v4980_v3  ;;  %v3142_v4 = vpack.c.bf16 %v2658_v1, %v2657_v0  ;;  %v2690_v5 = vld [vmem:[%s4975_s1 + $0x288] sm:$0xff]  ;;  %v2660_v7 = vld [vmem:[%s4975_s1 + $0x198] sm:$0xff]  ;;  %298 = vst [vmem:[#allocation2 + $0x5f] sm:$0x1] %v3428_v11  ;;  %vm491_vm0 = vcmask 1046528  }
   0xf   : > { %v3189_v8 = vpack.c.bf16 %v2690_v5, %v2689_v2  ;;  %v2691_v9 = vld [vmem:[%s4975_s1 + $0x290] sm:$0xff]  ;;  %v2692_v10 = vld [vmem:[%s4975_s1 + $0x298] sm:$0xff]  ;;  %s5016_s2 = smov (!%p222_p3, %s2647_s2), 1  ;;  %268 = vst [vmem:[#allocation2] sm:$0xff] %v3428_v11  ;;  %282 = vst [vmem:[#allocation2 + $0x30] sm:$0x1] %v3428_v11  ;;  %v3145_v12 = vpack.c.bf16 %v2660_v7, %v2659_v6 }
  0x10   : > { %283 = vst [vmem:[#allocation2 + $0x60] sm:$0x1] %v3428_v11  ;;  %284 = vst [vmem:[#allocation2 + $0x90] sm:$0x1] %v3428_v11  ;;  %3143 = vmatpush1.bf16.msra.mxu0 %v3142_v4  ;;  %v3193_v13 = vpack.c.bf16 %v2692_v10, %v2691_v9  ;;  %v2693_v14 = vld [vmem:[%s4975_s1 + $0x2a0] sm:$0xff]  ;;  %v2694_v15 = vld [vmem:[%s4975_s1 + $0x2a8] sm:$0xff] }
  0x11   : > { %285 = vst [vmem:[#allocation2 + $0xc0] sm:$0x1] %v3428_v11  ;;  %286 = vst [vmem:[#allocation2 + $0xf0] sm:$0x1] %v3428_v11  ;;  %3190 = vmatprep.subr.bf16.mxu1 %v3189_v8  ;;  %3144 = vmatprep.subr.bf16.mxu0 %v4980_v3  ;;  %v2661_v16 = vld [vmem:[%s4975_s1 + $0x1a0] sm:$0xff]  ;;  %v2662_v17 = vld [vmem:[%s4975_s1 + $0x1a8] sm:$0xff]  ;;  %v3197_v18 = vpack.c.bf16 %v2694_v15, %v2693_v14 }
  0x12   : > { %287 = vst [vmem:[#allocation2 + $0x120] sm:$0x1] %v3428_v11  ;;  %288 = vst [vmem:[#allocation2 + $0x150] sm:$0x1] %v3428_v11  ;;  %3192 = vmatpush3.bf16.msra.mxu1 %v3189_v8  ;;  %s2755_s17 = sshll.u32 %s5016_s2, 8  ;;  %v3148_v19 = vpack.c.bf16 %v2662_v17, %v2661_v16  ;;  %v2695_v20 = vld [vmem:[%s4975_s1 + $0x2b0] sm:$0xff] }
  0x13   : > { %289 = vst [vmem:[#allocation2 + $0x180] sm:$0x1] %v3428_v11  ;;  %290 = vst [vmem:[#allocation2 + $0x1b0] sm:$0x1] %v3428_v11  ;;  %3194 = vmatprep.subr.bf16.mxu1 %v3193_v13  ;;  %v2696_v21 = vld [vmem:[%s4975_s1 + $0x2b8] sm:$0xff]  ;;  %v2663_v22 = vld [vmem:[%s4975_s1 + $0x1b0] sm:$0xff]  ;;  %s3526_s28 = scalar_lea.vmem %s4974_s0, %s2755_s17  ;;  %s4894_s24 = scalar_lea.vmem %s4978_s4, %s2755_s17 }
  0x14   : > { %291 = vst [vmem:[#allocation2 + $0x1e0] sm:$0x1] %v3428_v11  ;;  %292 = vst [vmem:[#allocation2 + $0x210] sm:$0x1] %v3428_v11  ;;  %3146 = vmatpush1.bf16.msra.mxu0 %v3145_v12  ;;  %v2664_v23 = vld [vmem:[%s4975_s1 + $0x1b8] sm:$0xff]  ;;  %v3201_v24 = vpack.c.bf16 %v2696_v21, %v2695_v20  ;;  %v236_v25 = vld [vmem:[%s3526_s28] sm:$0xff] }
  0x15   : > { %293 = vst [vmem:[#allocation2 + $0x240] sm:$0x1] %v3428_v11  ;;  %294 = vst [vmem:[#allocation2 + $0x270] sm:$0x1] %v3428_v11  ;;  %3147 = vmatprep.subr.bf16.mxu0 %v4980_v3  ;;  %v3151_v26 = vpack.c.bf16 %v2664_v23, %v2663_v22  ;;  %v2697_v27 = vld [vmem:[%s4975_s1 + $0x2c0] sm:$0xff]  ;;  %v2698_v28 = vld [vmem:[%s4975_s1 + $0x2c8] sm:$0xff]  ;;  %957 = vmatprep.mubr.f32.mxu0 %v236_v25 }
  0x16   : > { %295 = vst [vmem:[#allocation2 + $0x2a0] sm:$0x1] %v3428_v11  ;;  %296 = vst [vmem:[#allocation2 + $0x2d0] sm:$0x1] %v3428_v11  ;;  %3196 = vmatpush3.bf16.msra.mxu1 %v3193_v13  ;;  %v3536_v29 = vld [vmem:[%s3526_s28 + $0x8] sm:$0xff]  ;;  %v492_v30 = vrot.slane %v236_v25, 1  ;;  %v3557_v40 = vpack.c.bf16 %v2698_v28, %v2697_v27 }
  0x17   : > { %297 = vst [vmem:[#allocation2 + $0x300] sm:$0x1] %v3428_v11  ;;  %299 = vst [vmem:[#allocation2 + $0x8f] sm:$0x1] %v3428_v11  ;;  %3198 = vmatprep.subr.bf16.mxu1 %v3197_v18  ;;  %v379_v31 = vrot.slane %v236_v25, 7  ;;  %vm378_vm1 = vcmask 1040384  }
  0x18   : > { %300 = vst [vmem:[#allocation2 + $0xbf] sm:$0x1] %v3428_v11  ;;  %301 = vst [vmem:[#allocation2 + $0xef] sm:$0x1] %v3428_v11  ;;  %3149 = vmatpush1.bf16.msra.mxu0 %v3148_v19  ;;  %v2665_v32 = vld [vmem:[%s4975_s1 + $0x1c0] sm:$0xff]  ;;  %v2666_v33 = vld [vmem:[%s4975_s1 + $0x1c8] sm:$0xff] }
  0x19   : > { %302 = vst [vmem:[#allocation2 + $0x11f] sm:$0x1] %v3428_v11  ;;  %303 = vst [vmem:[#allocation2 + $0x14f] sm:$0x1] %v3428_v11  ;;  %3150 = vmatprep.subr.bf16.mxu0 %v4980_v3  ;;  %v493_v34 = vrot.slane %v3536_v29, 1  ;;  %v3548_v35 = vld [vmem:[%s3526_s28 + $0x10] sm:$0xff]  ;;  %v3154_v45 = vpack.c.bf16 %v2666_v33, %v2665_v32 }
  0x1a   : > { %304 = vst [vmem:[#allocation2 + $0x17f] sm:$0x1] %v3428_v11  ;;  %305 = vst [vmem:[#allocation2 + $0x1af] sm:$0x1] %v3428_v11  ;;  %v380_v36 = vrot.slane %v3536_v29, 7  ;;  %3200 = vmatpush3.bf16.msra.mxu1 %v3197_v18  ;;  %v3552_v37 = vld [vmem:[%s3526_s28 + $0x18] sm:$0xff] }
  0x1b   : > { %306 = vst [vmem:[#allocation2 + $0x1df] sm:$0x1] %v3428_v11  ;;  %307 = vst [vmem:[#allocation2 + $0x20f] sm:$0x1] %v3428_v11  ;;  %v495_v38 = vrot.slane %v3548_v35, 1  ;;  %v382_v39 = vrot.slane %v3548_v35, 7  ;;  %3202 = vmatprep.subr.bf16.mxu1 %v3201_v24  ;;  %v494_v41 = vsel %vm491_vm0, %v492_v30, %v493_v34 }
  0x1c   : > { %308 = vst [vmem:[#allocation2 + $0x23f] sm:$0x1] %v3428_v11  ;;  %309 = vst [vmem:[#allocation2 + $0x26f] sm:$0x1] %v3428_v11  ;;  %v496_v42 = vrot.slane %v3552_v37, 1  ;;  %v3563_v43 = vld [vmem:[%s3526_s28 + $0x20] sm:$0xff]  ;;  %v3566_v44 = vsel %vm378_vm1, %v379_v31, %v380_v36  ;;  %3152 = vmatpush1.bf16.msra.mxu0 %v3151_v26  ;;  %2933 = vmatprep.mubr.f32.mxu1 %v494_v41 }
  0x1d   : > { %310 = vst [vmem:[#allocation2 + $0x29f] sm:$0x1] %v3428_v11  ;;  %311 = vst [vmem:[#allocation2 + $0x2cf] sm:$0x1] %v3428_v11  ;;  %v2699_v46 = vld [vmem:[%s4975_s1 + $0x2d0] sm:$0xff]  ;;  %v2700_v47 = vld [vmem:[%s4975_s1 + $0x2d8] sm:$0xff]  ;;  %3153 = vmatprep.subr.bf16.mxu0 %v4980_v3 }
  0x1e   : > { %312 = vst [vmem:[#allocation2 + $0x2ff] sm:$0x1] %v3428_v11  ;;  %313 = vst [vmem:[#allocation2 + $0x32f] sm:$0x1] %v3428_v11  ;;  %v3575_v48 = vld [vmem:[%s3526_s28 + $0x28] sm:$0xff]  ;;  %v498_v49 = vrot.slane %v3563_v43, 1  ;;  %v3593_v54 = vsel %vm491_vm0, %v495_v38, %v496_v42  ;;  %3204 = vmatpush3.bf16.msra.mxu1 %v3201_v24  ;;  %v3612_v62 = vpack.c.bf16 %v2700_v47, %v2699_v46 }
  0x1f   : > { %314 = vst [vmem:[#allocation2 + $0x38] sm:$0xff] %v236_v25  ;;  %315 = vst [vmem:[#allocation2 + $0x50] sm:$0xff] %v3536_v29  ;;  %v383_v50 = vrot.slane %v3552_v37, 7  ;;  %v385_v51 = vrot.slane %v3563_v43, 7  ;;  %v3585_v52 = vld [vmem:[%s4975_s1 + $0x1d0] sm:$0xff]  ;;  %v3590_v53 = vld [vmem:[%s4975_s1 + $0x1d8] sm:$0xff]  ;;  %3206 = vmatprep.subr.bf16.mxu1 %v3557_v40 }
  0x20   : > { %316 = vst [vmem:[#allocation2 + $0x68] sm:$0xff] %v3548_v35  ;;  %459 = vst [vmem:[#allocation2 + $0x30] sm:$0xfe] %v379_v31  ;;  %v499_v55 = vrot.slane %v3575_v48, 1  ;;  %v3598_v56 = vld [vmem:[%s3526_s28 + $0x30] sm:$0xff]  ;;  %v386_v57 = vrot.slane %v3575_v48, 7  ;;  %3155 = vmatpush1.bf16.msra.mxu0 %v3154_v45  ;;  %v3157_v6 = vpack.c.bf16 %v3590_v53, %v3585_v52 }
  0x21   : > { %573 = vst [vmem:[#allocation2 + $0x58] sm:$0x7f] %v493_v34  ;;  %317 = vst [vmem:[#allocation2 + $0x80] sm:$0xff] %v3552_v37  ;;  %v3603_v58 = vld [vmem:[%s3526_s28 + $0x38] sm:$0xff]  ;;  %v501_v59 = vrot.slane %v3598_v56, 1  ;;  %v3608_v60 = vsel %vm378_vm1, %v382_v39, %v383_v50  ;;  %v388_v61 = vrot.slane %v3598_v56, 7  ;;  %3156 = vmatprep.subr.bf16.mxu0 %v4980_v3 }
  0x22   : > { %572 = vst [vmem:[#allocation2 + $0x40] sm:$0xff] %v494_v41  ;;  %318 = vst [vmem:[#allocation2 + $0x98] sm:$0xff] %v3563_v43  ;;  %v2701_v63 = vld [vmem:[%s4975_s1 + $0x2e0] sm:$0xff]  ;;  %v2702_v0 = vld [vmem:[%s4975_s1 + $0x2e8] sm:$0xff]  ;;  %v3621_v1 = vsel %vm491_vm0, %v498_v49, %v499_v55  ;;  %v502_v2 = vrot.slane %v3603_v58, 1  ;;  %v3630_v5 = vsel %vm378_vm1, %v385_v51, %v386_v57  ;;  %v389_v9 = vrot.slane %v3603_v58, 7  ;;  %3208 = vmatpush3.bf16.msra.mxu1 %v3557_v40 }
  0x23   : > { %461 = vst [vmem:[#allocation2 + $0x60] sm:$0xfe] %v382_v39  ;;  %575 = vst [vmem:[#allocation2 + $0x88] sm:$0x7f] %v496_v42  ;;  %v3626_v4 = vld [vmem:[%s3526_s28 + $0x40] sm:$0xff]  ;;  %v3636_v7 = vld [vmem:[%s3526_s28 + $0x48] sm:$0xff]  ;;  %v3660_v17 = vpack.c.bf16 %v2702_v0, %v2701_v63  ;;  %3210 = vmatprep.subr.bf16.mxu1 %v3612_v62 }
  0x24   : > { %319 = vst [vmem:[#allocation2 + $0xb0] sm:$0xff] %v3575_v48  ;;  %574 = vst [vmem:[#allocation2 + $0x70] sm:$0xff] %v3593_v54  ;;  %v504_v8 = vrot.slane %v3626_v4, 1  ;;  %v391_v10 = vrot.slane %v3626_v4, 7  ;;  %v2669_v11 = vld [vmem:[%s4975_s1 + $0x1e0] sm:$0xff]  ;;  %v2670_v12 = vld [vmem:[%s4975_s1 + $0x1e8] sm:$0xff]  ;;  %v3651_v13 = vsel %vm491_vm0, %v501_v59, %v502_v2  ;;  %v3669_v20 = vsel %vm378_vm1, %v388_v61, %v389_v9  ;;  %3158 = vmatpush1.bf16.msra.mxu0 %v3157_v6 }
  0x25   : > { %320 = vst [vmem:[#allocation2 + $0xc8] sm:$0xff] %v3598_v56  ;;  %463 = vst [vmem:[#allocation2 + $0x90] sm:$0xfe] %v385_v51  ;;  %v505_v14 = vrot.slane %v3636_v7, 1  ;;  %v3656_v15 = vld [vmem:[%s3526_s28 + $0x50] sm:$0xff]  ;;  %v392_v16 = vrot.slane %v3636_v7, 7  ;;  %v3160_v27 = vpack.c.bf16 %v2670_v12, %v2669_v11  ;;  %3159 = vmatprep.subr.bf16.mxu0 %v4980_v3 }
  0x26   : > { %577 = vst [vmem:[#allocation2 + $0xb8] sm:$0x7f] %v499_v55  ;;  %321 = vst [vmem:[#allocation2 + $0xe0] sm:$0xff] %v3603_v58  ;;  %v3664_v18 = vld [vmem:[%s3526_s28 + $0x58] sm:$0xff]  ;;  %v507_v19 = vrot.slane %v3656_v15, 1  ;;  %v394_v21 = vrot.slane %v3656_v15, 7  ;;  %3212 = vmatpush3.bf16.msra.mxu1 %v3612_v62 }
  0x27   : > { %462 = vst [vmem:[#allocation2 + $0x78] sm:$0xff] %v3608_v60  ;;  %576 = vst [vmem:[#allocation2 + $0xa0] sm:$0xff] %v3621_v1  ;;  %v2703_v22 = vld [vmem:[%s4975_s1 + $0x2f0] sm:$0xff]  ;;  %v3677_v23 = vsel %vm491_vm0, %v504_v8, %v505_v14  ;;  %v508_v24 = vrot.slane %v3664_v18, 1  ;;  %v3683_v25 = vsel %vm378_vm1, %v391_v10, %v392_v16  ;;  %v395_v26 = vrot.slane %v3664_v18, 7  ;;  %v2704_v28 = vld [vmem:[%s4975_s1 + $0x2f8] sm:$0xff]  ;;  %3214 = vmatprep.subr.bf16.mxu1 %v3660_v17 }
  0x28   : > { %322 = vst [vmem:[#allocation2 + $0xf8] sm:$0xff] %v3626_v4  ;;  %464 = vst [vmem:[#allocation2 + $0xa8] sm:$0xff] %v3630_v5  ;;  %v3691_v30 = vld [vmem:[%s3526_s28 + $0x60] sm:$0xff]  ;;  %v3694_v31 = vld [vmem:[%s3526_s28 + $0x68] sm:$0xff]  ;;  %v3217_v45 = vpack.c.bf16 %v2704_v28, %v2703_v22  ;;  %3161 = vmatpush1.bf16.msra.mxu0 %v3160_v27  ;;  %s2656_s17 = sshll.u32 %s5016_s2, 1 }
  0x29   : > { %465 = vst [vmem:[#allocation2 + $0xc0] sm:$0xfe] %v388_v61  ;;  %579 = vst [vmem:[#allocation2 + $0xe8] sm:$0x7f] %v502_v2  ;;  %v2671_v32 = vld [vmem:[%s4975_s1 + $0x1f0] sm:$0xff]  ;;  %v2672_v33 = vld [vmem:[%s4975_s1 + $0x1f8] sm:$0xff]  ;;  %v3705_v34 = vsel %vm491_vm0, %v507_v19, %v508_v24  ;;  %v3712_v39 = vsel %vm378_vm1, %v394_v21, %v395_v26  ;;  %3162 = vmatprep.subr.bf16.mxu0 %v4980_v3  ;;  %s235_s27 = scalar_lea.vmem %s4979_s5, %s2656_s17 }
  0x2a   : > { %323 = vst [vmem:[#allocation2 + $0x110] sm:$0xff] %v3636_v7  ;;  %578 = vst [vmem:[#allocation2 + $0xd0] sm:$0xff] %v3651_v13  ;;  %v510_v36 = vrot.slane %v3691_v30, 1  ;;  %v511_v38 = vrot.slane %v3694_v31, 1  ;;  %v3717_v40 = vld [vmem:[%s3526_s28 + $0x70] sm:$0xff]  ;;  %v397_v41 = vrot.slane %v3691_v30, 7  ;;  %v3163_v51 = vpack.c.bf16 %v2672_v33, %v2671_v32  ;;  %3216 = vmatpush3.bf16.msra.mxu1 %v3660_v17 }
  0x2b   : > { %324 = vst [vmem:[#allocation2 + $0x128] sm:$0xff] %v3656_v15  ;;  %467 = vst [vmem:[#allocation2 + $0xf0] sm:$0xfe] %v391_v10  ;;  %v398_v42 = vrot.slane %v3694_v31, 7  ;;  %v3727_v47 = vld [vmem:[%s3526_s28 + $0x78] sm:$0xff]  ;;  %v513_v49 = vrot.slane %v3717_v40, 1  ;;  %3218 = vmatprep.subr.bf16.mxu1 %v3217_v45 }
  0x2c   : > { %581 = vst [vmem:[#allocation2 + $0x118] sm:$0x7f] %v505_v14  ;;  %325 = vst [vmem:[#allocation2 + $0x140] sm:$0xff] %v3664_v18  ;;  %v3724_v46 = vsel %vm491_vm0, %v510_v36, %v511_v38  ;;  %v400_v50 = vrot.slane %v3717_v40, 7  ;;  %v3735_v52 = vld [vmem:[%s4975_s1 + $0x200] sm:$0xff]  ;;  %v3740_v53 = vld [vmem:[%s4975_s1 + $0x208] sm:$0xff]  ;;  %3164 = vmatpush1.bf16.msra.mxu0 %v3163_v51 }
  0x2d   : > { %466 = vst [vmem:[#allocation2 + $0xd8] sm:$0xff] %v3669_v20  ;;  %580 = vst [vmem:[#allocation2 + $0x100] sm:$0xff] %v3677_v23  ;;  %v514_v55 = vrot.slane %v3727_v47, 1  ;;  %v3746_v57 = vsel %vm378_vm1, %v397_v41, %v398_v42  ;;  %v401_v59 = vrot.slane %v3727_v47, 7  ;;  %v3751_v61 = vld [vmem:[%s3526_s28 + $0x80] sm:$0xff]  ;;  %v3754_v62 = vld [vmem:[%s3526_s28 + $0x88] sm:$0xff]  ;;  %v3166_v10 = vpack.c.bf16 %v3740_v53, %v3735_v52  ;;  %3165 = vmatprep.subr.bf16.mxu0 %v4980_v3 }
  0x2e   : > { %468 = vst [vmem:[#allocation2 + $0x108] sm:$0xff] %v3683_v25  ;;  %469 = vst [vmem:[#allocation2 + $0x120] sm:$0xfe] %v394_v21  ;;  %v3761_v63 = vld [vmem:[%s4975_s1] sm:$0xff]  ;;  %v3766_v0 = vld [vmem:[%s4975_s1 + $0x8] sm:$0xff]  ;;  %v516_v6 = vrot.slane %v3751_v61, 1  ;;  %3220 = vmatpush3.bf16.msra.mxu1 %v3217_v45 }
  0x2f   : > { %583 = vst [vmem:[#allocation2 + $0x148] sm:$0x7f] %v508_v24  ;;  %326 = vst [vmem:[#allocation2 + $0x158] sm:$0xff] %v3691_v30  ;;  %v3769_v2 = vsel %vm491_vm0, %v513_v49, %v514_v55  ;;  %v517_v8 = vrot.slane %v3754_v62, 1  ;;  %v3776_v9 = vsel %vm378_vm1, %v400_v50, %v401_v59  ;;  %v3782_v11 = vld [vmem:[%s3526_s28 + $0x90] sm:$0xff]  ;;  %v3785_v12 = vld [vmem:[%s3526_s28 + $0x98] sm:$0xff]  ;;  %v3222_v26 = vpack.c.bf16 %v3766_v0, %v3761_v63 }
  0x30   : > { %327 = vst [vmem:[#allocation2 + $0x170] sm:$0xff] %v3694_v31  ;;  %582 = vst [vmem:[#allocation2 + $0x130] sm:$0xff] %v3705_v34  ;;  %v403_v14 = vrot.slane %v3751_v61, 7  ;;  %v404_v16 = vrot.slane %v3754_v62, 7  ;;  %v3793_v17 = vld [vmem:[%s4975_s1 + $0x210] sm:$0xff]  ;;  %v519_v21 = vrot.slane %v3782_v11, 1  ;;  %3221 = vmatprep.subr.bf16.mxu1 %v4980_v3  ;;  %3167 = vmatpush1.bf16.msra.mxu0 %v3166_v10 }
  0x31   : > { %470 = vst [vmem:[#allocation2 + $0x138] sm:$0xff] %v3712_v39  ;;  %585 = vst [vmem:[#allocation2 + $0x178] sm:$0x7f] %v511_v38  ;;  %v3796_v19 = vsel %vm491_vm0, %v516_v6, %v517_v8  ;;  %v520_v22 = vrot.slane %v3785_v12, 1  ;;  %v406_v24 = vrot.slane %v3782_v11, 7  ;;  %v3809_v27 = vld [vmem:[%s4975_s1 + $0x218] sm:$0xff]  ;;  %3168 = vmatprep.subr.bf16.mxu0 %v4980_v3 }
  0x32   : > { %328 = vst [vmem:[#allocation2 + $0x188] sm:$0xff] %v3717_v40  ;;  %584 = vst [vmem:[#allocation2 + $0x160] sm:$0xff] %v3724_v46  ;;  %v3813_v28 = vld [vmem:[%s3526_s28 + $0xa0] sm:$0xff]  ;;  %v3816_v32 = vld [vmem:[%s3526_s28 + $0xa8] sm:$0xff]  ;;  %v3819_v33 = vsel %vm378_vm1, %v403_v14, %v404_v16  ;;  %v407_v36 = vrot.slane %v3785_v12, 7  ;;  %v3169_v0 = vpack.c.bf16 %v3809_v27, %v3793_v17 }
  0x33   : > { %329 = vst [vmem:[#allocation2 + $0x1a0] sm:$0xff] %v3727_v47  ;;  %471 = vst [vmem:[#allocation2 + $0x150] sm:$0xfe] %v397_v41  ;;  %v753_v38 = vld [vmem:[#allocation2 + $0x58] sm:$0xff]  ;;  %v3823_v41 = vsel %vm491_vm0, %v519_v21, %v520_v22  ;;  %v522_v42 = vrot.slane %v3813_v28, 1  ;;  %v523_v49 = vrot.slane %v3816_v32, 1 }
  0x34   : > { %472 = vst [vmem:[#allocation2 + $0x168] sm:$0xff] %v3746_v57  ;;  %473 = vst [vmem:[#allocation2 + $0x180] sm:$0xfe] %v400_v50  ;;  %v3830_v50 = vld [vmem:[%s3526_s28 + $0xb0] sm:$0xff]  ;;  %v409_v45 = vrot.slane %v3813_v28, 7  ;;  %v3843_v52 = vld [vmem:[%s4975_s1 + $0x18] sm:$0xff]  ;;  %v3852_v59 = vsel %vm378_vm1, %v406_v24, %v407_v36  ;;  %2934 = vmatmul.mubr.f32.vlgmr.msra.gmra.mrb[0].mxu1 %v753_v38  ;;  %3170 = vmatpush1.bf16.msra.mxu0 %v3169_v0 }
  0x35   : > { %587 = vst [vmem:[#allocation2 + $0x1a8] sm:$0x7f] %v514_v55  ;;  %330 = vst [vmem:[#allocation2 + $0x1b8] sm:$0xff] %v3751_v61  ;;  %v3838_v51 = vld [vmem:[%s4975_s1 + $0x10] sm:$0xff]  ;;  %v3847_v53 = vld [vmem:[%s3526_s28 + $0xb8] sm:$0xff]  ;;  %v525_v55 = vrot.slane %v3830_v50, 1  ;;  %v3858_v6 = vsel %vm491_vm0, %v522_v42, %v523_v49  ;;  %3223 = vmatpush1.bf16.msra.mxu1 %v3222_v26  ;;  %2936 = vmatprep.mubr.f32.mxu1 %v3593_v54 }
  0x36   : > { %331 = vst [vmem:[#allocation2 + $0x1d0] sm:$0xff] %v3754_v62  ;;  %586 = vst [vmem:[#allocation2 + $0x190] sm:$0xff] %v3769_v2  ;;  %v410_v63 = vrot.slane %v3816_v32, 7  ;;  %v3866_v16 = vld [vmem:[%s3526_s28 + $0xc8] sm:$0xff]  ;;  %v412_v10 = vrot.slane %v3830_v50, 7  ;;  %v3874_v17 = vld [vmem:[%s4975_s1 + $0x220] sm:$0xff]  ;;  %v3225_v42 = vpack.c.bf16 %v3843_v52, %v3838_v51 }
  0x37   : > { %474 = vst [vmem:[#allocation2 + $0x198] sm:$0xff] %v3776_v9  ;;  %589 = vst [vmem:[#allocation2 + $0x1d8] sm:$0x7f] %v517_v8  ;;  %v526_v8 = vrot.slane %v3847_v53, 1  ;;  %v3879_v21 = vld [vmem:[%s4975_s1 + $0x228] sm:$0xff]  ;;  %v413_v36 = vrot.slane %v3847_v53, 7 }
  0x38   : > { %332 = vst [vmem:[#allocation2 + $0x1e8] sm:$0xff] %v3782_v11  ;;  %333 = vst [vmem:[#allocation2 + $0x200] sm:$0xff] %v3785_v12  ;;  %v3887_v27 = vsel %vm378_vm1, %v409_v45, %v410_v63  ;;  %v759_v38 = vld [vmem:[#allocation2 + $0x88] sm:$0xff]  ;;  %v3897_v3 = vld [vmem:[%s3526_s28 + $0xd0] sm:$0xff]  ;;  %v416_v54 = vrot.slane %v3866_v16, 7  ;;  %v5003_v26 = vmov 0.0|0.0  }
  0x39   : > { %588 = vst [vmem:[#allocation2 + $0x1c0] sm:$0xff] %v3796_v19  ;;  %475 = vst [vmem:[#allocation2 + $0x1b0] sm:$0xfe] %v403_v14  ;;  %v3863_v14 = vld [vmem:[%s3526_s28 + $0xc0] sm:$0xff]  ;;  %3224 = vmatprep.subr.bf16.mxu1 %v5003_v26  ;;  %v705_v52 = vld [vmem:[%s4975_s1 + $0x28] sm:$0xff]  ;;  %v531_v63 = vrot.slane %v3897_v3, 1  ;;  %2937 = vmatmul.mubr.f32.gmra.mrb[2].mxu1 %v759_v38 }
  0x3a   : > { %591 = vst [vmem:[#allocation2 + $0x208] sm:$0x7f] %v520_v22  ;;  %334 = vst [vmem:[#allocation2 + $0x218] sm:$0xff] %v3813_v28  ;;  %v528_v22 = vrot.slane %v3863_v14, 1  ;;  %v704_v51 = vld [vmem:[%s4975_s1 + $0x20] sm:$0xff]  ;;  %3171 = vmatprep.subr.bf16.mxu0 %v5003_v26  ;;  %v2679_v0 = vld [vmem:[%s4975_s1 + $0x230] sm:$0xff]  ;;  %3226 = vmatpush1.bf16.msra.mxu1 %v3225_v42 }
  0x3b   : > { %335 = vst [vmem:[#allocation2 + $0x230] sm:$0xff] %v3816_v32  ;;  %4998 = vst [vmem:[#allocation3_spill] sm:$0xff] %v3830_v50  ;;  %v3952_v38 = vld [vmem:[%s3526_s28 + $0xf0] sm:$0xff]  ;;  %2939 = vmatprep.mubr.f32.mxu1 %v3621_v1  ;;  %3227 = vmatprep.subr.bf16.mxu1 %v5003_v26  ;;  %v707_v1 = vld [vmem:[%s4975_s1 + $0x38] sm:$0xff] }
  0x3c   : > { %476 = vst [vmem:[#allocation2 + $0x1c8] sm:$0xff] %v3819_v33  ;;  %477 = vst [vmem:[#allocation2 + $0x1e0] sm:$0xfe] %v406_v24  ;;  %v529_v24 = vrot.slane %v3866_v16, 1  ;;  %v706_v42 = vld [vmem:[%s4975_s1 + $0x30] sm:$0xff] }
  0x3d   : > { %590 = vst [vmem:[#allocation2 + $0x1f0] sm:$0xff] %v3823_v41  ;;  %4999 = vst [vmem:[#allocation4_spill] sm:$0xff] %v3847_v53 }
  0x3e   : > { %336 = vst [vmem:[#allocation2 + $0x248] sm:$0xff] %v3830_v50  ;;  %593 = vst [vmem:[#allocation2 + $0x238] sm:$0x7f] %v523_v49  ;;  %v3894_v49 = vsel %vm491_vm0, %v525_v55, %v526_v8  ;;  %v3900_v50 = vld [vmem:[%s3526_s28 + $0xd8] sm:$0xff]  ;;  %v3914_v55 = vsel %vm491_vm0, %v528_v22, %v529_v24  ;;  %v3927_v22 = vld [vmem:[%s3526_s28 + $0xe0] sm:$0xff] }
  0x3f   : > { %337 = vst [vmem:[#allocation2 + $0x260] sm:$0xff] %v3847_v53  ;;  %5000 = vst [vmem:[#allocation5_spill] sm:$0xff] %v3863_v14 }
  0x40   : > { %5001 = vst [vmem:[#allocation6_spill] sm:$0xff] %v3866_v16  ;;  %478 = vst [vmem:[#allocation2 + $0x1f8] sm:$0xff] %v3852_v59 }
  0x41   : > { %479 = vst [vmem:[#allocation2 + $0x210] sm:$0xfe] %v409_v45  ;;  %592 = vst [vmem:[#allocation2 + $0x220] sm:$0xff] %v3858_v6  ;;  %v415_v45 = vrot.slane %v3863_v14, 7 }
  0x42   : > { %338 = vst [vmem:[#allocation2 + $0x278] sm:$0xff] %v3863_v14  ;;  %339 = vst [vmem:[#allocation2 + $0x290] sm:$0xff] %v3866_v16  ;;  %v3921_v16 = vsel %vm378_vm1, %v412_v10, %v413_v36  ;;  %v3172_v14 = vpack.c.bf16 %v3879_v21, %v3874_v17  ;;  %v2680_v17 = vld [vmem:[%s4975_s1 + $0x238] sm:$0xff]  ;;  %v534_v36 = vrot.slane %v3927_v22, 1 }
  0x43   : > { %595 = vst [vmem:[#allocation2 + $0x268] sm:$0x7f] %v526_v8  ;;  %5002 = vst [vmem:[#allocation7_spill] sm:$0xff] %v3897_v3  ;;  %v532_v8 = vrot.slane %v3900_v50, 1  ;;  %v3934_v53 = vsel %vm378_vm1, %v415_v45, %v416_v54  ;;  %v765_v54 = vld [vmem:[#allocation2 + $0xb8] sm:$0xff] }
  0x44   : > { %480 = vst [vmem:[#allocation2 + $0x228] sm:$0xff] %v3887_v27  ;;  %481 = vst [vmem:[#allocation2 + $0x240] sm:$0xfe] %v412_v10  ;;  %v418_v10 = vrot.slane %v3897_v3, 7  ;;  %3173 = vmatpush1.bf16.msra.mxu0 %v3172_v14  ;;  %2940 = vmatmul.mubr.f32.gmra.mrb[4].mxu1 %v765_v54  ;;  %v419_v14 = vrot.slane %v3900_v50, 7  ;;  %v708_v54 = vld [vmem:[%s4975_s1 + $0x40] sm:$0xff] }
  0x45   : > { %594 = vst [vmem:[#allocation2 + $0x250] sm:$0xff] %v3894_v49  ;;  %597 = vst [vmem:[#allocation2 + $0x298] sm:$0x7f] %v529_v24  ;;  %v3930_v24 = vld [vmem:[%s3526_s28 + $0xe8] sm:$0xff]  ;;  %v3945_v21 = vsel %vm491_vm0, %v531_v63, %v532_v8  ;;  %v3958_v63 = vld [vmem:[%s3526_s28 + $0xf8] sm:$0xff]  ;;  %3174 = vmatprep.subr.bf16.mxu0 %v5003_v26  ;;  %2942 = vmatprep.mubr.f32.mxu1 %v3651_v13 }
  0x46   : > { %340 = vst [vmem:[#allocation2 + $0x2a8] sm:$0xff] %v3897_v3  ;;  %341 = vst [vmem:[#allocation2 + $0x2c0] sm:$0xff] %v3900_v50  ;;  %v3228_v3 = vpack.c.bf16 %v705_v52, %v704_v51  ;;  %v538_v52 = vrot.slane %v3958_v63, 1  ;;  %v2683_v13 = vld [vmem:[%s4975_s1 + $0x250] sm:$0xff] }
  0x47   : > { %5004 = vst [vmem:[#allocation8_spill] sm:$0xff] %v3921_v16  ;;  %596 = vst [vmem:[#allocation2 + $0x280] sm:$0xff] %v3914_v55 }
  0x48   : > { %5005 = vst [vmem:[#allocation9_spill] sm:$0xff] %v3927_v22  ;;  %482 = vst [vmem:[#allocation2 + $0x258] sm:$0xff] %v3921_v16  ;;  %v421_v16 = vrot.slane %v3927_v22, 7  ;;  %3229 = vmatpush1.bf16.msra.mxu1 %v3228_v3 }
  0x49   : > { %483 = vst [vmem:[#allocation2 + $0x270] sm:$0xfe] %v415_v45  ;;  %5006 = vst [vmem:[#allocation10_spill] sm:$0xff] %v3934_v53  ;;  %v535_v45 = vrot.slane %v3930_v24, 1  ;;  %3230 = vmatprep.subr.bf16.mxu1 %v5003_v26 }
  0x4a   : > { %599 = vst [vmem:[#allocation2 + $0x2c8] sm:$0x7f] %v532_v8  ;;  %342 = vst [vmem:[#allocation2 + $0x2d8] sm:$0xff] %v3927_v22  ;;  %v537_v8 = vrot.slane %v3952_v38, 1  ;;  %v3175_v22 = vpack.c.bf16 %v2680_v17, %v2679_v0  ;;  %v771_v0 = vld [vmem:[#allocation2 + $0xe8] sm:$0xff]  ;;  %v3231_v17 = vpack.c.bf16 %v707_v1, %v706_v42  ;;  %v2684_v42 = vld [vmem:[%s4975_s1 + $0x258] sm:$0xff] }
  0x4b   : > { %343 = vst [vmem:[#allocation2 + $0x2f0] sm:$0xff] %v3930_v24  ;;  %484 = vst [vmem:[#allocation2 + $0x288] sm:$0xff] %v3934_v53  ;;  %v3971_v51 = vsel %vm491_vm0, %v534_v36, %v535_v45  ;;  %v2681_v53 = vld [vmem:[%s4975_s1 + $0x240] sm:$0xff]  ;;  %v2682_v36 = vld [vmem:[%s4975_s1 + $0x248] sm:$0xff]  ;;  %2943 = vmatmul.mubr.f32.gmra.mrb[6].mxu1 %v771_v0 }
  0x4c   : > { %598 = vst [vmem:[#allocation2 + $0x2b0] sm:$0xff] %v3945_v21  ;;  %344 = vst [vmem:[#allocation2 + $0x308] sm:$0xff] %v3952_v38  ;;  %3176 = vmatpush1.bf16.msra.mxu0 %v3175_v22  ;;  %v3178_v3 = vpack.c.bf16 %v2682_v36, %v2681_v53  ;;  %3232 = vmatpush1.bf16.msra.mxu1 %v3231_v17  ;;  %v424_v53 = vrot.slane %v3952_v38, 7  ;;  %v710_v22 = vld [vmem:[%s4975_s1 + $0x50] sm:$0xff]  ;;  %v711_v36 = vld [vmem:[%s4975_s1 + $0x58] sm:$0xff]  ;;  %v422_v17 = vrot.slane %v3930_v24, 7 }
  0x4d   : > { %485 = vst [vmem:[#allocation2 + $0x2a0] sm:$0xfe] %v418_v10  ;;  %601 = vst [vmem:[#allocation2 + $0x2f8] sm:$0x7f] %v535_v45  ;;  %v3984_v45 = vsel %vm491_vm0, %v537_v8, %v538_v52  ;;  %v709_v8 = vld [vmem:[%s4975_s1 + $0x48] sm:$0xff]  ;;  %3177 = vmatprep.subr.bf16.mxu0 %v5003_v26  ;;  %2945 = vmatprep.mubr.f32.mxu1 %v3677_v23  ;;  %v2685_v23 = vld [vmem:[%s4975_s1 + $0x260] sm:$0xff] }
  0x4e   : > { %345 = vst [vmem:[#allocation2 + $0x320] sm:$0xff] %v3958_v63  ;;  %600 = vst [vmem:[#allocation2 + $0x2e0] sm:$0xff] %v3971_v51  ;;  %v3234_v1 = vpack.c.bf16 %v709_v8, %v708_v54  ;;  %3233 = vmatprep.subr.bf16.mxu1 %v5003_v26  ;;  %v2686_v0 = vld [vmem:[%s4975_s1 + $0x268] sm:$0xff]  ;;  %v3237_v8 = vpack.c.bf16 %v711_v36, %v710_v22  ;;  %v732_v36 = vld [vmem:[%s4975_s1 + $0x100] sm:$0xff] }
  0x4f   : > { %487 = vst [vmem:[#allocation2 + $0x2d0] sm:$0xfe] %v421_v16  ;;  %603 = vst [vmem:[#allocation2 + $0x328] sm:$0x7f] %v538_v52  ;;  %v3997_v52 = vsel %vm378_vm1, %v418_v10, %v419_v14  ;;  %v777_v10 = vld [vmem:[#allocation2 + $0x118] sm:$0xff]  ;;  %v3181_v14 = vpack.c.bf16 %v2684_v42, %v2683_v13  ;;  %v783_v54 = vld [vmem:[#allocation2 + $0x148] sm:$0xff]  ;;  %v4033_v42 = vsel %vm378_vm1, %v421_v16, %v422_v17 }
  0x50   : > { %602 = vst [vmem:[#allocation2 + $0x310] sm:$0xff] %v3984_v45  ;;  %486 = vst [vmem:[#allocation2 + $0x2b8] sm:$0xff] %v3997_v52  ;;  %3179 = vmatpush1.bf16.msra.mxu0 %v3178_v3  ;;  %2946 = vmatmul.mubr.f32.gmra.mrb[8].mxu1 %v777_v10  ;;  %v712_v3 = vld [vmem:[%s4975_s1 + $0x60] sm:$0xff]  ;;  %v713_v13 = vld [vmem:[%s4975_s1 + $0x68] sm:$0xff]  ;;  %v3184_v10 = vpack.c.bf16 %v2686_v0, %v2685_v23 }
  0x51   : > { %489 = vst [vmem:[#allocation2 + $0x300] sm:$0xfe] %v424_v53  ;;  %3180 = vmatprep.subr.bf16.mxu0 %v5003_v26  ;;  %3235 = vmatpush1.bf16.msra.mxu1 %v3234_v1  ;;  %488 = vst [vmem:[#allocation2 + $0x2e8] sm:$0xff] %v4033_v42  ;;  %v2688_v1 = vld [vmem:[%s4975_s1 + $0x278] sm:$0xff]  ;;  %v3240_v22 = vpack.c.bf16 %v713_v13, %v712_v3  ;;  %v714_v23 = vld [vmem:[%s4975_s1 + $0x70] sm:$0xff] }
  0x52   : > { %2948 = vmatprep.mubr.f32.mxu1 %v3705_v34  ;;  %3236 = vmatprep.subr.bf16.mxu1 %v5003_v26  ;;  %v2687_v34 = vld [vmem:[%s4975_s1 + $0x270] sm:$0xff]  ;;  %v789_v16 = vld [vmem:[#allocation2 + $0x178] sm:$0xff] }
  0x53   : > { %v3187_v0 = vpack.c.bf16 %v2688_v1, %v2687_v34  ;;  %v734_v13 = vld [vmem:[%s4975_s1 + $0x110] sm:$0xff]  ;;  %v716_v34 = vld [vmem:[%s4975_s1 + $0x80] sm:$0xff] }
  0x54   : > { %3182 = vmatpush1.bf16.msra.mxu0 %v3181_v14  ;;  %2949 = vmatmul.mubr.f32.gmra.mrb[10].mxu1 %v783_v54  ;;  %v733_v14 = vld [vmem:[%s4975_s1 + $0x108] sm:$0xff]  ;;  %v425_v54 = vrot.slane %v3958_v63, 7 }
  0x55   : > { %3183 = vmatprep.subr.bf16.mxu0 %v5003_v26  ;;  %3238 = vmatpush1.bf16.msra.mxu1 %v3237_v8  ;;  %v3269_v17 = vpack.c.bf16 %v733_v14, %v732_v36  ;;  %v795_v8 = vld [vmem:[#allocation2 + $0x1a8] sm:$0xff]  ;;  %v801_v36 = vld [vmem:[#allocation2 + $0x1d8] sm:$0xff] }
  0x56   : > { %2951 = vmatprep.mubr.f32.mxu1 %v3724_v46  ;;  %3239 = vmatprep.subr.bf16.mxu1 %v5003_v26  ;;  %v715_v46 = vld [vmem:[%s4975_s1 + $0x78] sm:$0xff]  ;;  %v4074_v1 = vsel %vm378_vm1, %v424_v53, %v425_v54  ;;  %v737_v53 = vld [vmem:[%s4975_s1 + $0x128] sm:$0xff] }
  0x57   : > { %v3243_v3 = vpack.c.bf16 %v715_v46, %v714_v23  ;;  %490 = vst [vmem:[#allocation2 + $0x318] sm:$0xff] %v4074_v1  ;;  %v736_v23 = vld [vmem:[%s4975_s1 + $0x120] sm:$0xff]  ;;  %v718_v46 = vld [vmem:[%s4975_s1 + $0x90] sm:$0xff]  ;;  %v807_v54 = vld [vmem:[#allocation2 + $0x208] sm:$0xff] }
  0x58   : > { %3185 = vmatpush1.bf16.msra.mxu0 %v3184_v10  ;;  %2952 = vmatmul.mubr.f32.gmra.mrb[12].mxu1 %v789_v16  ;;  %v735_v10 = vld [vmem:[%s4975_s1 + $0x118] sm:$0xff]  ;;  %v4076_v16 = vld [vmem:[#allocation2 + $0x30] sm:$0xff] }
  0x59   : > { %3186 = vmatprep.subr.bf16.mxu0 %v5003_v26  ;;  %3241 = vmatpush1.bf16.msra.mxu1 %v3240_v22  ;;  %v3273_v22 = vpack.c.bf16 %v735_v10, %v734_v13  ;;  %v739_v13 = vld [vmem:[%s4975_s1 + $0x138] sm:$0xff] }
  0x5a   : > { %2954 = vmatprep.mubr.f32.mxu1 %v3769_v2  ;;  %3242 = vmatprep.subr.bf16.mxu1 %v5003_v26  ;;  %v717_v2 = vld [vmem:[%s4975_s1 + $0x88] sm:$0xff] }
  0x5b   : > { %v3246_v14 = vpack.c.bf16 %v717_v2, %v716_v34  ;;  %v813_v34 = vld [vmem:[#allocation2 + $0x238] sm:$0xff] }
  0x5c   : > { %3188 = vmatpush1.bf16.msra.mxu0 %v3187_v0  ;;  %2955 = vmatmul.mubr.f32.gmra.mrb[14].mxu1 %v795_v8  ;;  %v3277_v0 = vpack.c.bf16 %v737_v53, %v736_v23  ;;  %v819_v23 = vld [vmem:[#allocation2 + $0x268] sm:$0xff] }
  0x5d   : > { %3270 = vmatprep.subr.bf16.mxu0 %v3269_v17  ;;  %3244 = vmatpush1.bf16.msra.mxu1 %v3243_v3  ;;  %v738_v3 = vld [vmem:[%s4975_s1 + $0x130] sm:$0xff] }
  0x5e   : > { %2957 = vmatprep.mubr.f32.mxu1 %v3796_v19  ;;  %3245 = vmatprep.subr.bf16.mxu1 %v5003_v26  ;;  %v719_v19 = vld [vmem:[%s4975_s1 + $0x98] sm:$0xff]  ;;  %v3281_v10 = vpack.c.bf16 %v739_v13, %v738_v3  ;;  %v744_v13 = vld [vmem:[%s4975_s1 + $0x160] sm:$0xff] }
  0x5f   : > { %958 = vmatmul.mubr.f32.vlgmr.msra.gmra.mrb[0].mxu0 %v4076_v16  ;;  %v3249_v8 = vpack.c.bf16 %v719_v19, %v718_v46  ;;  %v742_v46 = vld [vmem:[%s4975_s1 + $0x150] sm:$0xff]  ;;  %v743_v19 = vld [vmem:[%s4975_s1 + $0x158] sm:$0xff] }
  0x60   : > { %962 = vmatprep.mubr.f32.mxu0 %v3536_v29  ;;  %3272 = vmatpush3.bf16.msra.mxu0 %v3269_v17  ;;  %v720_v29 = vld [vmem:[%s4975_s1 + $0xa0] sm:$0xff] }
  0x61   : > { %2958 = vmatmul.mubr.f32.gmra.mrb[16].mxu1 %v801_v36  ;;  %3274 = vmatprep.subr.bf16.mxu0 %v3273_v22  ;;  %v4111_v17 = vld [vmem:[#allocation2 + $0x60] sm:$0xff] }
  0x62   : > { %3247 = vmatpush1.bf16.msra.mxu1 %v3246_v14  ;;  %2960 = vmatprep.mubr.f32.mxu1 %v3823_v41  ;;  %v721_v41 = vld [vmem:[%s4975_s1 + $0xa8] sm:$0xff]  ;;  %v740_v36 = vld [vmem:[%s4975_s1 + $0x140] sm:$0xff] }
  0x63   : > { %963 = vmatmul.mubr.f32.gmra.mrb[2].mxu0 %v3566_v44  ;;  %3248 = vmatprep.subr.bf16.mxu1 %v5003_v26  ;;  %v3252_v2 = vpack.c.bf16 %v721_v41, %v720_v29  ;;  %v741_v14 = vld [vmem:[%s4975_s1 + $0x148] sm:$0xff] }
  0x64   : > { %967 = vmatprep.mubr.f32.mxu0 %v3548_v35  ;;  %3276 = vmatpush3.bf16.msra.mxu0 %v3273_v22  ;;  %v722_v35 = vld [vmem:[%s4975_s1 + $0xb0] sm:$0xff]  ;;  %v3285_v22 = vpack.c.bf16 %v741_v14, %v740_v36  ;;  %v745_v29 = vld [vmem:[%s4975_s1 + $0x168] sm:$0xff]  ;;  %v747_v36 = vld [vmem:[%s4975_s1 + $0x178] sm:$0xff] }
  0x65   : > { %2961 = vmatmul.mubr.f32.gmra.mrb[18].mxu1 %v807_v54  ;;  %3278 = vmatprep.subr.bf16.mxu0 %v3277_v0  ;;  %v3289_v54 = vpack.c.bf16 %v743_v19, %v742_v46  ;;  %v3293_v41 = vpack.c.bf16 %v745_v29, %v744_v13  ;;  %v4179_v14 = vld [vmem:[#allocation2 + $0xc0] sm:$0xff]  ;;  %v4201_v19 = vld [vmem:[#allocation2 + $0xf0] sm:$0xff] }
  0x66   : > { %3250 = vmatpush1.bf16.msra.mxu1 %v3249_v8  ;;  %2963 = vmatprep.mubr.f32.mxu1 %v3858_v6  ;;  %v723_v6 = vld [vmem:[%s4975_s1 + $0xb8] sm:$0xff]  ;;  %v2705_v46 = vld [vmem:[%s4975_s1 + $0x300] sm:$0xff] }
  0x67   : > { %968 = vmatmul.mubr.f32.gmra.mrb[4].mxu0 %v4111_v17  ;;  %3251 = vmatprep.subr.bf16.mxu1 %v5003_v26  ;;  %v3255_v53 = vpack.c.bf16 %v723_v6, %v722_v35  ;;  %v825_v8 = vld [vmem:[#allocation2 + $0x298] sm:$0xff]  ;;  %v2709_v29 = vld [vmem:[%s4975_s1 + $0x320] sm:$0xff] }
  0x68   : > { %972 = vmatprep.mubr.f32.mxu0 %v3552_v37  ;;  %3280 = vmatpush3.bf16.msra.mxu0 %v3277_v0  ;;  %v724_v37 = vld [vmem:[%s4975_s1 + $0xc0] sm:$0xff]  ;;  %v4145_v0 = vld [vmem:[#allocation2 + $0x90] sm:$0xff]  ;;  %v837_v6 = vld [vmem:[#allocation2 + $0x2f8] sm:$0xff] }
  0x69   : > { %2964 = vmatmul.mubr.f32.gmra.mrb[20].mxu1 %v813_v34  ;;  %3282 = vmatprep.subr.bf16.mxu0 %v3281_v10 }
  0x6a   : > { %3253 = vmatpush1.bf16.msra.mxu1 %v3252_v2  ;;  %2966 = vmatprep.mubr.f32.mxu1 %v3894_v49  ;;  %v725_v49 = vld [vmem:[%s4975_s1 + $0xc8] sm:$0xff]  ;;  %v746_v2 = vld [vmem:[%s4975_s1 + $0x170] sm:$0xff] }
  0x6b   : > { %973 = vmatmul.mubr.f32.gmra.mrb[6].mxu0 %v3608_v60  ;;  %3254 = vmatprep.subr.bf16.mxu1 %v5003_v26  ;;  %v3258_v3 = vpack.c.bf16 %v725_v49, %v724_v37  ;;  %v3297_v35 = vpack.c.bf16 %v747_v36, %v746_v2  ;;  %v2738_v37 = vld [vmem:[%s4975_s1 + $0x408] sm:$0xff]  ;;  %v4209_v49 = vld [vmem:[#allocation2] sm:$0xff] }
  0x6c   : > { %977 = vmatprep.mubr.f32.mxu0 %v3563_v43  ;;  %3284 = vmatpush3.bf16.msra.mxu0 %v3281_v10  ;;  %v726_v43 = vld [vmem:[%s4975_s1 + $0xd0] sm:$0xff]  ;;  %v831_v10 = vld [vmem:[#allocation2 + $0x2c8] sm:$0xff]  ;;  %v2713_v36 = vld [vmem:[%s4975_s1 + $0x340] sm:$0xff] }
  0x6d   : > { %2967 = vmatmul.mubr.f32.gmra.mrb[22].mxu1 %v819_v23  ;;  %3286 = vmatprep.subr.bf16.mxu0 %v3285_v22  ;;  %v730_v23 = vld [vmem:[%s4975_s1 + $0xf0] sm:$0xff] }
  0x6e   : > { %3256 = vmatpush1.bf16.msra.mxu1 %v3255_v53  ;;  %2969 = vmatprep.mubr.f32.mxu1 %v3914_v55  ;;  %v727_v55 = vld [vmem:[%s4975_s1 + $0xd8] sm:$0xff] }
  0x6f   : > { %978 = vmatmul.mubr.f32.gmra.mrb[8].mxu0 %v4145_v0  ;;  %3257 = vmatprep.subr.bf16.mxu1 %v5003_v26  ;;  %v3261_v34 = vpack.c.bf16 %v727_v55, %v726_v43  ;;  %v4235_v43 = vld [vmem:[#allocation2 + $0x120] sm:$0xff]  ;;  %v3392_v55 = vld [vmem:[#allocation2 + $0x38] sm:$0xff] }
  0x70   : > { %982 = vmatprep.mubr.f32.mxu0 %v3575_v48  ;;  %3288 = vmatpush3.bf16.msra.mxu0 %v3285_v22  ;;  %v728_v48 = vld [vmem:[%s4975_s1 + $0xe0] sm:$0xff] }
  0x71   : > { %2970 = vmatmul.mubr.f32.gmra.mrb[24].mxu1 %v825_v8  ;;  %3290 = vmatprep.subr.bf16.mxu0 %v3289_v54 }
  0x72   : > { %3259 = vmatpush1.bf16.msra.mxu1 %v3258_v3  ;;  %2972 = vmatprep.mubr.f32.mxu1 %v3945_v21  ;;  %v729_v21 = vld [vmem:[%s4975_s1 + $0xe8] sm:$0xff]  ;;  %v2708_v3 = vld [vmem:[%s4975_s1 + $0x318] sm:$0xff] }
  0x73   : > { %983 = vmatmul.mubr.f32.gmra.mrb[10].mxu0 %v3630_v5  ;;  %3260 = vmatprep.subr.bf16.mxu1 %v5003_v26  ;;  %v3264_v22 = vpack.c.bf16 %v729_v21, %v728_v48  ;;  %v2714_v48 = vld [vmem:[%s4975_s1 + $0x348] sm:$0xff] }
  0x74   : > { %987 = vmatprep.mubr.f32.mxu0 %v3598_v56  ;;  %3292 = vmatpush3.bf16.msra.mxu0 %v3289_v54  ;;  %v731_v56 = vld [vmem:[%s4975_s1 + $0xf8] sm:$0xff]  ;;  %v3314_v21 = vpack.c.bf16 %v2714_v48, %v2713_v36  ;;  %v2731_v48 = vld [vmem:[%s4975_s1 + $0x3d0] sm:$0xff] }
  0x75   : > { %2973 = vmatmul.mubr.f32.gmra.mrb[26].mxu1 %v831_v10  ;;  %3294 = vmatprep.subr.bf16.mxu0 %v3293_v41  ;;  %v3267_v53 = vpack.c.bf16 %v731_v56, %v730_v23  ;;  %v2711_v10 = vld [vmem:[%s4975_s1 + $0x330] sm:$0xff]  ;;  %v2718_v23 = vld [vmem:[%s4975_s1 + $0x368] sm:$0xff] }
  0x76   : > { %3262 = vmatpush1.bf16.msra.mxu1 %v3261_v34  ;;  %2975 = vmatprep.mubr.f32.mxu1 %v3971_v51  ;;  %v843_v51 = vld [vmem:[#allocation2 + $0x328] sm:$0xff]  ;;  %v3393_v34 = vld [vmem:[#allocation2 + $0x50] sm:$0xff] }
  0x77   : > { %988 = vmatmul.mubr.f32.gmra.mrb[12].mxu0 %v4179_v14  ;;  %3263 = vmatprep.subr.bf16.mxu1 %v5003_v26 }
  0x78   : > { %992 = vmatprep.mubr.f32.mxu0 %v3603_v58  ;;  %3296 = vmatpush3.bf16.msra.mxu0 %v3293_v41  ;;  %v2706_v58 = vld [vmem:[%s4975_s1 + $0x308] sm:$0xff] }
  0x79   : > { %2976 = vmatmul.mubr.f32.gmra.mrb[28].mxu1 %v837_v6  ;;  %3298 = vmatprep.subr.bf16.mxu0 %v3297_v35  ;;  %v3302_v54 = vpack.c.bf16 %v2706_v58, %v2705_v46  ;;  %v2721_v46 = vld [vmem:[%s4975_s1 + $0x380] sm:$0xff]  ;;  %v2722_v58 = vld [vmem:[%s4975_s1 + $0x388] sm:$0xff] }
  0x7a   : > { %3265 = vmatpush1.bf16.msra.mxu1 %v3264_v22  ;;  %2978 = vmatprep.mubr.f32.mxu1 %v3984_v45  ;;  %v2737_v45 = vld [vmem:[%s4975_s1 + $0x400] sm:$0xff] }
  0x7b   : > { %993 = vmatmul.mubr.f32.gmra.mrb[14].mxu0 %v3669_v20  ;;  %3266 = vmatprep.subr.bf16.mxu1 %v5003_v26  ;;  %v4212_v8 = vpack.c.bf16 %v2738_v37, %v2737_v45  ;;  %v2717_v22 = vld [vmem:[%s4975_s1 + $0x360] sm:$0xff]  ;;  %v3326_v45 = vpack.c.bf16 %v2722_v58, %v2721_v46  ;;  %v2723_v37 = vld [vmem:[%s4975_s1 + $0x390] sm:$0xff]  ;;  %v3406_v46 = vld [vmem:[#allocation2 + $0x188] sm:$0xff] }
  0x7c   : > { %997 = vmatprep.mubr.f32.mxu0 %v3626_v4  ;;  %3300 = vmatpush3.bf16.msra.mxu0 %v3297_v35  ;;  %v2707_v4 = vld [vmem:[%s4975_s1 + $0x310] sm:$0xff]  ;;  %v3320_v56 = vpack.c.bf16 %v2718_v23, %v2717_v22  ;;  %v5011_v58 = vld [vmem:[#allocation6_spill] sm:$0xff] }
  0x7d   : > { %2979 = vmatmul.mubr.f32.gmra.mrb[30].mxu1 %v843_v51  ;;  %3350 = vmatprep.subr.bf16.mxu0 %v4212_v8  ;;  %v3305_v13 = vpack.c.bf16 %v2708_v3, %v2707_v4  ;;  %v2715_v35 = vld [vmem:[%s4975_s1 + $0x350] sm:$0xff]  ;;  %v2725_v3 = vld [vmem:[%s4975_s1 + $0x3a0] sm:$0xff] }
  0x7e   : > { %3268 = vmatpush1.bf16.msra.mxu1 %v3267_v53  ;;  %1407 = vmatprep.mubr.f32.mxu1 %v4209_v49  ;;  %v2719_v51 = vld [vmem:[%s4975_s1 + $0x370] sm:$0xff] }
  0x7f   : > { %998 = vmatmul.mubr.f32.gmra.mrb[16].mxu0 %v4201_v19  ;;  %3301 = vmatprep.subr.bf16.mxu1 %v5003_v26  ;;  %v2735_v23 = vld [vmem:[%s4975_s1 + $0x3f0] sm:$0xff] }
  0x80   : > { %1002 = vmatprep.mubr.f32.mxu0 %v3636_v7  ;;  %v2710_v7 = vld [vmem:[%s4975_s1 + $0x328] sm:$0xff] }
  0x81   : > { %1408 = vmatmul.mubr.f32.vlgmr.msra.gmra.mrb[32].mxu1 %v4209_v49  ;;  %v3308_v41 = vpack.c.bf16 %v2710_v7, %v2709_v29  ;;  %v4323_v29 = vld [vmem:[#allocation2 + $0x1e0] sm:$0xff] }
  0x82   : > { %3303 = vmatpush1.bf16.msra.mxu1 %v3302_v54  ;;  %1412 = vmatprep.mubr.f32.mxu1 %v4209_v49  ;;  %v2724_v54 = vld [vmem:[%s4975_s1 + $0x398] sm:$0xff] }
  0x83   : > { %1003 = vmatmul.mubr.f32.gmra.mrb[18].mxu0 %v3683_v25  ;;  %3304 = vmatprep.subr.bf16.mxu1 %v5003_v26  ;;  %v3329_v4 = vpack.c.bf16 %v2724_v54, %v2723_v37  ;;  %v4391_v37 = vld [vmem:[#allocation2 + $0x2a0] sm:$0xff]  ;;  %v4401_v54 = vld [vmem:[#allocation2 + $0x2d0] sm:$0xff] }
  0x84   : > { %1007 = vmatprep.mubr.f32.mxu0 %v3656_v15  ;;  %v2712_v15 = vld [vmem:[%s4975_s1 + $0x338] sm:$0xff] }
  0x85   : > { %1413 = vmatmul.mubr.f32.gmra.mrb[34].mxu1 %v4209_v49  ;;  %v3311_v2 = vpack.c.bf16 %v2712_v15, %v2711_v10  ;;  %v2729_v15 = vld [vmem:[%s4975_s1 + $0x3c0] sm:$0xff] }
  0x86   : > { %1417 = vmatprep.mubr.f32.mxu1 %v3392_v55  ;;  %3306 = vmatpush1.bf16.msra.mxu1 %v3305_v13  ;;  %v2726_v13 = vld [vmem:[%s4975_s1 + $0x3a8] sm:$0xff]  ;;  %v2727_v55 = vld [vmem:[%s4975_s1 + $0x3b0] sm:$0xff] }
  0x87   : > { %1008 = vmatmul.mubr.f32.gmra.mrb[20].mxu0 %v4235_v43  ;;  %3307 = vmatprep.subr.bf16.mxu1 %v5003_v26  ;;  %v3332_v7 = vpack.c.bf16 %v2726_v13, %v2725_v3  ;;  %v2746_v3 = vld [vmem:[%s4975_s1 + $0x448] sm:$0xff]  ;;  %v4462_v13 = vld [vmem:[#allocation2 + $0xb8] sm:$0xff] }
  0x88   : > { %1012 = vmatprep.mubr.f32.mxu0 %v3664_v18  ;;  %v4257_v18 = vld [vmem:[#allocation2 + $0x150] sm:$0xff] }
  0x89   : > { %1418 = vmatmul.mubr.f32.gmra.mrb[36].mxu1 %v4076_v16  ;;  %v3394_v16 = vld [vmem:[#allocation2 + $0x68] sm:$0xff] }
  0x8a   : > { %1422 = vmatprep.mubr.f32.mxu1 %v3393_v34  ;;  %3309 = vmatpush1.bf16.msra.mxu1 %v3308_v41  ;;  %v2728_v41 = vld [vmem:[%s4975_s1 + $0x3b8] sm:$0xff]  ;;  %v2730_v34 = vld [vmem:[%s4975_s1 + $0x3c8] sm:$0xff] }
  0x8b   : > { %1013 = vmatmul.mubr.f32.gmra.mrb[22].mxu0 %v3712_v39  ;;  %3310 = vmatprep.subr.bf16.mxu1 %v5003_v26  ;;  %v3335_v10 = vpack.c.bf16 %v2728_v41, %v2727_v55  ;;  %v3338_v36 = vpack.c.bf16 %v2730_v34, %v2729_v15  ;;  %v2747_v55 = vld [vmem:[%s4975_s1 + $0x450] sm:$0xff]  ;;  %v2748_v41 = vld [vmem:[%s4975_s1 + $0x458] sm:$0xff]  ;;  %v2749_v34 = vld [vmem:[%s4975_s1 + $0x460] sm:$0xff] }
  0x8c   : > { %1017 = vmatprep.mubr.f32.mxu0 %v3691_v30  ;;  %v2716_v30 = vld [vmem:[%s4975_s1 + $0x358] sm:$0xff]  ;;  %v3369_v15 = vpack.c.bf16 %v2748_v41, %v2747_v55 }
  0x8d   : > { %1423 = vmatmul.mubr.f32.gmra.mrb[38].mxu1 %v3566_v44  ;;  %v3395_v44 = vld [vmem:[#allocation2 + $0x80] sm:$0xff]  ;;  %v3317_v6 = vpack.c.bf16 %v2716_v30, %v2715_v35  ;;  %v2734_v30 = vld [vmem:[%s4975_s1 + $0x3e8] sm:$0xff]  ;;  %v4567_v41 = vld [vmem:[#allocation2 + $0x2f8] sm:$0xff] }
  0x8e   : > { %1427 = vmatprep.mubr.f32.mxu1 %v3394_v16  ;;  %3312 = vmatpush1.bf16.msra.mxu1 %v3311_v2  ;;  %v4345_v2 = vld [vmem:[#allocation2 + $0x210] sm:$0xff]  ;;  %v2732_v16 = vld [vmem:[%s4975_s1 + $0x3d8] sm:$0xff]  ;;  %v2733_v35 = vld [vmem:[%s4975_s1 + $0x3e0] sm:$0xff] }
  0x8f   : > { %1018 = vmatmul.mubr.f32.gmra.mrb[24].mxu0 %v4257_v18  ;;  %3313 = vmatprep.subr.bf16.mxu1 %v5003_v26  ;;  %v3344_v22 = vpack.c.bf16 %v2734_v30, %v2733_v35  ;;  %v4504_v35 = vld [vmem:[#allocation2 + $0x148] sm:$0xff]  ;;  %v4507_v30 = vld [vmem:[#allocation2 + $0x160] sm:$0xff] }
  0x90   : > { %1022 = vmatprep.mubr.f32.mxu0 %v3694_v31  ;;  %v4279_v31 = vld [vmem:[#allocation2 + $0x180] sm:$0xff] }
  0x91   : > { %1428 = vmatmul.mubr.f32.gmra.mrb[40].mxu1 %v4111_v17  ;;  %v3396_v17 = vld [vmem:[#allocation2 + $0x98] sm:$0xff] }
  0x92   : > { %1432 = vmatprep.mubr.f32.mxu1 %v3395_v44  ;;  %3315 = vmatpush1.bf16.msra.mxu1 %v3314_v21  ;;  %v3341_v21 = vpack.c.bf16 %v2732_v16, %v2731_v48  ;;  %v5007_v44 = vld [vmem:[#allocation3_spill] sm:$0xff]  ;;  %v4493_v48 = vld [vmem:[#allocation2 + $0x130] sm:$0xff] }
  0x93   : > { %1023 = vmatmul.mubr.f32.gmra.mrb[26].mxu0 %v3746_v57  ;;  %3316 = vmatprep.subr.bf16.mxu1 %v5003_v26 }
  0x94   : > { %1027 = vmatprep.mubr.f32.mxu0 %v3717_v40  ;;  %v2720_v40 = vld [vmem:[%s4975_s1 + $0x378] sm:$0xff] }
  0x95   : > { %1433 = vmatmul.mubr.f32.gmra.mrb[42].mxu1 %v3608_v60  ;;  %v3397_v60 = vld [vmem:[#allocation2 + $0xb0] sm:$0xff]  ;;  %v3323_v53 = vpack.c.bf16 %v2720_v40, %v2719_v51  ;;  %v5009_v40 = vld [vmem:[#allocation8_spill] sm:$0xff] }
  0x96   : > { %1437 = vmatprep.mubr.f32.mxu1 %v3396_v17  ;;  %3318 = vmatpush1.bf16.msra.mxu1 %v3317_v6  ;;  %v4367_v6 = vld [vmem:[#allocation2 + $0x240] sm:$0xff]  ;;  %v2736_v17 = vld [vmem:[%s4975_s1 + $0x3f8] sm:$0xff] }
  0x97   : > { %1028 = vmatmul.mubr.f32.gmra.mrb[28].mxu0 %v4279_v31  ;;  %3319 = vmatprep.subr.bf16.mxu1 %v5003_v26  ;;  %v3347_v51 = vpack.c.bf16 %v2736_v17, %v2735_v23  ;;  %v4523_v23 = vld [vmem:[#allocation2 + $0x1c0] sm:$0xff] }
  0x98   : > { %1032 = vmatprep.mubr.f32.mxu0 %v3727_v47  ;;  %v4301_v47 = vld [vmem:[#allocation2 + $0x1b0] sm:$0xff]  ;;  %v1794_v17 = vld [vmem:[#allocation2 + $0x60] sm:$0xff] }
  0x99   : > { %1438 = vmatmul.mubr.f32.gmra.mrb[44].mxu1 %v4145_v0  ;;  %v3398_v0 = vld [vmem:[#allocation2 + $0xc8] sm:$0xff] }
  0x9a   : > { %1442 = vmatprep.mubr.f32.mxu1 %v3397_v60  ;;  %3321 = vmatpush1.bf16.msra.mxu1 %v3320_v56  ;;  %v5008_v56 = vld [vmem:[#allocation4_spill] sm:$0xff]  ;;  %v5010_v60 = vld [vmem:[#allocation5_spill] sm:$0xff] }
  0x9b   : > { %1033 = vmatmul.mubr.f32.gmra.mrb[30].mxu0 %v3776_v9  ;;  %3322 = vmatprep.subr.bf16.mxu1 %v5003_v26 }
  0x9c   : > { %1037 = vmatprep.mubr.f32.mxu0 %v3751_v61 }
  0x9d   : > { %1443 = vmatmul.mubr.f32.gmra.mrb[46].mxu1 %v3630_v5  ;;  %v3399_v5 = vld [vmem:[#allocation2 + $0xe0] sm:$0xff] }
  0x9e   : > { %1447 = vmatprep.mubr.f32.mxu1 %v3398_v0  ;;  %3324 = vmatpush1.bf16.msra.mxu1 %v3323_v53  ;;  %v4383_v53 = vld [vmem:[#allocation2 + $0x270] sm:$0xff]  ;;  %v3407_v0 = vld [vmem:[#allocation2 + $0x1a0] sm:$0xff] }
  0x9f   : > { %1038 = vmatmul.mubr.f32.gmra.mrb[32].mxu0 %v4301_v47  ;;  %3325 = vmatprep.subr.bf16.mxu1 %v5003_v26 }
  0xa0   : > { %1042 = vmatprep.mubr.f32.mxu0 %v3754_v62 }
  0xa1   : > { %1448 = vmatmul.mubr.f32.gmra.mrb[48].mxu1 %v4179_v14  ;;  %v3400_v14 = vld [vmem:[#allocation2 + $0xf8] sm:$0xff] }
  0xa2   : > { %1452 = vmatprep.mubr.f32.mxu1 %v3399_v5  ;;  %3327 = vmatpush1.bf16.msra.mxu1 %v3326_v45  ;;  %v5012_v45 = vld [vmem:[#allocation10_spill] sm:$0xff] }
  0xa3   : > { %1043 = vmatmul.mubr.f32.gmra.mrb[34].mxu0 %v3819_v33  ;;  %3328 = vmatprep.subr.bf16.mxu1 %v5003_v26 }
  0xa4   : > { %1047 = vmatprep.mubr.f32.mxu0 %v3782_v11 }
  0xa5   : > { %1453 = vmatmul.mubr.f32.gmra.mrb[50].mxu1 %v3669_v20  ;;  %v3401_v20 = vld [vmem:[#allocation2 + $0x110] sm:$0xff] }
  0xa6   : > { %1457 = vmatprep.mubr.f32.mxu1 %v3400_v14  ;;  %3330 = vmatpush1.bf16.msra.mxu1 %v3329_v4  ;;  %v2745_v4 = vld [vmem:[%s4975_s1 + $0x440] sm:$0xff]  ;;  %v4465_v14 = vld [vmem:[#allocation2 + $0xd0] sm:$0xff] }
  0xa7   : > { %1048 = vmatmul.mubr.f32.gmra.mrb[36].mxu0 %v4323_v29  ;;  %3331 = vmatprep.subr.bf16.mxu1 %v5003_v26 }
  0xa8   : > { %1052 = vmatprep.mubr.f32.mxu0 %v3785_v12 }
  0xa9   : > { %1458 = vmatmul.mubr.f32.gmra.mrb[52].mxu1 %v4201_v19  ;;  %v3402_v19 = vld [vmem:[#allocation2 + $0x128] sm:$0xff] }
  0xaa   : > { %1462 = vmatprep.mubr.f32.mxu1 %v3401_v20  ;;  %3333 = vmatpush1.bf16.msra.mxu1 %v3332_v7  ;;  %v3365_v7 = vpack.c.bf16 %v2746_v3, %v2745_v4  ;;  %v4476_v20 = vld [vmem:[#allocation2 + $0xe8] sm:$0xff]  ;;  %v4561_v4 = vld [vmem:[#allocation2 + $0x2e0] sm:$0xff]  ;;  %v1812_v3 = vld [vmem:[#allocation2 + $0xf0] sm:$0xff] }
  0xab   : > { %1053 = vmatmul.mubr.f32.gmra.mrb[38].mxu0 %v3852_v59  ;;  %3334 = vmatprep.subr.bf16.mxu1 %v5003_v26 }
  0xac   : > { %1057 = vmatprep.mubr.f32.mxu0 %v3813_v28 }
  0xad   : > { %1463 = vmatmul.mubr.f32.gmra.mrb[54].mxu1 %v3683_v25  ;;  %v3403_v25 = vld [vmem:[#allocation2 + $0x140] sm:$0xff] }
  0xae   : > { %1467 = vmatprep.mubr.f32.mxu1 %v3402_v19  ;;  %3336 = vmatpush1.bf16.msra.mxu1 %v3335_v10  ;;  %v4479_v10 = vld [vmem:[#allocation2 + $0x100] sm:$0xff]  ;;  %v2750_v19 = vld [vmem:[%s4975_s1 + $0x468] sm:$0xff] }
  0xaf   : > { %1058 = vmatmul.mubr.f32.gmra.mrb[40].mxu0 %v4345_v2  ;;  %3337 = vmatprep.subr.bf16.mxu1 %v5003_v26  ;;  %v3373_v16 = vpack.c.bf16 %v2750_v19, %v2749_v34  ;;  %v1815_v34 = vld [vmem:[#allocation2 + $0x108] sm:$0xff] }
  0xb0   : > { %1062 = vmatprep.mubr.f32.mxu0 %v3816_v32  ;;  %v1819_v19 = vld [vmem:[#allocation2 + $0x128] sm:$0xff] }
  0xb1   : > { %1468 = vmatmul.mubr.f32.gmra.mrb[56].mxu1 %v4235_v43  ;;  %v3404_v43 = vld [vmem:[#allocation2 + $0x158] sm:$0xff] }
  0xb2   : > { %1472 = vmatprep.mubr.f32.mxu1 %v3403_v25  ;;  %3339 = vmatpush1.bf16.msra.mxu1 %v3338_v36  ;;  %v4490_v36 = vld [vmem:[#allocation2 + $0x118] sm:$0xff]  ;;  %v2751_v25 = vld [vmem:[%s4975_s1 + $0x470] sm:$0xff] }
  0xb3   : > { %1063 = vmatmul.mubr.f32.gmra.mrb[42].mxu0 %v3887_v27  ;;  %3340 = vmatprep.subr.bf16.mxu1 %v5003_v26 }
  0xb4   : > { %1067 = vmatprep.mubr.f32.mxu0 %v5007_v44 }
  0xb5   : > { %1473 = vmatmul.mubr.f32.gmra.mrb[58].mxu1 %v3712_v39  ;;  %v3405_v39 = vld [vmem:[#allocation2 + $0x170] sm:$0xff] }
  0xb6   : > { %1477 = vmatprep.mubr.f32.mxu1 %v3404_v43  ;;  %3342 = vmatpush1.bf16.msra.mxu1 %v3341_v21  ;;  %v2752_v21 = vld [vmem:[%s4975_s1 + $0x478] sm:$0xff]  ;;  %v4515_v43 = vld [vmem:[#allocation2 + $0x190] sm:$0xff] }
  0xb7   : > { %1068 = vmatmul.mubr.f32.gmra.mrb[44].mxu0 %v4367_v6  ;;  %3343 = vmatprep.subr.bf16.mxu1 %v5003_v26 }
  0xb8   : > { %1072 = vmatprep.mubr.f32.mxu0 %v5008_v56 }
  0xb9   : > { %1478 = vmatmul.mubr.f32.gmra.mrb[60].mxu1 %v4257_v18 }
  0xba   : > { %1482 = vmatprep.mubr.f32.mxu1 %v3405_v39  ;;  %3345 = vmatpush1.bf16.msra.mxu1 %v3344_v22  ;;  %v4520_v22 = vld [vmem:[#allocation2 + $0x1a8] sm:$0xff]  ;;  %v4529_v39 = vld [vmem:[#allocation2 + $0x1f0] sm:$0xff] }
  0xbb   : > { %1073 = vmatmul.mubr.f32.gmra.mrb[46].mxu0 %v5009_v40  ;;  %3346 = vmatprep.subr.bf16.mxu1 %v5003_v26  ;;  %v5013_v26 = vld [vmem:[#allocation7_spill] sm:$0xff] }
  0xbc   : > { %1077 = vmatprep.mubr.f32.mxu0 %v5010_v60 }
  0xbd   : > { %1483 = vmatmul.mubr.f32.gmra.mrb[62].mxu1 %v3746_v57  ;;  %v5014_v57 = vld [vmem:[#allocation9_spill] sm:$0xff] }
  0xbe   : > { %1487 = vmatprep.mubr.f32.mxu1 %v3406_v46  ;;  %3348 = vmatpush1.bf16.msra.mxu1 %v3347_v51  ;;  %v1797_v51 = vld [vmem:[#allocation2 + $0x78] sm:$0xff]  ;;  %v1800_v46 = vld [vmem:[#allocation2 + $0x90] sm:$0xff] }
  0xbf   : > { %1078 = vmatmul.mubr.f32.gmra.mrb[48].mxu0 %v4383_v53 }
  0xc0   : > { %1082 = vmatprep.mubr.f32.mxu0 %v5011_v58 }
  0xc1   : > { %1488 = vmatmul.mubr.f32.gmra.mrb[64].mxu1 %v4279_v31 }
  0xc2   : > { %1492 = vmatprep.mubr.f32.mxu1 %v3407_v0  ;;  %v4539_v0 = vld [vmem:[#allocation2 + $0x238] sm:$0xff] }
  0xc3   : > { %1083 = vmatmul.mubr.f32.gmra.mrb[50].mxu0 %v5012_v45 }
  0xc4   : > { %1087 = vmatprep.mubr.f32.mxu0 %v5013_v26 }
  0xc5   : > { %1493 = vmatmul.mubr.f32.gmra.mrb[66].mxu1 %v3776_v9  ;;  %v2740_v9 = vld [vmem:[%s4975_s1 + $0x418] sm:$0xff] }
  0xc6   : > { %1497 = vmatprep.mubr.f32.mxu1 %v3751_v61  ;;  %v4411_v61 = vld [vmem:[#allocation2 + $0x300] sm:$0xff] }
  0xc7   : > { %1088 = vmatmul.mubr.f32.gmra.mrb[52].mxu0 %v4391_v37 }
  0xc8   : > { %1092 = vmatprep.mubr.f32.mxu0 %v3900_v50 }
  0xc9   : > { %1498 = vmatmul.mubr.f32.gmra.mrb[68].mxu1 %v4301_v47 }
  0xca   : > { %1502 = vmatprep.mubr.f32.mxu1 %v3754_v62  ;;  %v2739_v62 = vld [vmem:[%s4975_s1 + $0x410] sm:$0xff] }
  0xcb   : > { %1093 = vmatmul.mubr.f32.gmra.mrb[54].mxu0 %v3997_v52 }
  0xcc   : > { %1097 = vmatprep.mubr.f32.mxu0 %v5014_v57 }
  0xcd   : > { %1503 = vmatmul.mubr.f32.gmra.mrb[70].mxu1 %v3819_v33  ;;  %v615_v33 = vld [vmem:[#allocation2 + $0x58] sm:$0xff] }
  0xce   : > { %1507 = vmatprep.mubr.f32.mxu1 %v3782_v11  ;;  %v612_v11 = vld [vmem:[#allocation2 + $0x40] sm:$0xff] }
  0xcf   : > { %1098 = vmatmul.mubr.f32.gmra.mrb[56].mxu0 %v4401_v54 }
  0xd0   : > { %1102 = vmatprep.mubr.f32.mxu0 %v3930_v24 }
  0xd1   : > { %1508 = vmatmul.mubr.f32.gmra.mrb[72].mxu1 %v4323_v29 }
  0xd2   : > { %1512 = vmatprep.mubr.f32.mxu1 %v3785_v12  ;;  %v3353_v12 = vpack.c.bf16 %v2740_v9, %v2739_v62  ;;  %v4545_v62 = vld [vmem:[#allocation2 + $0x268] sm:$0xff]  ;;  %v4547_v9 = vld [vmem:[#allocation2 + $0x280] sm:$0xff] }
  0xd3   : > { %1103 = vmatmul.mubr.f32.gmra.mrb[58].mxu0 %v4033_v42 }
  0xd4   : > { %1107 = vmatprep.mubr.f32.mxu0 %v3952_v38  ;;  %v2743_v38 = vld [vmem:[%s4975_s1 + $0x430] sm:$0xff] }
  0xd5   : > { %1513 = vmatmul.mubr.f32.gmra.mrb[74].mxu1 %v3852_v59  ;;  %v4438_v59 = vld [vmem:[#allocation2 + $0x70] sm:$0xff] }
  0xd6   : > { %1517 = vmatprep.mubr.f32.mxu1 %v3813_v28  ;;  %v2741_v28 = vld [vmem:[%s4975_s1 + $0x420] sm:$0xff] }
  0xd7   : > { %1108 = vmatmul.mubr.f32.gmra.mrb[60].mxu0 %v4411_v61 }
  0xd8   : > { %1112 = vmatprep.mubr.f32.mxu0 %v3958_v63  ;;  %v2744_v63 = vld [vmem:[%s4975_s1 + $0x438] sm:$0xff] }
  0xd9   : > { %1518 = vmatmul.mubr.f32.gmra.mrb[76].mxu1 %v4345_v2  ;;  %v3361_v5 = vpack.c.bf16 %v2744_v63, %v2743_v38  ;;  %v4559_v63 = vld [vmem:[#allocation2 + $0x2c8] sm:$0xff] }
  0xda   : > { %1522 = vmatprep.mubr.f32.mxu1 %v3816_v32  ;;  %v2742_v32 = vld [vmem:[%s4975_s1 + $0x428] sm:$0xff] }
  0xdb   : > { %1113 = vmatmul.mubr.f32.gmra.mrb[62].mxu0 %v4074_v1  ;;  %v4448_v1 = vld [vmem:[#allocation2 + $0x88] sm:$0xff] }
  0xdc   : > { %3013 = vmatprep.mubr.f32.mxu0 %v4209_v49 }
  0xdd   : > { %1523 = vmatmul.mubr.f32.gmra.mrb[78].mxu1 %v3887_v27  ;;  %v3357_v27 = vpack.c.bf16 %v2742_v32, %v2741_v28  ;;  %v4551_v28 = vld [vmem:[#allocation2 + $0x298] sm:$0xff]  ;;  %v4553_v32 = vld [vmem:[#allocation2 + $0x2b0] sm:$0xff] }
  0xde   : > { %1527 = vmatprep.mubr.f32.mxu1 %v5007_v44  ;;  %v4512_v44 = vld [vmem:[#allocation2 + $0x178] sm:$0xff] }
  0xdf   : > { %3014 = vmatmul.mubr.f32.vlgmr.msra.gmra.mrb[64].mxu0 %v4209_v49 }
  0xe0   : > { %3016 = vmatprep.mubr.f32.mxu0 %v612_v11  ;;  %3352 = vmatpush3.bf16.msra.mxu0 %v4212_v8  ;;  %v4451_v8 = vld [vmem:[#allocation2 + $0xa0] sm:$0xff] }
  0xe1   : > { %1528 = vmatmul.mubr.f32.gmra.mrb[80].mxu1 %v4367_v6  ;;  %3354 = vmatprep.subr.bf16.mxu0 %v3353_v12  ;;  %v1806_v11 = vld [vmem:[#allocation2 + $0xc0] sm:$0xff] }
  0xe2   : > { %1532 = vmatprep.mubr.f32.mxu1 %v5008_v56  ;;  %v1798_v56 = vld [vmem:[#allocation2 + $0x80] sm:$0xff] }
  0xe3   : > { %3017 = vmatmul.mubr.f32.gmra.mrb[66].mxu0 %v615_v33  ;;  %v1809_v33 = vld [vmem:[#allocation2 + $0xd8] sm:$0xff] }
  0xe4   : > { %3019 = vmatprep.mubr.f32.mxu0 %v4438_v59  ;;  %3356 = vmatpush3.bf16.msra.mxu0 %v3353_v12  ;;  %v1810_v12 = vld [vmem:[#allocation2 + $0xe0] sm:$0xff] }
  0xe5   : > { %1533 = vmatmul.mubr.f32.gmra.mrb[82].mxu1 %v5009_v40  ;;  %3358 = vmatprep.subr.bf16.mxu0 %v3357_v27  ;;  %v1801_v40 = vld [vmem:[#allocation2 + $0x98] sm:$0xff] }
  0xe6   : > { %1537 = vmatprep.mubr.f32.mxu1 %v5010_v60  ;;  %v4535_v60 = vld [vmem:[#allocation2 + $0x220] sm:$0xff] }
  0xe7   : > { %3020 = vmatmul.mubr.f32.gmra.mrb[68].mxu0 %v4448_v1 }
  0xe8   : > { %3022 = vmatprep.mubr.f32.mxu0 %v4451_v8  ;;  %3360 = vmatpush3.bf16.msra.mxu0 %v3357_v27  ;;  %v1813_v27 = vld [vmem:[#allocation2 + $0xf8] sm:$0xff] }
  0xe9   : > { %1538 = vmatmul.mubr.f32.gmra.mrb[84].mxu1 %v4383_v53  ;;  %3362 = vmatprep.subr.bf16.mxu0 %v3361_v5 }
  0xea   : > { %1542 = vmatprep.mubr.f32.mxu1 %v5011_v58  ;;  %v1804_v58 = vld [vmem:[#allocation2 + $0xb0] sm:$0xff] }
  0xeb   : > { %3023 = vmatmul.mubr.f32.gmra.mrb[70].mxu0 %v4462_v13 }
  0xec   : > { %3025 = vmatprep.mubr.f32.mxu0 %v4465_v14  ;;  %3364 = vmatpush3.bf16.msra.mxu0 %v3361_v5 }
  0xed   : > { %1543 = vmatmul.mubr.f32.gmra.mrb[86].mxu1 %v5012_v45  ;;  %3366 = vmatprep.subr.bf16.mxu0 %v3365_v7  ;;  %v4541_v45 = vld [vmem:[#allocation2 + $0x250] sm:$0xff] }
  0xee   : > { %1547 = vmatprep.mubr.f32.mxu1 %v5013_v26  ;;  %v1803_v26 = vld [vmem:[#allocation2 + $0xa8] sm:$0xff] }
  0xef   : > { %3026 = vmatmul.mubr.f32.gmra.mrb[72].mxu0 %v4476_v20 }
  0xf0   : > { %3028 = vmatprep.mubr.f32.mxu0 %v4479_v10  ;;  %3368 = vmatpush3.bf16.msra.mxu0 %v3365_v7  ;;  %v1816_v7 = vld [vmem:[#allocation2 + $0x110] sm:$0xff] }
  0xf1   : > { %1548 = vmatmul.mubr.f32.gmra.mrb[88].mxu1 %v4391_v37  ;;  %3370 = vmatprep.subr.bf16.mxu0 %v3369_v15 }
  0xf2   : > { %1552 = vmatprep.mubr.f32.mxu1 %v3900_v50  ;;  %v3377_v50 = vpack.c.bf16 %v2752_v21, %v2751_v25  ;;  %v1818_v21 = vld [vmem:[#allocation2 + $0x120] sm:$0xff] }
  0xf3   : > { %3029 = vmatmul.mubr.f32.gmra.mrb[74].mxu0 %v4490_v36 }
  0xf4   : > { %3031 = vmatprep.mubr.f32.mxu0 %v4493_v48  ;;  %3372 = vmatpush3.bf16.msra.mxu0 %v3369_v15 }
  0xf5   : > { %1553 = vmatmul.mubr.f32.gmra.mrb[90].mxu1 %v3997_v52  ;;  %3374 = vmatprep.subr.bf16.mxu0 %v3373_v16  ;;  %v1795_v52 = vld [vmem:[#allocation2 + $0x68] sm:$0xff] }
  0xf6   : > { %1557 = vmatprep.mubr.f32.mxu1 %v5014_v57  ;;  %v1807_v57 = vld [vmem:[#allocation2 + $0xc8] sm:$0xff] }
  0xf7   : > { %3032 = vmatmul.mubr.f32.gmra.mrb[76].mxu0 %v4504_v35 }
  0xf8   : > { %3034 = vmatprep.mubr.f32.mxu0 %v4507_v30  ;;  %3376 = vmatpush3.bf16.msra.mxu0 %v3373_v16 }
  0xf9   : > { %1558 = vmatmul.mubr.f32.gmra.mrb[92].mxu1 %v4401_v54  ;;  %3378 = vmatprep.subr.bf16.mxu0 %v3377_v50 }
  0xfa   : > { %1562 = vmatprep.mubr.f32.mxu1 %v3930_v24  ;;  %v4527_v24 = vld [vmem:[#allocation2 + $0x1d8] sm:$0xff] }
  0xfb   : > { %3035 = vmatmul.mubr.f32.gmra.mrb[78].mxu0 %v4512_v44 }
  0xfc   : > { %3037 = vmatprep.mubr.f32.mxu0 %v4515_v43  ;;  %3380 = vmatpush3.bf16.msra.mxu0 %v3377_v50  ;;  %v1822_v50 = vld [vmem:[#allocation2 + $0x140] sm:$0xff] }
  0xfd   : > { %1563 = vmatmul.mubr.f32.gmra.mrb[94].mxu1 %v4033_v42  ;;  %v4533_v42 = vld [vmem:[#allocation2 + $0x208] sm:$0xff] }
  0xfe   : > { %2003 = vmatprep.mubr.f32.mxu1 %v1795_v52 }
  0xff   : > { %3038 = vmatmul.mubr.f32.gmra.mrb[80].mxu0 %v4520_v22 }
 0x100   : > { %3040 = vmatprep.mubr.f32.mxu0 %v4523_v23 }
 0x101   : > { %2004 = vmatmul.mubr.f32.vlgmr.msra.gmra.mrb[96].mxu1 %v1794_v17 }
 0x102   : > { %2008 = vmatprep.mubr.f32.mxu1 %v1798_v56  ;;  %v1821_v56 = vld [vmem:[#allocation2 + $0x138] sm:$0xff] }
 0x103   : > { %3041 = vmatmul.mubr.f32.gmra.mrb[82].mxu0 %v4527_v24 }
 0x104   : > { %3043 = vmatprep.mubr.f32.mxu0 %v4529_v39 }
 0x105   : > { %2009 = vmatmul.mubr.f32.gmra.mrb[98].mxu1 %v1797_v51 }
 0x106   : > { %2013 = vmatprep.mubr.f32.mxu1 %v1801_v40 }
 0x107   : > { %3044 = vmatmul.mubr.f32.gmra.mrb[84].mxu0 %v4533_v42  ;;  %v4556_v38 = vpop.f32.mrb[0].mxu1 }
 0x108   : > { %3046 = vmatprep.mubr.f32.mxu0 %v4535_v60  ;;  %v1184_v5 = vpop.f32.mrb[1].mxu1 }
 0x109   : > { %2014 = vmatmul.mubr.f32.gmra.mrb[100].mxu1 %v1800_v46 }
 0x10a   : > { %2018 = vmatprep.mubr.f32.mxu1 %v1804_v58 }
 0x10b   : > { %3047 = vmatmul.mubr.f32.gmra.mrb[86].mxu0 %v4539_v0 }
 0x10c   : > { %3049 = vmatprep.mubr.f32.mxu0 %v4541_v45  ;;  %v4564_v55 = vpop.f32.mrb[2].mxu1 }
 0x10d   : > { %2019 = vmatmul.mubr.f32.gmra.mrb[102].mxu1 %v1803_v26  ;;  %v4569_v15 = vpop.f32.mrb[3].mxu1 }
 0x10e   : > { %2023 = vmatprep.mubr.f32.mxu1 %v1807_v57 }
 0x10f   : > { %3050 = vmatmul.mubr.f32.gmra.mrb[88].mxu0 %v4545_v62 }
 0x110   : > { %3052 = vmatprep.mubr.f32.mxu0 %v4547_v9 }
 0x111   : > { %2024 = vmatmul.mubr.f32.gmra.mrb[104].mxu1 %v1806_v11  ;;  %v1837_v11 = vld [vmem:[#allocation2 + $0x1b8] sm:$0xff] }
 0x112   : > { %2028 = vmatprep.mubr.f32.mxu1 %v1810_v12 }
 0x113   : > { %3053 = vmatmul.mubr.f32.gmra.mrb[90].mxu0 %v4551_v28 }
 0x114   : > { %3055 = vmatprep.mubr.f32.mxu0 %v4553_v32 }
 0x115   : > { %2029 = vmatmul.mubr.f32.gmra.mrb[106].mxu1 %v1809_v33  ;;  %v3409_v33 = vld [vmem:[#allocation2 + $0x198] sm:$0xff] }
 0x116   : > { %2033 = vmatprep.mubr.f32.mxu1 %v1813_v27 }
 0x117   : > { %3056 = vmatmul.mubr.f32.gmra.mrb[92].mxu0 %v4559_v63  ;;  %v4572_v16 = vpop.f32.mrb[4].mxu1 }
 0x118   : > { %3058 = vmatprep.mubr.f32.mxu0 %v4561_v4  ;;  %v4575_v25 = vpop.f32.mrb[5].mxu1 }
 0x119   : > { %2034 = vmatmul.mubr.f32.gmra.mrb[108].mxu1 %v1812_v3 }
 0x11a   : > { %2038 = vmatprep.mubr.f32.mxu1 %v1816_v7 }
 0x11b   : > { %3059 = vmatmul.mubr.f32.gmra.mrb[94].mxu0 %v4567_v41 }
 0x11c   : > { %3093 = vmatprep.mubr.f32.mxu0 %v4438_v59  ;;  %v1825_v59 = vld [vmem:[#allocation2 + $0x158] sm:$0xff] }
 0x11d   : > { %2039 = vmatmul.mubr.f32.gmra.mrb[110].mxu1 %v1815_v34  ;;  %v1843_v34 = vld [vmem:[#allocation2 + $0x1e8] sm:$0xff] }
 0x11e   : > { %2043 = vmatprep.mubr.f32.mxu1 %v1819_v19  ;;  %v4578_v52 = vpop.f32.mrb[6].mxu1 }
 0x11f   : > { %3094 = vmatmul.mubr.f32.vlgmr.msra.gmra.mrb[96].mxu0 %v4448_v1  ;;  %v4581_v17 = vpop.f32.mrb[7].mxu1  ;;  %v1828_v1 = vld [vmem:[#allocation2 + $0x170] sm:$0xff] }
 0x120   : > { %3096 = vmatprep.mubr.f32.mxu0 %v4451_v8 }
 0x121   : > { %2044 = vmatmul.mubr.f32.gmra.mrb[112].mxu1 %v1818_v21 }
 0x122   : > { %2048 = vmatprep.mubr.f32.mxu1 %v1822_v50  ;;  %v1846_v50 = vld [vmem:[#allocation2 + $0x200] sm:$0xff] }
 0x123   : > { %3097 = vmatmul.mubr.f32.gmra.mrb[98].mxu0 %v4462_v13  ;;  %v4584_v51 = vpop.f32.mrb[8].mxu1  ;;  %v1831_v13 = vld [vmem:[#allocation2 + $0x188] sm:$0xff] }
 0x124   : > { %3099 = vmatprep.mubr.f32.mxu0 %v4465_v14  ;;  %v4587_v40 = vpop.f32.mrb[9].mxu1 }
 0x125   : > { %2049 = vmatmul.mubr.f32.gmra.mrb[114].mxu1 %v1821_v56 }
 0x126   : > { %2053 = vmatprep.mubr.f32.mxu1 %v1825_v59 }
 0x127   : > { %3100 = vmatmul.mubr.f32.gmra.mrb[100].mxu0 %v4476_v20  ;;  %v4590_v8 = vpop.f32.mrb[10].mxu1  ;;  %v3408_v20 = vld [vmem:[#allocation2 + $0x168] sm:$0xff] }
 0x128   : > { %3102 = vmatprep.mubr.f32.mxu0 %v4479_v10  ;;  %v4593_v46 = vpop.f32.mrb[11].mxu1  ;;  %v1834_v10 = vld [vmem:[#allocation2 + $0x1a0] sm:$0xff] }
 0x129   : > { %2054 = vmatmul.mubr.f32.gmra.mrb[116].mxu1 %v4257_v18 }
 0x12a   : > { %2058 = vmatprep.mubr.f32.mxu1 %v1828_v1 }
 0x12b   : > { %3103 = vmatmul.mubr.f32.gmra.mrb[102].mxu0 %v4490_v36  ;;  %v4597_v14 = vpop.f32.mrb[12].mxu1 }
 0x12c   : > { %3105 = vmatprep.mubr.f32.mxu0 %v4493_v48  ;;  %v4600_v58 = vpop.f32.mrb[13].mxu1 }
 0x12d   : > { %2059 = vmatmul.mubr.f32.gmra.mrb[118].mxu1 %v3408_v20 }
 0x12e   : > { %2063 = vmatprep.mubr.f32.mxu1 %v1831_v13 }
 0x12f   : > { %3106 = vmatmul.mubr.f32.gmra.mrb[104].mxu0 %v4504_v35  ;;  %v4603_v26 = vpop.f32.mrb[14].mxu1 }
 0x130   : > { %3108 = vmatprep.mubr.f32.mxu0 %v4507_v30  ;;  %v4606_v18 = vpop.f32.mrb[15].mxu1 }
 0x131   : > { %2064 = vmatmul.mubr.f32.gmra.mrb[120].mxu1 %v4279_v31 }
 0x132   : > { %v959_v36 = vpop.f32.mrb[0].mxu0  ;;  %2068 = vmatprep.mubr.f32.mxu1 %v1834_v10 }
 0x133   : > { %v4609_v57 = vadd.f32 %v1184_v5, %v959_v36  ;;  %3109 = vmatmul.mubr.f32.gmra.mrb[106].mxu0 %v4512_v44  ;;  %v961_v48 = vpop.f32.mrb[1].mxu0  ;;  %v1840_v5 = vld [vmem:[#allocation2 + $0x1d0] sm:$0xff] }
 0x134   : > { %v4612_v12 = vpop.f32.mrb[16].mxu1  ;;  %3111 = vmatprep.mubr.f32.mxu0 %v4515_v43 }
 0x135   : > { %v4615_v35 = vpop.f32.mrb[17].mxu1  ;;  %2069 = vmatmul.mubr.f32.gmra.mrb[122].mxu1 %v3409_v33 }
 0x136   : > { %v964_v30 = vpop.f32.mrb[2].mxu0  ;;  %2073 = vmatprep.mubr.f32.mxu1 %v1837_v11 }
 0x137   : > { %v4618_v31 = vadd.f32 %v4556_v38, %v964_v30  ;;  %3112 = vmatmul.mubr.f32.gmra.mrb[108].mxu0 %v4520_v22  ;;  %v966_v27 = vpop.f32.mrb[3].mxu0 }
 0x138   : > { %v4621_v44 = vpop.f32.mrb[18].mxu1  ;;  %3114 = vmatprep.mubr.f32.mxu0 %v4523_v23  ;;  %v3410_v23 = vld [vmem:[#allocation2 + $0x1c8] sm:$0xff] }
 0x139   : > { %v4624_v3 = vpop.f32.mrb[19].mxu1  ;;  %2074 = vmatmul.mubr.f32.gmra.mrb[124].mxu1 %v4301_v47 }
 0x13a   : > { %v969_v43 = vpop.f32.mrb[4].mxu0  ;;  %2078 = vmatprep.mubr.f32.mxu1 %v1840_v5 }
 0x13b   : > { %v4628_v7 = vadd.f32 %v4569_v15, %v969_v43  ;;  %3115 = vmatmul.mubr.f32.gmra.mrb[110].mxu0 %v4527_v24  ;;  %v971_v38 = vpop.f32.mrb[5].mxu0 }
 0x13c   : > { %v4631_v22 = vpop.f32.mrb[20].mxu1  ;;  %3117 = vmatprep.mubr.f32.mxu0 %v4529_v39 }
 0x13d   : > { %v4634_v19 = vpop.f32.mrb[21].mxu1  ;;  %2079 = vmatmul.mubr.f32.gmra.mrb[126].mxu1 %v3410_v23 }
 0x13e   : > { %v974_v21 = vpop.f32.mrb[6].mxu0  ;;  %2083 = vmatprep.mubr.f32.mxu1 %v1843_v34  ;;  %v1861_v34 = vld [vmem:[#allocation2 + $0x278] sm:$0xff] }
 0x13f   : > { %v4637_v47 = vadd.f32 %v4564_v55, %v974_v21  ;;  %3118 = vmatmul.mubr.f32.gmra.mrb[112].mxu0 %v4533_v42  ;;  %v976_v15 = vpop.f32.mrb[7].mxu0  ;;  %v1849_v55 = vld [vmem:[#allocation2 + $0x218] sm:$0xff] }
 0x140   : > { %v4640_v24 = vpop.f32.mrb[22].mxu1  ;;  %3120 = vmatprep.mubr.f32.mxu0 %v4535_v60  ;;  %v3411_v60 = vld [vmem:[#allocation2 + $0x1f8] sm:$0xff] }
 0x141   : > { %v4643_v56 = vpop.f32.mrb[23].mxu1  ;;  %2084 = vmatmul.mubr.f32.gmra.mrb[128].mxu1 %v4323_v29  ;;  %v3413_v15 = vld [vmem:[#allocation2 + $0x258] sm:$0xff] }
 0x142   : > { %v979_v39 = vpop.f32.mrb[8].mxu0  ;;  %2088 = vmatprep.mubr.f32.mxu1 %v1846_v50 }
 0x143   : > { %v4647_v59 = vadd.f32 %v4575_v25, %v979_v39  ;;  %v981_v1 = vpop.f32.mrb[9].mxu0  ;;  %3121 = vmatmul.mubr.f32.gmra.mrb[114].mxu0 %v4539_v0  ;;  %v1852_v25 = vld [vmem:[#allocation2 + $0x230] sm:$0xff] }
 0x144   : > { %v4650_v42 = vpop.f32.mrb[24].mxu1  ;;  %3123 = vmatprep.mubr.f32.mxu0 %v4541_v45  ;;  %v1864_v39 = vld [vmem:[#allocation2 + $0x290] sm:$0xff] }
 0x145   : > { %v4653_v13 = vpop.f32.mrb[25].mxu1  ;;  %2089 = vmatmul.mubr.f32.gmra.mrb[130].mxu1 %v3411_v60 }
 0x146   : > { %v984_v20 = vpop.f32.mrb[10].mxu0  ;;  %2093 = vmatprep.mubr.f32.mxu1 %v1849_v55 }
 0x147   : > { %v4656_v29 = vadd.f32 %v4572_v16, %v984_v20  ;;  %v986_v10 = vpop.f32.mrb[11].mxu0  ;;  %3124 = vmatmul.mubr.f32.gmra.mrb[116].mxu0 %v4545_v62  ;;  %v1855_v16 = vld [vmem:[#allocation2 + $0x248] sm:$0xff] }
 0x148   : > { %v4659_v36 = vpop.f32.mrb[26].mxu1  ;;  %3126 = vmatprep.mubr.f32.mxu0 %v4547_v9  ;;  %v3412_v9 = vld [vmem:[#allocation2 + $0x228] sm:$0xff] }
 0x149   : > { %v4662_v0 = vpop.f32.mrb[27].mxu1  ;;  %2094 = vmatmul.mubr.f32.gmra.mrb[132].mxu1 %v4345_v2 }
 0x14a   : > { %v989_v45 = vpop.f32.mrb[12].mxu0  ;;  %2098 = vmatprep.mubr.f32.mxu1 %v1852_v25 }
 0x14b   : > { %v4666_v48 = vadd.f32 %v4581_v17, %v989_v45  ;;  %v991_v11 = vpop.f32.mrb[13].mxu0  ;;  %3127 = vmatmul.mubr.f32.gmra.mrb[118].mxu0 %v4551_v28  ;;  %v1858_v17 = vld [vmem:[#allocation2 + $0x260] sm:$0xff] }
 0x14c   : > { %v4669_v33 = vpop.f32.mrb[28].mxu1  ;;  %3129 = vmatprep.mubr.f32.mxu0 %v4553_v32  ;;  %v1880_v32 = vld [vmem:[#allocation2 + $0x310] sm:$0xff]  ;;  %v3414_v11 = vld [vmem:[#allocation2 + $0x288] sm:$0xff] }
 0x14d   : > { %v4672_v62 = vpop.f32.mrb[29].mxu1  ;;  %2099 = vmatmul.mubr.f32.gmra.mrb[134].mxu1 %v3412_v9  ;;  %v1870_v9 = vld [vmem:[#allocation2 + $0x2c0] sm:$0xff] }
 0x14e   : > { %v994_v30 = vpop.f32.mrb[14].mxu0  ;;  %2103 = vmatprep.mubr.f32.mxu1 %v1855_v16 }
 0x14f   : > { %v4675_v2 = vadd.f32 %v4578_v52, %v994_v30  ;;  %v996_v27 = vpop.f32.mrb[15].mxu0  ;;  %3130 = vmatmul.mubr.f32.gmra.mrb[120].mxu0 %v4559_v63  ;;  %v1883_v63 = vld [vmem:[#allocation2 + $0x328] sm:$0xff] }
 0x150   : > { %v4678_v5 = vpop.f32.mrb[30].mxu1  ;;  %3132 = vmatprep.mubr.f32.mxu0 %v4561_v4 }
 0x151   : > { %v4681_v28 = vpop.f32.mrb[31].mxu1  ;;  %2104 = vmatmul.mubr.f32.gmra.mrb[136].mxu1 %v4367_v6 }
 0x152   : > { %v999_v43 = vpop.f32.mrb[16].mxu0  ;;  %2108 = vmatprep.mubr.f32.mxu1 %v1858_v17 }
 0x153   : > { %v4685_v38 = vadd.f32 %v4587_v40, %v999_v43  ;;  %v1001_v52 = vpop.f32.mrb[17].mxu0  ;;  %3133 = vmatmul.mubr.f32.gmra.mrb[122].mxu0 %v4567_v41 }
 0x154   : > { %v1409_v23 = vpop.f32.mrb[32].mxu1  ;;  %3135 = vmatprep.mubr.f32.mxu0 %v1880_v32  ;;  %v1873_v32 = vld [vmem:[#allocation2 + $0x2d8] sm:$0xff] }
 0x155   : > { %v4689_v21 = vadd.f32 %v1409_v23, %v4609_v57  ;;  %v1411_v4 = vpop.f32.mrb[33].mxu1  ;;  %2109 = vmatmul.mubr.f32.gmra.mrb[138].mxu1 %v3413_v15 }
 0x156   : > { %v1004_v6 = vpop.f32.mrb[18].mxu0  ;;  %2113 = vmatprep.mubr.f32.mxu1 %v1861_v34  ;;  %v3415_v34 = vld [vmem:[#allocation2 + $0x2b8] sm:$0xff] }
 0x157   : > { %v4692_v50 = vadd.f32 %v4584_v51, %v1004_v6  ;;  %v1006_v40 = vpop.f32.mrb[19].mxu0  ;;  %3136 = vmatmul.mubr.f32.gmra.mrb[124].mxu0 %v1883_v63  ;;  %v1867_v51 = vld [vmem:[#allocation2 + $0x2a8] sm:$0xff]  ;;  %v1876_v63 = vld [vmem:[#allocation2 + $0x2f0] sm:$0xff] }
 0x158   : > { %v1414_v1 = vpop.f32.mrb[34].mxu1  ;;  %3138 = vmatprep.mubr.f32.mxu0 %v4209_v49 }
 0x159   : > { %v4696_v41 = vadd.f32 %v1414_v1, %v4618_v31  ;;  %v1416_v55 = vpop.f32.mrb[35].mxu1  ;;  %2114 = vmatmul.mubr.f32.gmra.mrb[140].mxu1 %v4383_v53 }
 0x15a   : > { %v1009_v57 = vpop.f32.mrb[20].mxu0  ;;  %2118 = vmatprep.mubr.f32.mxu1 %v1864_v39  ;;  %v1879_v39 = vld [vmem:[#allocation2 + $0x308] sm:$0xff] }
 0x15b   : > { %v4700_v60 = vadd.f32 %v4593_v46, %v1009_v57  ;;  %v1011_v20 = vpop.f32.mrb[21].mxu0  ;;  %3139 = vmatmul.mubr.f32.gmra.mrb[126].mxu0 %v4209_v49  ;;  %v3416_v57 = vld [vmem:[#allocation2 + $0x2e8] sm:$0xff] }
 0x15c   : > { %v1419_v10 = vpop.f32.mrb[36].mxu1 }
 0x15d   : > { %v4704_v25 = vadd.f32 %v1419_v10, %v4628_v7  ;;  %v1421_v45 = vpop.f32.mrb[37].mxu1  ;;  %2119 = vmatmul.mubr.f32.gmra.mrb[142].mxu1 %v3414_v11 }
 0x15e   : > { %v1014_v31 = vpop.f32.mrb[22].mxu0  ;;  %2123 = vmatprep.mubr.f32.mxu1 %v1867_v51 }
 0x15f   : > { %v4707_v53 = vadd.f32 %v4590_v8, %v1014_v31  ;;  %v1016_v16 = vpop.f32.mrb[23].mxu0 }
 0x160   : > { %v1424_v46 = vpop.f32.mrb[38].mxu1 }
 0x161   : > { %v4710_v30 = vadd.f32 %v1424_v46, %v4637_v47  ;;  %v1426_v27 = vpop.f32.mrb[39].mxu1  ;;  %2124 = vmatmul.mubr.f32.gmra.mrb[144].mxu1 %v4391_v37 }
 0x162   : > { %v1019_v49 = vpop.f32.mrb[24].mxu0  ;;  %2128 = vmatprep.mubr.f32.mxu1 %v1870_v9 }
 0x163   : > { %v4714_v7 = vadd.f32 %v4600_v58, %v1019_v49  ;;  %v1021_v17 = vpop.f32.mrb[25].mxu0  ;;  %v3418_v49 = vld [vmem:[#allocation2] sm:$0xff] }
 0x164   : > { %v1429_v43 = vpop.f32.mrb[40].mxu1 }
 0x165   : > { %v4717_v8 = vadd.f32 %v1429_v43, %v4647_v59  ;;  %v1431_v52 = vpop.f32.mrb[41].mxu1  ;;  %2129 = vmatmul.mubr.f32.gmra.mrb[146].mxu1 %v3415_v34 }
 0x166   : > { %v1024_v23 = vpop.f32.mrb[26].mxu0  ;;  %2133 = vmatprep.mubr.f32.mxu1 %v1873_v32 }
 0x167   : > { %v4720_v47 = vadd.f32 %v4597_v14, %v1024_v23  ;;  %v1026_v37 = vpop.f32.mrb[27].mxu0 }
 0x168   : > { %v1434_v4 = vpop.f32.mrb[42].mxu1 }
 0x169   : > { %v4723_v58 = vadd.f32 %v1434_v4, %v4656_v29  ;;  %v1436_v15 = vpop.f32.mrb[43].mxu1  ;;  %2134 = vmatmul.mubr.f32.gmra.mrb[148].mxu1 %v4401_v54  ;;  %v1882_v54 = vld [vmem:[#allocation2 + $0x320] sm:$0xff] }
 0x16a   : > { %v1029_v6 = vpop.f32.mrb[28].mxu0  ;;  %2138 = vmatprep.mubr.f32.mxu1 %v1876_v63 }
 0x16b   : > { %v4727_v59 = vadd.f32 %v4606_v18, %v1029_v6  ;;  %v1031_v40 = vpop.f32.mrb[29].mxu0 }
 0x16c   : > { %v1439_v1 = vpop.f32.mrb[44].mxu1 }
 0x16d   : > { %v4730_v14 = vadd.f32 %v1439_v1, %v4666_v48  ;;  %v1441_v55 = vpop.f32.mrb[45].mxu1  ;;  %2139 = vmatmul.mubr.f32.gmra.mrb[150].mxu1 %v3416_v57 }
 0x16e   : > { %v1034_v20 = vpop.f32.mrb[30].mxu0  ;;  %2143 = vmatprep.mubr.f32.mxu1 %v1879_v39 }
 0x16f   : > { %v1260_v29 = vadd.f32 %v4603_v26, %v1034_v20  ;;  %v1036_v51 = vpop.f32.mrb[31].mxu0  ;;  %v3417_v26 = vld [vmem:[#allocation2 + $0x318] sm:$0xff] }
 0x170   : > { %v1444_v10 = vpop.f32.mrb[46].mxu1 }
 0x171   : > { %v4734_v45 = vadd.f32 %v1444_v10, %v4675_v2  ;;  %v1446_v18 = vpop.f32.mrb[47].mxu1  ;;  %2144 = vmatmul.mubr.f32.gmra.mrb[152].mxu1 %v4411_v61 }
 0x172   : > { %v1039_v11 = vpop.f32.mrb[32].mxu0  ;;  %2148 = vmatprep.mubr.f32.mxu1 %v1882_v54 }
 0x173   : > { %v1265_v48 = vadd.f32 %v4615_v35, %v1039_v11  ;;  %v1041_v31 = vpop.f32.mrb[33].mxu0 }
 0x174   : > { %v1449_v16 = vpop.f32.mrb[48].mxu1 }
 0x175   : > { %v4739_v9 = vadd.f32 %v1449_v16, %v4685_v38  ;;  %v1451_v46 = vpop.f32.mrb[49].mxu1  ;;  %2149 = vmatmul.mubr.f32.gmra.mrb[154].mxu1 %v3417_v26 }
 0x176   : > { %v1044_v27 = vpop.f32.mrb[34].mxu0  ;;  %2153 = vmatprep.mubr.f32.mxu1 %v3418_v49 }
 0x177   : > { %v1270_v2 = vadd.f32 %v4612_v12, %v1044_v27  ;;  %v1046_v17 = vpop.f32.mrb[35].mxu0 }
 0x178   : > { %v1454_v32 = vpop.f32.mrb[50].mxu1 }
 0x179   : > { %v4743_v61 = vadd.f32 %v1454_v32, %v4692_v50  ;;  %v1456_v43 = vpop.f32.mrb[51].mxu1  ;;  %2154 = vmatmul.mubr.f32.gmra.mrb[156].mxu1 %v3418_v49 }
 0x17a   : > { %v1049_v35 = vpop.f32.mrb[36].mxu0  ;;  %2158 = vmatprep.mubr.f32.mxu1 %v3418_v49 }
 0x17b   : > { %v1275_v38 = vadd.f32 %v4624_v3, %v1049_v35  ;;  %v1051_v52 = vpop.f32.mrb[37].mxu0 }
 0x17c   : > { %v1459_v34 = vpop.f32.mrb[52].mxu1 }
 0x17d   : > { %v4747_v23 = vadd.f32 %v1459_v34, %v4700_v60  ;;  %v1461_v37 = vpop.f32.mrb[53].mxu1  ;;  %2159 = vmatmul.mubr.f32.gmra.mrb[158].mxu1 %v3418_v49 }
 0x17e   : > { %v1054_v63 = vpop.f32.mrb[38].mxu0 }
 0x17f   : > { %v1280_v12 = vadd.f32 %v4621_v44, %v1054_v63  ;;  %v1056_v4 = vpop.f32.mrb[39].mxu0 }
 0x180   : > { %v1464_v15 = vpop.f32.mrb[54].mxu1 }
 0x181   : > { %v4751_v50 = vadd.f32 %v1464_v15, %v4707_v53  ;;  %v1466_v6 = vpop.f32.mrb[55].mxu1 }
 0x182   : > { %v1059_v40 = vpop.f32.mrb[40].mxu0 }
 0x183   : > { %v1285_v39 = vadd.f32 %v4634_v19, %v1059_v40  ;;  %v1061_v3 = vpop.f32.mrb[41].mxu0 }
 0x184   : > { %v1469_v1 = vpop.f32.mrb[56].mxu1 }
 0x185   : > { %v4755_v55 = vadd.f32 %v1469_v1, %v4714_v7  ;;  %v1471_v60 = vpop.f32.mrb[57].mxu1 }
 0x186   : > { %v1064_v57 = vpop.f32.mrb[42].mxu0 }
 0x187   : > { %v1290_v20 = vadd.f32 %v4631_v22, %v1064_v57  ;;  %v1066_v51 = vpop.f32.mrb[43].mxu0 }
 0x188   : > { %v1474_v44 = vpop.f32.mrb[58].mxu1 }
 0x189   : > { %v4759_v54 = vadd.f32 %v1474_v44, %v4720_v47  ;;  %v1476_v53 = vpop.f32.mrb[59].mxu1 }
 0x18a   : > { %v1069_v10 = vpop.f32.mrb[44].mxu0 }
 0x18b   : > { %v1295_v18 = vadd.f32 %v4643_v56, %v1069_v10  ;;  %v1071_v11 = vpop.f32.mrb[45].mxu0 }
 0x18c   : > { %v1479_v19 = vpop.f32.mrb[60].mxu1 }
 0x18d   : > { %v4763_v31 = vadd.f32 %v1479_v19, %v4727_v59  ;;  %v1481_v7 = vpop.f32.mrb[61].mxu1 }
 0x18e   : > { %v1074_v16 = vpop.f32.mrb[46].mxu0 }
 0x18f   : > { %v1300_v46 = vadd.f32 %v4640_v24, %v1074_v16  ;;  %v1076_v26 = vpop.f32.mrb[47].mxu0 }
 0x190   : > { %v1484_v22 = vpop.f32.mrb[62].mxu1 }
 0x191   : > { %v4766_v27 = vadd.f32 %v1484_v22, %v1260_v29  ;;  %v1486_v49 = vpop.f32.mrb[63].mxu1 }
 0x192   : > { %v1079_v47 = vpop.f32.mrb[48].mxu0 }
 0x193   : > { %v1305_v17 = vadd.f32 %v4653_v13, %v1079_v47  ;;  %v1081_v32 = vpop.f32.mrb[49].mxu0 }
 0x194   : > { %v1489_v43 = vpop.f32.mrb[64].mxu1 }
 0x195   : > { %v4769_v56 = vadd.f32 %v1489_v43, %v1265_v48  ;;  %v1491_v35 = vpop.f32.mrb[65].mxu1 }
 0x196   : > { %v1084_v52 = vpop.f32.mrb[50].mxu0 }
 0x197   : > { %v1310_v59 = vadd.f32 %v4650_v42, %v1084_v52  ;;  %v1086_v34 = vpop.f32.mrb[51].mxu0 }
 0x198   : > { %v1494_v37 = vpop.f32.mrb[66].mxu1 }
 0x199   : > { %v4772_v63 = vadd.f32 %v1494_v37, %v1270_v2  ;;  %v1496_v24 = vpop.f32.mrb[67].mxu1 }
 0x19a   : > { %v1089_v4 = vpop.f32.mrb[52].mxu0 }
 0x19b   : > { %v1315_v29 = vadd.f32 %v4662_v0, %v1089_v4  ;;  %v1091_v15 = vpop.f32.mrb[53].mxu0 }
 0x19c   : > { %v1499_v6 = vpop.f32.mrb[68].mxu1 }
 0x19d   : > { %v4775_v40 = vadd.f32 %v1499_v6, %v1275_v38  ;;  %v1501_v13 = vpop.f32.mrb[69].mxu1 }
 0x19e   : > { %v1094_v3 = vpop.f32.mrb[54].mxu0 }
 0x19f   : > { %v1320_v48 = vadd.f32 %v4659_v36, %v1094_v3  ;;  %v1096_v1 = vpop.f32.mrb[55].mxu0 }
 0x1a0   : > { %v1504_v60 = vpop.f32.mrb[70].mxu1 }
 0x1a1   : > { %v4778_v57 = vadd.f32 %v1504_v60, %v1280_v12  ;;  %v1506_v42 = vpop.f32.mrb[71].mxu1 }
 0x1a2   : > { %v1099_v51 = vpop.f32.mrb[56].mxu0 }
 0x1a3   : > { %v1325_v2 = vadd.f32 %v4672_v62, %v1099_v51  ;;  %v1101_v44 = vpop.f32.mrb[57].mxu0 }
 0x1a4   : > { %v1509_v53 = vpop.f32.mrb[72].mxu1 }
 0x1a5   : > { %v4781_v10 = vadd.f32 %v1509_v53, %v1285_v39  ;;  %v1511_v0 = vpop.f32.mrb[73].mxu1 }
 0x1a6   : > { %v1104_v11 = vpop.f32.mrb[58].mxu0 }
 0x1a7   : > { %v1330_v38 = vadd.f32 %v4669_v33, %v1104_v11  ;;  %v1106_v19 = vpop.f32.mrb[59].mxu0 }
 0x1a8   : > { %v1514_v7 = vpop.f32.mrb[74].mxu1 }
 0x1a9   : > { %v4784_v16 = vadd.f32 %v1514_v7, %v1290_v20  ;;  %v1516_v36 = vpop.f32.mrb[75].mxu1 }
 0x1aa   : > { %v1109_v26 = vpop.f32.mrb[60].mxu0 }
 0x1ab   : > { %v1335_v12 = vadd.f32 %v4681_v28, %v1109_v26  ;;  %v1111_v22 = vpop.f32.mrb[61].mxu0 }
 0x1ac   : > { %v1519_v49 = vpop.f32.mrb[76].mxu1 }
 0x1ad   : > { %v4787_v47 = vadd.f32 %v1519_v49, %v1295_v18  ;;  %v1521_v62 = vpop.f32.mrb[77].mxu1 }
 0x1ae   : > { %v1114_v32 = vpop.f32.mrb[62].mxu0 }
 0x1af   : > { %v1340_v39 = vadd.f32 %v4678_v5, %v1114_v32  ;;  %v1116_v43 = vpop.f32.mrb[63].mxu0 }
 0x1b0   : > { %v1524_v35 = vpop.f32.mrb[78].mxu1 }
 0x1b1   : > { %v4790_v52 = vadd.f32 %v1524_v35, %v1300_v46  ;;  %v1526_v33 = vpop.f32.mrb[79].mxu1 }
 0x1b2   : > { %v3015_v34 = vpop.f32.mrb[64].mxu0 }
 0x1b3   : > { %v4793_v20 = vadd.f32 %v3015_v34, %v4696_v41  ;;  %v1634_v37 = vpop.f32.mrb[65].mxu0 }
 0x1b4   : > { %v1529_v24 = vpop.f32.mrb[80].mxu1  ;;  %v4796_v28 = vadd.f32 %v1634_v37, %v4689_v21 }
 0x1b5   : > { %v4798_v18 = vadd.f32 %v1529_v24, %v1305_v17  ;;  %v1531_v4 = vpop.f32.mrb[81].mxu1 }
 0x1b6   : > { %v3018_v15 = vpop.f32.mrb[66].mxu0 }
 0x1b7   : > { %v4801_v5 = vadd.f32 %v3018_v15, %v4710_v30  ;;  %v1644_v6 = vpop.f32.mrb[67].mxu0 }
 0x1b8   : > { %v1534_v46 = vpop.f32.mrb[82].mxu1  ;;  %v4804_v13 = vadd.f32 %v1644_v6, %v4704_v25 }
 0x1b9   : > { %v4806_v3 = vadd.f32 %v1534_v46, %v1310_v59  ;;  %v1536_v41 = vpop.f32.mrb[83].mxu1 }
 0x1ba   : > { %v3021_v1 = vpop.f32.mrb[68].mxu0 }
 0x1bb   : > { %v4809_v60 = vadd.f32 %v3021_v1, %v4723_v58  ;;  %v1654_v21 = vpop.f32.mrb[69].mxu0 }
 0x1bc   : > { %v1539_v17 = vpop.f32.mrb[84].mxu1  ;;  %v4812_v42 = vadd.f32 %v1654_v21, %v4717_v8 }
 0x1bd   : > { %v4814_v51 = vadd.f32 %v1539_v17, %v1315_v29  ;;  %v1541_v30 = vpop.f32.mrb[85].mxu1 }
 0x1be   : > { %v3024_v44 = vpop.f32.mrb[70].mxu0 }
 0x1bf   : > { %v4817_v53 = vadd.f32 %v3024_v44, %v4734_v45  ;;  %v1664_v25 = vpop.f32.mrb[71].mxu0 }
 0x1c0   : > { %v1544_v59 = vpop.f32.mrb[86].mxu1  ;;  %v4820_v0 = vadd.f32 %v1664_v25, %v4730_v14 }
 0x1c1   : > { %v1545_v11 = vadd.f32 %v1544_v59, %v1320_v48  ;;  %v1546_v58 = vpop.f32.mrb[87].mxu1 }
 0x1c2   : > { %v3027_v19 = vpop.f32.mrb[72].mxu0 }
 0x1c3   : > { %v4823_v7 = vadd.f32 %v3027_v19, %v4743_v61  ;;  %v1674_v8 = vpop.f32.mrb[73].mxu0 }
 0x1c4   : > { %v1549_v36 = vpop.f32.mrb[88].mxu1  ;;  %v4826_v29 = vadd.f32 %v1674_v8, %v4739_v9 }
 0x1c5   : > { %v1550_v26 = vadd.f32 %v1549_v36, %v1325_v2  ;;  %v1551_v22 = vpop.f32.mrb[89].mxu1 }
 0x1c6   : > { %v3030_v45 = vpop.f32.mrb[74].mxu0 }
 0x1c7   : > { %v4829_v49 = vadd.f32 %v3030_v45, %v4751_v50  ;;  %v1684_v62 = vpop.f32.mrb[75].mxu0 }
 0x1c8   : > { %v1554_v14 = vpop.f32.mrb[90].mxu1  ;;  %v4832_v48 = vadd.f32 %v1684_v62, %v4747_v23 }
 0x1c9   : > { %v1555_v32 = vadd.f32 %v1554_v14, %v1330_v38  ;;  %v1556_v43 = vpop.f32.mrb[91].mxu1 }
 0x1ca   : > { %v3033_v61 = vpop.f32.mrb[76].mxu0 }
 0x1cb   : > { %v4835_v35 = vadd.f32 %v3033_v61, %v4759_v54  ;;  %v1694_v33 = vpop.f32.mrb[77].mxu0 }
 0x1cc   : > { %v1559_v9 = vpop.f32.mrb[92].mxu1  ;;  %v4838_v2 = vadd.f32 %v1694_v33, %v4755_v55 }
 0x1cd   : > { %v1560_v34 = vadd.f32 %v1559_v9, %v1335_v12  ;;  %v1561_v37 = vpop.f32.mrb[93].mxu1 }
 0x1ce   : > { %v3036_v50 = vpop.f32.mrb[78].mxu0 }
 0x1cf   : > { %v4841_v24 = vadd.f32 %v3036_v50, %v4766_v27  ;;  %v1704_v4 = vpop.f32.mrb[79].mxu0 }
 0x1d0   : > { %v1564_v23 = vpop.f32.mrb[94].mxu1  ;;  %v4844_v38 = vadd.f32 %v1704_v4, %v4763_v31 }
 0x1d1   : > { %v1565_v15 = vadd.f32 %v1564_v23, %v1340_v39  ;;  %v1566_v6 = vpop.f32.mrb[95].mxu1 }
 0x1d2   : > { %v3039_v54 = vpop.f32.mrb[80].mxu0 }
 0x1d3   : > { %v4847_v46 = vadd.f32 %v3039_v54, %v4772_v63  ;;  %v1714_v41 = vpop.f32.mrb[81].mxu0 }
 0x1d4   : > { %v4850_v55 = vadd.f32 %v1714_v41, %v4769_v56  ;;  %v2005_v12 = vpop.f32.mrb[96].mxu1 }
 0x1d5   : > { %v2007_v1 = vpop.f32.mrb[97].mxu1 }
 0x1d6   : > { %v3042_v21 = vpop.f32.mrb[82].mxu0 }
 0x1d7   : > { %v4853_v27 = vadd.f32 %v3042_v21, %v4778_v57  ;;  %v1724_v17 = vpop.f32.mrb[83].mxu0 }
 0x1d8   : > { %v4856_v31 = vadd.f32 %v1724_v17, %v4775_v40  ;;  %v2010_v39 = vpop.f32.mrb[98].mxu1 }
 0x1d9   : > { %v2012_v30 = vpop.f32.mrb[99].mxu1 }
 0x1da   : > { %v3045_v44 = vpop.f32.mrb[84].mxu0 }
 0x1db   : > { %v4859_v63 = vadd.f32 %v3045_v44, %v4784_v16  ;;  %v1734_v25 = vpop.f32.mrb[85].mxu0 }
 0x1dc   : > { %v4862_v56 = vadd.f32 %v1734_v25, %v4781_v10  ;;  %v2015_v59 = vpop.f32.mrb[100].mxu1 }
 0x1dd   : > { %v2017_v58 = vpop.f32.mrb[101].mxu1 }
 0x1de   : > { %v3048_v19 = vpop.f32.mrb[86].mxu0 }
 0x1df   : > { %v4865_v57 = vadd.f32 %v3048_v19, %v4790_v52  ;;  %v1744_v8 = vpop.f32.mrb[87].mxu0 }
 0x1e0   : > { %v4868_v40 = vadd.f32 %v1744_v8, %v4787_v47  ;;  %v2020_v36 = vpop.f32.mrb[102].mxu1 }
 0x1e1   : > { %v2022_v22 = vpop.f32.mrb[103].mxu1 }
 0x1e2   : > { %v3051_v45 = vpop.f32.mrb[88].mxu0 }
 0x1e3   : > { %v4871_v16 = vadd.f32 %v3051_v45, %v4806_v3  ;;  %v1754_v62 = vpop.f32.mrb[89].mxu0 }
 0x1e4   : > { %v4874_v10 = vadd.f32 %v1754_v62, %v4798_v18  ;;  %v2025_v14 = vpop.f32.mrb[104].mxu1 }
 0x1e5   : > { %v2027_v43 = vpop.f32.mrb[105].mxu1 }
 0x1e6   : > { %v3054_v61 = vpop.f32.mrb[90].mxu0 }
 0x1e7   : > { %v4876_v33 = vadd.f32 %v3054_v61, %v1545_v11  ;;  %v1764_v52 = vpop.f32.mrb[91].mxu0 }
 0x1e8   : > { %v4879_v9 = vadd.f32 %v1764_v52, %v4814_v51  ;;  %v2030_v47 = vpop.f32.mrb[106].mxu1 }
 0x1e9   : > { %v2032_v37 = vpop.f32.mrb[107].mxu1 }
 0x1ea   : > { %v3057_v50 = vpop.f32.mrb[92].mxu0 }
 0x1eb   : > { %v4881_v4 = vadd.f32 %v3057_v50, %v1555_v32  ;;  %v1774_v3 = vpop.f32.mrb[93].mxu0 }
 0x1ec   : > { %v4883_v23 = vadd.f32 %v1774_v3, %v1550_v26  ;;  %v2035_v18 = vpop.f32.mrb[108].mxu1 }
 0x1ed   : > { %v2037_v6 = vpop.f32.mrb[109].mxu1 }
 0x1ee   : > { %v3060_v54 = vpop.f32.mrb[94].mxu0 }
 0x1ef   : > { %v4885_v41 = vadd.f32 %v3060_v54, %v1565_v15  ;;  %v1784_v11 = vpop.f32.mrb[95].mxu0 }
 0x1f0   : > { %v4887_v1 = vadd.f32 %v1784_v11, %v1560_v34  ;;  %v2040_v21 = vpop.f32.mrb[110].mxu1 }
 0x1f1   : > { %v2042_v51 = vpop.f32.mrb[111].mxu1 }
 0x1f2   : > { %v3095_v17 = vpop.f32.mrb[96].mxu0 }
 0x1f3   : > { %v2236_v30 = vadd.f32 %v3095_v17, %v2010_v39  ;;  %v2230_v44 = vpop.f32.mrb[97].mxu0 }
 0x1f4   : > { %v2045_v26 = vpop.f32.mrb[112].mxu1  ;;  %v2231_v32 = vadd.f32 %v2230_v44, %v2005_v12 }
 0x1f5   : > { %v2390_v15 = vadd.f32 %v2236_v30, %v4793_v20  ;;  %v2047_v25 = vpop.f32.mrb[113].mxu1 }
 0x1f6   : > { %v2389_v34 = vadd.f32 %v2231_v32, %v4796_v28  ;;  %v3098_v58 = vpop.f32.mrb[98].mxu0 }
 0x1f7   : > { %2422 = vst [vmem:[%s4894_s24 + $0x8] sm:$0xff] %v2390_v15  ;;  %v2491_v39 = vmul.f32 %v2390_v15, %v2390_v15  ;;  %v2246_v19 = vadd.f32 %v3098_v58, %v2020_v36  ;;  %v2240_v8 = vpop.f32.mrb[99].mxu0 }
 0x1f8   : > { %2421 = vst [vmem:[%s4894_s24] sm:$0xff] %v2389_v34  ;;  %v2453_v22 = vadd.f32 %v2390_v15, %v2389_v34  ;;  %v2490_v45 = vmul.f32 %v2389_v34, %v2389_v34  ;;  %v2050_v62 = vpop.f32.mrb[114].mxu1  ;;  %v2241_v43 = vadd.f32 %v2240_v8, %v2015_v59 }
 0x1f9   : > { %v2392_v61 = vadd.f32 %v2246_v19, %v4801_v5  ;;  %v2052_v12 = vpop.f32.mrb[115].mxu1 }
 0x1fa   : > { %v2522_v52 = vadd.f32 %v2491_v39, %v2490_v45  ;;  %v2391_v20 = vadd.f32 %v2241_v43, %v4804_v13  ;;  %v3101_v37 = vpop.f32.mrb[100].mxu0 }
 0x1fb   : > { %2424 = vst [vmem:[%s4894_s24 + $0x18] sm:$0xff] %v2392_v61  ;;  %v2256_v28 = vadd.f32 %v3101_v37, %v2030_v47  ;;  %v2250_v50 = vpop.f32.mrb[101].mxu0  ;;  %v2493_v51 = vmul.f32 %v2392_v61, %v2392_v61 }
 0x1fc   : > { %2423 = vst [vmem:[%s4894_s24 + $0x10] sm:$0xff] %v2391_v20  ;;  %v2454_v36 = vadd.f32 %v2453_v22, %v2391_v20  ;;  %v2492_v3 = vmul.f32 %v2391_v20, %v2391_v20  ;;  %v2055_v6 = vpop.f32.mrb[116].mxu1  ;;  %v2251_v54 = vadd.f32 %v2250_v50, %v2025_v14 }
 0x1fd   : > { %v2394_v11 = vadd.f32 %v2256_v28, %v4809_v60  ;;  %v2057_v59 = vpop.f32.mrb[117].mxu1 }
 0x1fe   : > { %v2523_v5 = vadd.f32 %v2522_v52, %v2492_v3  ;;  %v2393_v17 = vadd.f32 %v2251_v54, %v4812_v42  ;;  %v2455_v30 = vadd.f32 %v2454_v36, %v2392_v61  ;;  %v3104_v13 = vpop.f32.mrb[102].mxu0 }
 0x1ff   : > { %2426 = vst [vmem:[%s4894_s24 + $0x28] sm:$0xff] %v2394_v11  ;;  %v2266_v44 = vadd.f32 %v3104_v13, %v2040_v21  ;;  %v2260_v47 = vpop.f32.mrb[103].mxu0  ;;  %v2495_v39 = vmul.f32 %v2394_v11, %v2394_v11 }
 0x200   : > { %2425 = vst [vmem:[%s4894_s24 + $0x20] sm:$0xff] %v2393_v17  ;;  %v2456_v32 = vadd.f32 %v2455_v30, %v2393_v17  ;;  %v2494_v15 = vmul.f32 %v2393_v17, %v2393_v17  ;;  %v2524_v25 = vadd.f32 %v2523_v5, %v2493_v51  ;;  %v2060_v34 = vpop.f32.mrb[118].mxu1  ;;  %v2261_v14 = vadd.f32 %v2260_v47, %v2035_v18 }
 0x201   : > { %v2396_v60 = vadd.f32 %v2266_v44, %v4817_v53  ;;  %v2062_v58 = vpop.f32.mrb[119].mxu1 }
 0x202   : > { %v2525_v19 = vadd.f32 %v2524_v25, %v2494_v15  ;;  %v2395_v42 = vadd.f32 %v2261_v14, %v4820_v0  ;;  %v2457_v8 = vadd.f32 %v2456_v32, %v2394_v11  ;;  %v3107_v22 = vpop.f32.mrb[104].mxu0 }
 0x203   : > { %2428 = vst [vmem:[%s4894_s24 + $0x38] sm:$0xff] %v2396_v60  ;;  %v2276_v21 = vadd.f32 %v3107_v22, %v2050_v62  ;;  %v2270_v45 = vpop.f32.mrb[105].mxu0  ;;  %v2497_v37 = vmul.f32 %v2396_v60, %v2396_v60 }
 0x204   : > { %2427 = vst [vmem:[%s4894_s24 + $0x30] sm:$0xff] %v2395_v42  ;;  %v2458_v43 = vadd.f32 %v2457_v8, %v2395_v42  ;;  %v2496_v61 = vmul.f32 %v2395_v42, %v2395_v42  ;;  %v2526_v12 = vadd.f32 %v2525_v19, %v2495_v39  ;;  %v2065_v52 = vpop.f32.mrb[120].mxu1  ;;  %v2271_v18 = vadd.f32 %v2270_v45, %v2045_v26 }
 0x205   : > { %v2398_v53 = vadd.f32 %v2276_v21, %v4823_v7  ;;  %v2067_v20 = vpop.f32.mrb[121].mxu1 }
 0x206   : > { %v2527_v28 = vadd.f32 %v2526_v12, %v2496_v61  ;;  %v2397_v0 = vadd.f32 %v2271_v18, %v4826_v29  ;;  %v2459_v50 = vadd.f32 %v2458_v43, %v2396_v60  ;;  %v3110_v36 = vpop.f32.mrb[106].mxu0 }
 0x207   : > { %2430 = vst [vmem:[%s4894_s24 + $0x48] sm:$0xff] %v2398_v53  ;;  %v2286_v62 = vadd.f32 %v3110_v36, %v2060_v34  ;;  %v2280_v3 = vpop.f32.mrb[107].mxu0  ;;  %v2499_v17 = vmul.f32 %v2398_v53, %v2398_v53 }
 0x208   : > { %2429 = vst [vmem:[%s4894_s24 + $0x40] sm:$0xff] %v2397_v0  ;;  %v2460_v54 = vadd.f32 %v2459_v50, %v2397_v0  ;;  %v2498_v11 = vmul.f32 %v2397_v0, %v2397_v0  ;;  %v2528_v59 = vadd.f32 %v2527_v28, %v2497_v37  ;;  %v2070_v51 = vpop.f32.mrb[122].mxu1  ;;  %v2281_v26 = vadd.f32 %v2280_v3, %v2055_v6 }
 0x209   : > { %v2400_v7 = vadd.f32 %v2286_v62, %v4829_v49  ;;  %v2072_v5 = vpop.f32.mrb[123].mxu1 }
 0x20a   : > { %v2529_v30 = vadd.f32 %v2528_v59, %v2498_v11  ;;  %v2399_v29 = vadd.f32 %v2281_v26, %v4832_v48  ;;  %v2461_v13 = vadd.f32 %v2460_v54, %v2398_v53  ;;  %v3113_v44 = vpop.f32.mrb[108].mxu0 }
 0x20b   : > { %2432 = vst [vmem:[%s4894_s24 + $0x58] sm:$0xff] %v2400_v7  ;;  %v2296_v47 = vadd.f32 %v3113_v44, %v2070_v51  ;;  %v2290_v32 = vpop.f32.mrb[109].mxu0  ;;  %v2501_v58 = vmul.f32 %v2400_v7, %v2400_v7 }
 0x20c   : > { %2431 = vst [vmem:[%s4894_s24 + $0x50] sm:$0xff] %v2399_v29  ;;  %v2462_v15 = vadd.f32 %v2461_v13, %v2399_v29  ;;  %v2500_v25 = vmul.f32 %v2399_v29, %v2399_v29  ;;  %v2530_v34 = vadd.f32 %v2529_v30, %v2499_v17  ;;  %v2075_v14 = vpop.f32.mrb[124].mxu1  ;;  %v2291_v6 = vadd.f32 %v2290_v32, %v2065_v52 }
 0x20d   : > { %v2402_v49 = vadd.f32 %v2296_v47, %v4835_v35  ;;  %v2077_v60 = vpop.f32.mrb[125].mxu1 }
 0x20e   : > { %v2531_v39 = vadd.f32 %v2530_v34, %v2500_v25  ;;  %v2401_v48 = vadd.f32 %v2291_v6, %v4838_v2  ;;  %v2463_v19 = vadd.f32 %v2462_v15, %v2400_v7  ;;  %v3116_v42 = vpop.f32.mrb[110].mxu0 }
 0x20f   : > { %2434 = vst [vmem:[%s4894_s24 + $0x68] sm:$0xff] %v2402_v49  ;;  %v2300_v8 = vpop.f32.mrb[111].mxu0  ;;  %v2503_v35 = vmul.f32 %v2402_v49, %v2402_v49 }
 0x210   : > { %2433 = vst [vmem:[%s4894_s24 + $0x60] sm:$0xff] %v2401_v48  ;;  %v2464_v22 = vadd.f32 %v2463_v19, %v2401_v48  ;;  %v2502_v21 = vmul.f32 %v2401_v48, %v2401_v48  ;;  %v2532_v45 = vadd.f32 %v2531_v39, %v2501_v58  ;;  %v2080_v43 = vpop.f32.mrb[126].mxu1  ;;  %v2301_v61 = vadd.f32 %v2300_v8, %v2075_v14 }
 0x211   : > { %v2306_v12 = vadd.f32 %v3116_v42, %v2080_v43  ;;  %v2082_v52 = vpop.f32.mrb[127].mxu1 }
 0x212   : > { %v2533_v18 = vadd.f32 %v2532_v45, %v2502_v21  ;;  %v2403_v53 = vadd.f32 %v2301_v61, %v4844_v38  ;;  %v2465_v20 = vadd.f32 %v2464_v22, %v2402_v49  ;;  %v3119_v2 = vpop.f32.mrb[112].mxu0 }
 0x213   : > { %v2404_v37 = vadd.f32 %v2306_v12, %v4841_v24  ;;  %v2310_v28 = vpop.f32.mrb[113].mxu0 }
 0x214   : > { %2435 = vst [vmem:[%s4894_s24 + $0x70] sm:$0xff] %v2403_v53  ;;  %v2466_v0 = vadd.f32 %v2465_v20, %v2403_v53  ;;  %v2504_v50 = vmul.f32 %v2403_v53, %v2403_v53  ;;  %v2534_v36 = vadd.f32 %v2533_v18, %v2503_v35  ;;  %v2085_v62 = vpop.f32.mrb[128].mxu1 }
 0x215   : > { %2436 = vst [vmem:[%s4894_s24 + $0x78] sm:$0xff] %v2404_v37  ;;  %v2311_v3 = vadd.f32 %v2310_v28, %v2085_v62  ;;  %v2087_v54 = vpop.f32.mrb[129].mxu1  ;;  %v2505_v11 = vmul.f32 %v2404_v37, %v2404_v37 }
 0x216   : > { %v2535_v59 = vadd.f32 %v2534_v36, %v2504_v50  ;;  %v2467_v51 = vadd.f32 %v2466_v0, %v2404_v37  ;;  %v3122_v26 = vpop.f32.mrb[114].mxu0 }
 0x217   : > { %v2405_v38 = vadd.f32 %v2311_v3, %v4850_v55  ;;  %v2320_v7 = vpop.f32.mrb[115].mxu0 }
 0x218   : > { %v2536_v5 = vadd.f32 %v2535_v59, %v2505_v11  ;;  %v2090_v24 = vpop.f32.mrb[130].mxu1 }
 0x219   : > { %2437 = vst [vmem:[%s4894_s24 + $0x80] sm:$0xff] %v2405_v38  ;;  %v2468_v17 = vadd.f32 %v2467_v51, %v2405_v38  ;;  %v2506_v30 = vmul.f32 %v2405_v38, %v2405_v38  ;;  %v2316_v29 = vadd.f32 %v3119_v2, %v2090_v24  ;;  %v2092_v13 = vpop.f32.mrb[131].mxu1 }
 0x21a   : > { %v3125_v44 = vpop.f32.mrb[116].mxu0 }
 0x21b   : > { %v2537_v47 = vadd.f32 %v2536_v5, %v2506_v30  ;;  %v2406_v32 = vadd.f32 %v2316_v29, %v4847_v46  ;;  %v2330_v15 = vpop.f32.mrb[117].mxu0 }
 0x21c   : > { %v2095_v25 = vpop.f32.mrb[132].mxu1 }
 0x21d   : > { %2438 = vst [vmem:[%s4894_s24 + $0x88] sm:$0xff] %v2406_v32  ;;  %v2469_v34 = vadd.f32 %v2468_v17, %v2406_v32  ;;  %v2507_v14 = vmul.f32 %v2406_v32, %v2406_v32  ;;  %v2321_v6 = vadd.f32 %v2320_v7, %v2095_v25  ;;  %v2097_v55 = vpop.f32.mrb[133].mxu1 }
 0x21e   : > { %v3128_v49 = vpop.f32.mrb[118].mxu0 }
 0x21f   : > { %v2538_v60 = vadd.f32 %v2537_v47, %v2507_v14  ;;  %v2407_v58 = vadd.f32 %v2321_v6, %v4856_v31  ;;  %v2340_v39 = vpop.f32.mrb[119].mxu0 }
 0x220   : > { %v2100_v48 = vpop.f32.mrb[134].mxu1 }
 0x221   : > { %2439 = vst [vmem:[%s4894_s24 + $0x90] sm:$0xff] %v2407_v58  ;;  %v2470_v19 = vadd.f32 %v2469_v34, %v2407_v58  ;;  %v2508_v42 = vmul.f32 %v2407_v58, %v2407_v58  ;;  %v2326_v8 = vadd.f32 %v3122_v26, %v2100_v48  ;;  %v2102_v22 = vpop.f32.mrb[135].mxu1 }
 0x222   : > { %v3131_v46 = vpop.f32.mrb[120].mxu0 }
 0x223   : > { %v2539_v21 = vadd.f32 %v2538_v60, %v2508_v42  ;;  %v2408_v45 = vadd.f32 %v2326_v8, %v4853_v27  ;;  %v2350_v43 = vpop.f32.mrb[121].mxu0 }
 0x224   : > { %v2105_v61 = vpop.f32.mrb[136].mxu1 }
 0x225   : > { %2440 = vst [vmem:[%s4894_s24 + $0x98] sm:$0xff] %v2408_v45  ;;  %v2471_v12 = vadd.f32 %v2470_v19, %v2408_v45  ;;  %v2509_v52 = vmul.f32 %v2408_v45, %v2408_v45  ;;  %v2331_v35 = vadd.f32 %v2330_v15, %v2105_v61  ;;  %v2107_v18 = vpop.f32.mrb[137].mxu1 }
 0x226   : > { %v3134_v31 = vpop.f32.mrb[122].mxu0 }
 0x227   : > { %v2540_v53 = vadd.f32 %v2539_v21, %v2509_v52  ;;  %v2409_v20 = vadd.f32 %v2331_v35, %v4862_v56  ;;  %v2360_v2 = vpop.f32.mrb[123].mxu0 }
 0x228   : > { %v2110_v37 = vpop.f32.mrb[138].mxu1 }
 0x229   : > { %2441 = vst [vmem:[%s4894_s24 + $0xa0] sm:$0xff] %v2409_v20  ;;  %v2472_v28 = vadd.f32 %v2471_v12, %v2409_v20  ;;  %v2510_v0 = vmul.f32 %v2409_v20, %v2409_v20  ;;  %v2336_v50 = vadd.f32 %v3125_v44, %v2110_v37  ;;  %v2112_v36 = vpop.f32.mrb[139].mxu1 }
 0x22a   : > { %v4938_v27 = vpop.f32.mrb[124].mxu0 }
 0x22b   : > { %v2541_v62 = vadd.f32 %v2540_v53, %v2510_v0  ;;  %v2410_v3 = vadd.f32 %v2336_v50, %v4859_v63  ;;  %v2370_v54 = vpop.f32.mrb[125].mxu0 }
 0x22c   : > { %v2115_v11 = vpop.f32.mrb[140].mxu1 }
 0x22d   : > { %2442 = vst [vmem:[%s4894_s24 + $0xa8] sm:$0xff] %v2410_v3  ;;  %v2473_v59 = vadd.f32 %v2472_v28, %v2410_v3  ;;  %v2511_v51 = vmul.f32 %v2410_v3, %v2410_v3  ;;  %v2341_v56 = vadd.f32 %v2340_v39, %v2115_v11  ;;  %v2117_v26 = vpop.f32.mrb[141].mxu1 }
 0x22e   : > { %v4942_v38 = vpop.f32.mrb[126].mxu0 }
 0x22f   : > { %v2542_v7 = vadd.f32 %v2541_v62, %v2511_v51  ;;  %v2411_v5 = vadd.f32 %v2341_v56, %v4868_v40  ;;  %v2380_v24 = vpop.f32.mrb[127].mxu0 }
 0x230   : > { %v2120_v17 = vpop.f32.mrb[142].mxu1 }
 0x231   : > { %2443 = vst [vmem:[%s4894_s24 + $0xb0] sm:$0xff] %v2411_v5  ;;  %v2474_v30 = vadd.f32 %v2473_v59, %v2411_v5  ;;  %v2512_v29 = vmul.f32 %v2411_v5, %v2411_v5  ;;  %v2346_v63 = vadd.f32 %v3128_v49, %v2120_v17  ;;  %v2122_v13 = vpop.f32.mrb[143].mxu1 }
 0x233   : > { %v2543_v44 = vadd.f32 %v2542_v7, %v2512_v29  ;;  %v2412_v47 = vadd.f32 %v2346_v63, %v4865_v57 }
 0x234   : > { %v2125_v32 = vpop.f32.mrb[144].mxu1 }
 0x235   : > { %2444 = vst [vmem:[%s4894_s24 + $0xb8] sm:$0xff] %v2412_v47  ;;  %v2475_v15 = vadd.f32 %v2474_v30, %v2412_v47  ;;  %v2513_v25 = vmul.f32 %v2412_v47, %v2412_v47  ;;  %v2351_v34 = vadd.f32 %v2350_v43, %v2125_v32  ;;  %v2127_v14 = vpop.f32.mrb[145].mxu1 }
 0x237   : > { %v2544_v6 = vadd.f32 %v2543_v44, %v2513_v25  ;;  %v2413_v40 = vadd.f32 %v2351_v34, %v4874_v10 }
 0x238   : > { %v2130_v55 = vpop.f32.mrb[146].mxu1 }
 0x239   : > { %2445 = vst [vmem:[%s4894_s24 + $0xc0] sm:$0xff] %v2413_v40  ;;  %v2476_v60 = vadd.f32 %v2475_v15, %v2413_v40  ;;  %v2514_v58 = vmul.f32 %v2413_v40, %v2413_v40  ;;  %v2356_v49 = vadd.f32 %v3131_v46, %v2130_v55  ;;  %v2132_v39 = vpop.f32.mrb[147].mxu1 }
 0x23b   : > { %v2545_v48 = vadd.f32 %v2544_v6, %v2514_v58  ;;  %v2414_v57 = vadd.f32 %v2356_v49, %v4871_v16 }
 0x23c   : > { %v2135_v19 = vpop.f32.mrb[148].mxu1 }
 0x23d   : > { %2446 = vst [vmem:[%s4894_s24 + $0xc8] sm:$0xff] %v2414_v57  ;;  %v2477_v42 = vadd.f32 %v2476_v60, %v2414_v57  ;;  %v2515_v8 = vmul.f32 %v2414_v57, %v2414_v57  ;;  %v2361_v22 = vadd.f32 %v2360_v2, %v2135_v19  ;;  %v2137_v21 = vpop.f32.mrb[149].mxu1 }
 0x23f   : > { %v2546_v45 = vadd.f32 %v2545_v48, %v2515_v8  ;;  %v2415_v10 = vadd.f32 %v2361_v22, %v4879_v9 }
 0x240   : > { %v2140_v43 = vpop.f32.mrb[150].mxu1 }
 0x241   : > { %2447 = vst [vmem:[%s4894_s24 + $0xd0] sm:$0xff] %v2415_v10  ;;  %v2478_v61 = vadd.f32 %v2477_v42, %v2415_v10  ;;  %v2516_v12 = vmul.f32 %v2415_v10, %v2415_v10  ;;  %v2366_v46 = vadd.f32 %v3134_v31, %v2140_v43  ;;  %v2142_v52 = vpop.f32.mrb[151].mxu1 }
 0x243   : > { %v2547_v35 = vadd.f32 %v2546_v45, %v2516_v12  ;;  %v2416_v16 = vadd.f32 %v2366_v46, %v4876_v33 }
 0x244   : > { %v2145_v18 = vpop.f32.mrb[152].mxu1 }
 0x245   : > { %2448 = vst [vmem:[%s4894_s24 + $0xd8] sm:$0xff] %v2416_v16  ;;  %v2479_v53 = vadd.f32 %v2478_v61, %v2416_v16  ;;  %v2517_v20 = vmul.f32 %v2416_v16, %v2416_v16  ;;  %v2371_v2 = vadd.f32 %v2370_v54, %v2145_v18  ;;  %v2147_v37 = vpop.f32.mrb[153].mxu1 }
 0x247   : > { %v2548_v28 = vadd.f32 %v2547_v35, %v2517_v20  ;;  %v2417_v9 = vadd.f32 %v2371_v2, %v4883_v23 }
 0x248   : > { %v2150_v0 = vpop.f32.mrb[154].mxu1 }
 0x249   : > { %2449 = vst [vmem:[%s4894_s24 + $0xe0] sm:$0xff] %v2417_v9  ;;  %v2480_v50 = vadd.f32 %v2479_v53, %v2417_v9  ;;  %v2518_v36 = vmul.f32 %v2417_v9, %v2417_v9  ;;  %v2376_v31 = vadd.f32 %v4938_v27, %v2150_v0  ;;  %v2152_v62 = vpop.f32.mrb[155].mxu1 }
 0x24b   : > { %v2549_v3 = vadd.f32 %v2548_v28, %v2518_v36  ;;  %v2418_v33 = vadd.f32 %v2376_v31, %v4881_v4 }
 0x24c   : > { %v2155_v11 = vpop.f32.mrb[156].mxu1 }
 0x24d   : > { %2450 = vst [vmem:[%s4894_s24 + $0xe8] sm:$0xff] %v2418_v33  ;;  %v2481_v59 = vadd.f32 %v2480_v50, %v2418_v33  ;;  %v2519_v54 = vmul.f32 %v2418_v33, %v2418_v33  ;;  %v2381_v51 = vadd.f32 %v2380_v24, %v2155_v11  ;;  %v2157_v56 = vpop.f32.mrb[157].mxu1 }
 0x24f   : > { %v2550_v26 = vadd.f32 %v2549_v3, %v2519_v54  ;;  %v2419_v23 = vadd.f32 %v2381_v51, %v4887_v1 }
 0x250   : > { %v2160_v7 = vpop.f32.mrb[158].mxu1 }
 0x251   : > { %2451 = vst [vmem:[%s4894_s24 + $0xf0] sm:$0xff] %v2419_v23  ;;  %v2482_v5 = vadd.f32 %v2481_v59, %v2419_v23  ;;  %v2520_v17 = vmul.f32 %v2419_v23, %v2419_v23  ;;  %v2386_v27 = vadd.f32 %v4942_v38, %v2160_v7  ;;  %v2162_v30 = vpop.f32.mrb[159].mxu1 }
 0x253   : > { %v2551_v29 = vadd.f32 %v2550_v26, %v2520_v17  ;;  %v2420_v4 = vadd.f32 %v2386_v27, %v4885_v41 }
 0x255   : > { %2452 = vst [vmem:[%s4894_s24 + $0xf8] sm:$0xff] %v2420_v4  ;;  %v2483_v63 = vadd.f32 %v2482_v5, %v2420_v4  ;;  %v2521_v13 = vmul.f32 %v2420_v4, %v2420_v4 }
 0x257   : > { %v2484_v44 = vrot.slane %v2483_v63, 4  ;;  %v2552_v24 = vadd.f32 %v2551_v29, %v2521_v13 }
 0x259   : > { %v2485_v47 = vadd.f32 %v2484_v44, %v2483_v63  ;;  %v2553_v32 = vrot.slane %v2552_v24, 4 }
 0x25b   : > { %v2486_v15 = vrot.slane %v2485_v47, 2  ;;  %v2554_v1 = vadd.f32 %v2553_v32, %v2552_v24 }
 0x25d   : > { %v2487_v25 = vadd.f32 %v2486_v15, %v2485_v47  ;;  %v2555_v34 = vrot.slane %v2554_v1, 2 }
 0x25f   : > { %v2488_v14 = vrot.slane %v2487_v25, 1  ;;  %v2556_v6 = vadd.f32 %v2555_v34, %v2554_v1 }
 0x261   : > { %v2557_v38 = vrot.slane %v2556_v6, 1  ;;  %v2489_v41 = vadd.f32 %v2488_v14, %v2487_v25 }
 0x263   : > { %v2558_v40 = vadd.f32 %v2557_v38, %v2556_v6 }
 0x265   : > { %v2559_v55 = vsel %vm378_vm1, %v2489_v41, %v2558_v40 }
 0x266   : > { %2560 = vst [vmem:[%s235_s27] sm:$0x3] %v2559_v55 }
 0x267 PF: > { %s16_s18 = sadd.s32 1, %s3425_s18  }
 0x268   : > { %p13_p4 = scmp.ge.s32.totalorder %s16_s18, 4  }
 0x26a   :  { %15 = sbr.rel (!%p13_p4) target bundleno = 1 (0x1), region = 83 }

// kernel: double_conv.3
= control target key start
LH: loop header
LB: loop body
LE: loop exit
PB: predicated region body
PF: predicated region fallthrough
CT: control target
= control target key end

     0   :  { %s3568_s18 = smov 0   ;;  %s5253_s0 = inlined_call_operand.vmem [shape: f32[2,16,16,128], index: 0, kind: input, shape index: {}]   ;;  %s5254_s1 = inlined_call_operand.vmem [shape: f32[3,384,128], index: 1, kind: input, shape index: {}]   ;;  %s5255_s2 = inlined_call_operand.vmem [shape: f32[1,128], index: 2, kind: input, shape index: {}]   ;;  %s5256_s3 = inlined_call_operand.vmem [shape: f32[1,128], index: 3, kind: input, shape index: {}]   ;;  %s5257_s4 = inlined_call_operand.vmem [shape: f32[2,16,16,128], index: 4, kind: output, shape index: {0}]   ;;  %s5258_s5 = inlined_call_operand.vmem [shape: f32[2,2,128], index: 5, kind: output, shape index: {1}]  }
   0x1 LB: > { %s2757_s19 = sadd.s32 4294967295, %s3534_s18   ;;  %p2761_p0 = scmp.ge.s32.totalorder %s3534_s18, 1  ;;  %s3534_s18 = sphi %s3568_s18, %s16_s18  }
   0x2   : > { %p190_p1 = scmp.lt.s32.totalorder %s3534_s18, 3 }
   0x4   : > { %p191_p2 = pnand %p2761_p0, %p190_p1 }
   0x6   : > { %194 = sbr.rel (%p191_p2) target bundleno = 602 (0x25a), region = 36 }
   0xd   : > { %v2769_v0 = vld [vmem:[%s5254_s1 + $0x180] sm:$0xff]  ;;  %v2770_v1 = vld [vmem:[%s5254_s1 + $0x188] sm:$0xff]  ;;  %p222_p3 = scmp.lt.s32.totalorder %s2757_s19, 1  ;;  %v5259_v3 = vmov 0.0|0.0   ;;  %v2771_v6 = vld [vmem:[%s5254_s1 + $0x190] sm:$0xff]  ;;  %v3537_v11 = vmov 0.0  }
   0xe   : > { %v2801_v2 = vld [vmem:[%s5254_s1 + $0x280] sm:$0xff]  ;;  %3253 = vmatprep.subr.bf16.mxu0 %v5259_v3  ;;  %v3254_v4 = vpack.c.bf16 %v2770_v1, %v2769_v0  ;;  %v2802_v5 = vld [vmem:[%s5254_s1 + $0x288] sm:$0xff]  ;;  %v2772_v7 = vld [vmem:[%s5254_s1 + $0x198] sm:$0xff]  ;;  %408 = vst [vmem:[#allocation2 + $0x5f] sm:$0x1] %v3537_v11  ;;  %vm601_vm0 = vcmask 1046528  }
   0xf   : > { %v3301_v8 = vpack.c.bf16 %v2802_v5, %v2801_v2  ;;  %v2803_v9 = vld [vmem:[%s5254_s1 + $0x290] sm:$0xff]  ;;  %v2804_v10 = vld [vmem:[%s5254_s1 + $0x298] sm:$0xff]  ;;  %s5282_s19 = smov (!%p222_p3, %s2757_s19), 1  ;;  %378 = vst [vmem:[#allocation2] sm:$0xff] %v3537_v11  ;;  %392 = vst [vmem:[#allocation2 + $0x30] sm:$0x1] %v3537_v11  ;;  %v3257_v12 = vpack.c.bf16 %v2772_v7, %v2771_v6 }
  0x10   : > { %393 = vst [vmem:[#allocation2 + $0x60] sm:$0x1] %v3537_v11  ;;  %394 = vst [vmem:[#allocation2 + $0x90] sm:$0x1] %v3537_v11  ;;  %3255 = vmatpush1.bf16.msra.mxu0 %v3254_v4  ;;  %v3305_v13 = vpack.c.bf16 %v2804_v10, %v2803_v9  ;;  %v2805_v14 = vld [vmem:[%s5254_s1 + $0x2a0] sm:$0xff]  ;;  %v2806_v15 = vld [vmem:[%s5254_s1 + $0x2a8] sm:$0xff] }
  0x11   : > { %395 = vst [vmem:[#allocation2 + $0xc0] sm:$0x1] %v3537_v11  ;;  %396 = vst [vmem:[#allocation2 + $0xf0] sm:$0x1] %v3537_v11  ;;  %3302 = vmatprep.subr.bf16.mxu1 %v3301_v8  ;;  %3256 = vmatprep.subr.bf16.mxu0 %v5259_v3  ;;  %v2773_v16 = vld [vmem:[%s5254_s1 + $0x1a0] sm:$0xff]  ;;  %v2774_v17 = vld [vmem:[%s5254_s1 + $0x1a8] sm:$0xff]  ;;  %v3309_v18 = vpack.c.bf16 %v2806_v15, %v2805_v14 }
  0x12   : > { %397 = vst [vmem:[#allocation2 + $0x120] sm:$0x1] %v3537_v11  ;;  %398 = vst [vmem:[#allocation2 + $0x150] sm:$0x1] %v3537_v11  ;;  %3304 = vmatpush3.bf16.msra.mxu1 %v3301_v8  ;;  %s2867_s21 = sshll.u32 %s5282_s19, 8  ;;  %v3260_v19 = vpack.c.bf16 %v2774_v17, %v2773_v16  ;;  %v2807_v20 = vld [vmem:[%s5254_s1 + $0x2b0] sm:$0xff] }
  0x13   : > { %399 = vst [vmem:[#allocation2 + $0x180] sm:$0x1] %v3537_v11  ;;  %400 = vst [vmem:[#allocation2 + $0x1b0] sm:$0x1] %v3537_v11  ;;  %3306 = vmatprep.subr.bf16.mxu1 %v3305_v13  ;;  %v2808_v21 = vld [vmem:[%s5254_s1 + $0x2b8] sm:$0xff]  ;;  %v2775_v22 = vld [vmem:[%s5254_s1 + $0x1b0] sm:$0xff]  ;;  %s3635_s7 = scalar_lea.vmem %s5253_s0, %s2867_s21  ;;  %s5173_s10 = scalar_lea.vmem %s5257_s4, %s2867_s21 }
  0x14   : > { %401 = vst [vmem:[#allocation2 + $0x1e0] sm:$0x1] %v3537_v11  ;;  %402 = vst [vmem:[#allocation2 + $0x210] sm:$0x1] %v3537_v11  ;;  %3258 = vmatpush1.bf16.msra.mxu0 %v3257_v12  ;;  %v2776_v23 = vld [vmem:[%s5254_s1 + $0x1b8] sm:$0xff]  ;;  %v3313_v24 = vpack.c.bf16 %v2808_v21, %v2807_v20  ;;  %v2809_v25 = vld [vmem:[%s5254_s1 + $0x2c0] sm:$0xff] }
  0x15   : > { %403 = vst [vmem:[#allocation2 + $0x240] sm:$0x1] %v3537_v11  ;;  %404 = vst [vmem:[#allocation2 + $0x270] sm:$0x1] %v3537_v11  ;;  %3259 = vmatprep.subr.bf16.mxu0 %v5259_v3  ;;  %v2810_v26 = vld [vmem:[%s5254_s1 + $0x2c8] sm:$0xff]  ;;  %v236_v27 = vld [vmem:[%s3635_s7] sm:$0xff]  ;;  %v3263_v28 = vpack.c.bf16 %v2776_v23, %v2775_v22 }
  0x16   : > { %405 = vst [vmem:[#allocation2 + $0x2a0] sm:$0x1] %v3537_v11  ;;  %406 = vst [vmem:[#allocation2 + $0x2d0] sm:$0x1] %v3537_v11  ;;  %3308 = vmatpush3.bf16.msra.mxu1 %v3305_v13  ;;  %v237_v29 = vld [vmem:[%s3635_s7 + $0x8] sm:$0xff]  ;;  %v2777_v32 = vld [vmem:[%s5254_s1 + $0x1c0] sm:$0xff]  ;;  %v3317_v38 = vpack.c.bf16 %v2810_v26, %v2809_v25 }
  0x17   : > { %407 = vst [vmem:[#allocation2 + $0x300] sm:$0x1] %v3537_v11  ;;  %409 = vst [vmem:[#allocation2 + $0x8f] sm:$0x1] %v3537_v11  ;;  %3310 = vmatprep.subr.bf16.mxu1 %v3309_v18  ;;  %v3648_v30 = vld [vmem:[%s5255_s2] ss:$0 sm:$0xff] }
  0x18   : > { %410 = vst [vmem:[#allocation2 + $0xbf] sm:$0x1] %v3537_v11  ;;  %411 = vst [vmem:[#allocation2 + $0xef] sm:$0x1] %v3537_v11  ;;  %3261 = vmatpush1.bf16.msra.mxu0 %v3260_v19  ;;  %v3653_v31 = vld [vmem:[%s5256_s3] ss:$0 sm:$0xff]  ;;  %v276_v34 = vmul.f32 %v3648_v30, %v236_v27  ;;  %v277_v35 = vmul.f32 %v3648_v30, %v237_v29 }
  0x19   : > { %412 = vst [vmem:[#allocation2 + $0x11f] sm:$0x1] %v3537_v11  ;;  %413 = vst [vmem:[#allocation2 + $0x14f] sm:$0x1] %v3537_v11  ;;  %3262 = vmatprep.subr.bf16.mxu0 %v5259_v3  ;;  %v2778_v33 = vld [vmem:[%s5254_s1 + $0x1c8] sm:$0xff]  ;;  %v238_v36 = vld [vmem:[%s3635_s7 + $0x10] sm:$0xff] }
  0x1a   : > { %414 = vst [vmem:[#allocation2 + $0x17f] sm:$0x1] %v3537_v11  ;;  %415 = vst [vmem:[#allocation2 + $0x1af] sm:$0x1] %v3537_v11  ;;  %3312 = vmatpush3.bf16.msra.mxu1 %v3309_v18  ;;  %v239_v37 = vld [vmem:[%s3635_s7 + $0x18] sm:$0xff]  ;;  %v3669_v39 = vld [vmem:[%s5254_s1 + $0x1d0] sm:$0xff]  ;;  %v314_v42 = vadd.f32 %v3653_v31, %v276_v34  ;;  %v315_v43 = vadd.f32 %v3653_v31, %v277_v35  ;;  %v278_v44 = vmul.f32 %v3648_v30, %v238_v36 }
  0x1b   : > { %416 = vst [vmem:[#allocation2 + $0x1df] sm:$0x1] %v3537_v11  ;;  %417 = vst [vmem:[#allocation2 + $0x20f] sm:$0x1] %v3537_v11  ;;  %3314 = vmatprep.subr.bf16.mxu1 %v3313_v24  ;;  %v3674_v40 = vld [vmem:[%s5254_s1 + $0x1d8] sm:$0xff]  ;;  %v2811_v41 = vld [vmem:[%s5254_s1 + $0x2d0] sm:$0xff]  ;;  %v3266_v45 = vpack.c.bf16 %v2778_v33, %v2777_v32  ;;  %v279_v47 = vmul.f32 %v3648_v30, %v239_v37 }
  0x1c   : > { %418 = vst [vmem:[#allocation2 + $0x23f] sm:$0x1] %v3537_v11  ;;  %419 = vst [vmem:[#allocation2 + $0x26f] sm:$0x1] %v3537_v11  ;;  %3264 = vmatpush1.bf16.msra.mxu0 %v3263_v28  ;;  %v2812_v46 = vld [vmem:[%s5254_s1 + $0x2d8] sm:$0xff]  ;;  %v240_v48 = vld [vmem:[%s3635_s7 + $0x20] sm:$0xff]  ;;  %v316_v53 = vadd.f32 %v3653_v31, %v278_v44  ;;  %v3269_v54 = vpack.c.bf16 %v3674_v40, %v3669_v39 }
  0x1d   : > { %420 = vst [vmem:[#allocation2 + $0x29f] sm:$0x1] %v3537_v11  ;;  %421 = vst [vmem:[#allocation2 + $0x2cf] sm:$0x1] %v3537_v11  ;;  %v241_v49 = vld [vmem:[%s3635_s7 + $0x28] sm:$0xff]  ;;  %3265 = vmatprep.subr.bf16.mxu0 %v5259_v3  ;;  %v3692_v50 = vld [vmem:[%s5254_s1 + $0x1e0] sm:$0xff]  ;;  %v317_v56 = vadd.f32 %v3653_v31, %v279_v47  ;;  %v280_v57 = vmul.f32 %v3648_v30, %v240_v48  ;;  %v3321_v61 = vpack.c.bf16 %v2812_v46, %v2811_v41 }
  0x1e   : > { %422 = vst [vmem:[#allocation2 + $0x2ff] sm:$0x1] %v3537_v11  ;;  %423 = vst [vmem:[#allocation2 + $0x32f] sm:$0x1] %v3537_v11  ;;  %v3694_v51 = vmax.f32 %v314_v42, 0.0  ;;  %v3696_v52 = vmax.f32 %v315_v43, 0.0  ;;  %3316 = vmatpush3.bf16.msra.mxu1 %v3313_v24  ;;  %v281_v58 = vmul.f32 %v3648_v30, %v241_v49 }
  0x1f   : > { %v3704_v55 = vld [vmem:[%s5254_s1 + $0x1e8] sm:$0xff]  ;;  %v242_v59 = vld [vmem:[%s3635_s7 + $0x30] sm:$0xff]  ;;  %v243_v60 = vld [vmem:[%s3635_s7 + $0x38] sm:$0xff]  ;;  %3318 = vmatprep.subr.bf16.mxu1 %v3317_v38  ;;  %v3718_v1 = vmax.f32 %v316_v53, 0.0  ;;  %v3724_v4 = vmax.f32 %v317_v56, 0.0  ;;  %v318_v5 = vadd.f32 %v3653_v31, %v280_v57  ;;  %vm488_vm1 = vcmask 1040384  }
  0x20   : > { %v2813_v62 = vld [vmem:[%s5254_s1 + $0x2e0] sm:$0xff]  ;;  %v602_v63 = vrot.slane %v3694_v51, 1  ;;  %v603_v0 = vrot.slane %v3696_v52, 1  ;;  %424 = vst [vmem:[#allocation2 + $0x38] sm:$0xff] %v3694_v51  ;;  %425 = vst [vmem:[#allocation2 + $0x50] sm:$0xff] %v3696_v52  ;;  %1067 = vmatprep.mubr.f32.mxu0 %v3694_v51  ;;  %3267 = vmatpush1.bf16.msra.mxu0 %v3266_v45  ;;  %v2814_v2 = vld [vmem:[%s5254_s1 + $0x2e8] sm:$0xff]  ;;  %v319_v6 = vadd.f32 %v3653_v31, %v281_v58 }
  0x21   : > { %v282_v7 = vmul.f32 %v3648_v30, %v242_v59  ;;  %v244_v8 = vld [vmem:[%s3635_s7 + $0x40] sm:$0xff]  ;;  %v245_v9 = vld [vmem:[%s3635_s7 + $0x48] sm:$0xff]  ;;  %3268 = vmatprep.subr.bf16.mxu0 %v5259_v3  ;;  %v3272_v10 = vpack.c.bf16 %v3704_v55, %v3692_v50  ;;  %v605_v12 = vrot.slane %v3718_v1, 1  ;;  %426 = vst [vmem:[#allocation2 + $0x68] sm:$0xff] %v3718_v1  ;;  %v283_v13 = vmul.f32 %v3648_v30, %v243_v60  ;;  %v2815_v19 = vld [vmem:[%s5254_s1 + $0x2f0] sm:$0xff]  ;;  %s2766_s21 = sshll.u32 %s5282_s19, 1 }
  0x22   : > { %v604_v11 = vsel %vm601_vm0, %v602_v63, %v603_v0  ;;  %683 = vst [vmem:[#allocation2 + $0x58] sm:$0x7f] %v603_v0  ;;  %3320 = vmatpush3.bf16.msra.mxu1 %v3317_v38  ;;  %v606_v14 = vrot.slane %v3724_v4, 1  ;;  %427 = vst [vmem:[#allocation2 + $0x80] sm:$0xff] %v3724_v4  ;;  %v3740_v15 = vmax.f32 %v318_v5, 0.0  ;;  %v3742_v16 = vmax.f32 %v319_v6, 0.0  ;;  %s235_s12 = scalar_lea.vmem %s5258_s5, %s2766_s21 }
  0x23   : > { %682 = vst [vmem:[#allocation2 + $0x40] sm:$0xff] %v604_v11  ;;  %3045 = vmatprep.mubr.f32.mxu1 %v604_v11  ;;  %v320_v17 = vadd.f32 %v3653_v31, %v282_v7  ;;  %3322 = vmatprep.subr.bf16.mxu1 %v3321_v61  ;;  %v3325_v18 = vpack.c.bf16 %v2814_v2, %v2813_v62  ;;  %v2816_v20 = vld [vmem:[%s5254_s1 + $0x2f8] sm:$0xff]  ;;  %v246_v24 = vld [vmem:[%s3635_s7 + $0x50] sm:$0xff]  ;;  %v3779_v34 = vld [vmem:[%s5254_s1 + $0x200] sm:$0xff] }
  0x24   : > { %v321_v21 = vadd.f32 %v3653_v31, %v283_v13  ;;  %v284_v22 = vmul.f32 %v3648_v30, %v244_v8  ;;  %v285_v23 = vmul.f32 %v3648_v30, %v245_v9  ;;  %3270 = vmatpush1.bf16.msra.mxu0 %v3269_v54  ;;  %v3758_v25 = vld [vmem:[%s5254_s1 + $0x1f0] sm:$0xff]  ;;  %v3763_v26 = vld [vmem:[%s5254_s1 + $0x1f8] sm:$0xff]  ;;  %v3766_v27 = vsel %vm601_vm0, %v605_v12, %v606_v14  ;;  %v3784_v35 = vld [vmem:[%s5254_s1 + $0x208] sm:$0xff] }
  0x25   : > { %685 = vst [vmem:[#allocation2 + $0x88] sm:$0x7f] %v606_v14  ;;  %v608_v28 = vrot.slane %v3740_v15, 1  ;;  %v609_v29 = vrot.slane %v3742_v16, 1  ;;  %428 = vst [vmem:[#allocation2 + $0x98] sm:$0xff] %v3740_v15  ;;  %v3772_v32 = vmax.f32 %v320_v17, 0.0  ;;  %3271 = vmatprep.subr.bf16.mxu0 %v5259_v3  ;;  %v3792_v40 = vpack.c.bf16 %v2816_v20, %v2815_v19 }
  0x26   : > { %429 = vst [vmem:[#allocation2 + $0xb0] sm:$0xff] %v3742_v16  ;;  %v247_v33 = vld [vmem:[%s3635_s7 + $0x58] sm:$0xff]  ;;  %684 = vst [vmem:[#allocation2 + $0x70] sm:$0xff] %v3766_v27  ;;  %v3787_v36 = vmax.f32 %v321_v21, 0.0  ;;  %v322_v37 = vadd.f32 %v3653_v31, %v284_v22  ;;  %v323_v38 = vadd.f32 %v3653_v31, %v285_v23  ;;  %v248_v39 = vld [vmem:[%s3635_s7 + $0x60] sm:$0xff]  ;;  %3324 = vmatpush3.bf16.msra.mxu1 %v3321_v61 }
  0x27   : > { %v3795_v41 = vsel %vm601_vm0, %v608_v28, %v609_v29  ;;  %687 = vst [vmem:[#allocation2 + $0xb8] sm:$0x7f] %v609_v29  ;;  %v611_v42 = vrot.slane %v3772_v32, 1  ;;  %430 = vst [vmem:[#allocation2 + $0xc8] sm:$0xff] %v3772_v32  ;;  %v286_v43 = vmul.f32 %v3648_v30, %v246_v24  ;;  %3326 = vmatprep.subr.bf16.mxu1 %v3325_v18  ;;  %v3803_v44 = vld [vmem:[%s5254_s1] sm:$0xff]  ;;  %v3808_v45 = vld [vmem:[%s5254_s1 + $0x8] sm:$0xff] }
  0x28   : > { %686 = vst [vmem:[#allocation2 + $0xa0] sm:$0xff] %v3795_v41  ;;  %v612_v46 = vrot.slane %v3787_v36, 1  ;;  %431 = vst [vmem:[#allocation2 + $0xe0] sm:$0xff] %v3787_v36  ;;  %v3813_v47 = vmax.f32 %v322_v37, 0.0  ;;  %v3815_v48 = vmax.f32 %v323_v38, 0.0  ;;  %v287_v49 = vmul.f32 %v3648_v30, %v247_v33  ;;  %v249_v50 = vld [vmem:[%s3635_s7 + $0x68] sm:$0xff]  ;;  %3273 = vmatpush1.bf16.msra.mxu0 %v3272_v10 }
  0x29   : > { %v3275_v53 = vpack.c.bf16 %v3763_v26, %v3758_v25  ;;  %v3278_v54 = vpack.c.bf16 %v3784_v35, %v3779_v34  ;;  %v3826_v55 = vld [vmem:[%s5254_s1 + $0x210] sm:$0xff]  ;;  %v3831_v56 = vld [vmem:[%s5254_s1 + $0x218] sm:$0xff]  ;;  %v324_v57 = vadd.f32 %v3653_v31, %v286_v43  ;;  %v288_v58 = vmul.f32 %v3648_v30, %v248_v39  ;;  %3274 = vmatprep.subr.bf16.mxu0 %v5259_v3  ;;  %v3861_v7 = vld [vmem:[%s5254_s1 + $0x220] sm:$0xff] }
  0x2a   : > { %v250_v59 = vld [vmem:[%s3635_s7 + $0x70] sm:$0xff]  ;;  %v3843_v61 = vsel %vm601_vm0, %v611_v42, %v612_v46  ;;  %689 = vst [vmem:[#allocation2 + $0xe8] sm:$0x7f] %v612_v46  ;;  %v614_v62 = vrot.slane %v3813_v47, 1  ;;  %v615_v63 = vrot.slane %v3815_v48, 1  ;;  %432 = vst [vmem:[#allocation2 + $0xf8] sm:$0xff] %v3813_v47  ;;  %v325_v0 = vadd.f32 %v3653_v31, %v287_v49  ;;  %3328 = vmatpush3.bf16.msra.mxu1 %v3325_v18 }
  0x2b   : > { %v3840_v60 = vld [vmem:[%s5254_s1 + $0x10] sm:$0xff]  ;;  %433 = vst [vmem:[#allocation2 + $0x110] sm:$0xff] %v3815_v48  ;;  %v251_v2 = vld [vmem:[%s3635_s7 + $0x78] sm:$0xff]  ;;  %v3334_v5 = vpack.c.bf16 %v3808_v45, %v3803_v44  ;;  %v3866_v8 = vld [vmem:[%s5254_s1 + $0x228] sm:$0xff]  ;;  %v3869_v9 = vmax.f32 %v324_v57, 0.0  ;;  %v289_v10 = vmul.f32 %v3648_v30, %v249_v50  ;;  %v326_v11 = vadd.f32 %v3653_v31, %v288_v58  ;;  %3330 = vmatprep.subr.bf16.mxu1 %v3792_v40 }
  0x2c   : > { %v3856_v6 = vld [vmem:[%s5254_s1 + $0x18] sm:$0xff]  ;;  %688 = vst [vmem:[#allocation2 + $0xd0] sm:$0xff] %v3843_v61  ;;  %v3281_v12 = vpack.c.bf16 %v3831_v56, %v3826_v55  ;;  %v3877_v13 = vsel %vm601_vm0, %v614_v62, %v615_v63  ;;  %691 = vst [vmem:[#allocation2 + $0x118] sm:$0x7f] %v615_v63  ;;  %v3879_v14 = vmax.f32 %v325_v0, 0.0  ;;  %v290_v17 = vmul.f32 %v3648_v30, %v250_v59  ;;  %v252_v22 = vld [vmem:[%s3635_s7 + $0x80] sm:$0xff] }
  0x2d   : > { %3276 = vmatpush1.bf16.msra.mxu0 %v3275_v53  ;;  %690 = vst [vmem:[#allocation2 + $0x100] sm:$0xff] %v3877_v13  ;;  %v617_v18 = vrot.slane %v3869_v9, 1  ;;  %434 = vst [vmem:[#allocation2 + $0x128] sm:$0xff] %v3869_v9  ;;  %v327_v19 = vadd.f32 %v3653_v31, %v289_v10  ;;  %v3886_v20 = vmax.f32 %v326_v11, 0.0  ;;  %v291_v21 = vmul.f32 %v3648_v30, %v251_v2  ;;  %v253_v23 = vld [vmem:[%s3635_s7 + $0x88] sm:$0xff]  ;;  %v3899_v26 = vld [vmem:[%s5254_s1 + $0x20] sm:$0xff] }
  0x2e   : > { %3277 = vmatprep.subr.bf16.mxu0 %v5259_v3  ;;  %v3337_v24 = vpack.c.bf16 %v3856_v6, %v3840_v60  ;;  %v3284_v25 = vpack.c.bf16 %v3866_v8, %v3861_v7  ;;  %v3904_v28 = vld [vmem:[%s5254_s1 + $0x28] sm:$0xff]  ;;  %v618_v29 = vrot.slane %v3879_v14, 1  ;;  %435 = vst [vmem:[#allocation2 + $0x140] sm:$0xff] %v3879_v14  ;;  %v328_v33 = vadd.f32 %v3653_v31, %v290_v17  ;;  %v863_v34 = vld [vmem:[#allocation2 + $0x58] sm:$0xff]  ;;  %v254_v42 = vld [vmem:[%s3635_s7 + $0x90] sm:$0xff] }
  0x2f   : > { %3332 = vmatpush3.bf16.msra.mxu1 %v3792_v40  ;;  %v3910_v35 = vmax.f32 %v327_v19, 0.0  ;;  %v620_v37 = vrot.slane %v3886_v20, 1  ;;  %436 = vst [vmem:[#allocation2 + $0x158] sm:$0xff] %v3886_v20  ;;  %v329_v38 = vadd.f32 %v3653_v31, %v291_v21  ;;  %v489_v39 = vrot.slane %v3694_v51, 7  ;;  %v255_v50 = vld [vmem:[%s3635_s7 + $0x98] sm:$0xff]  ;;  %v3931_v51 = vld [vmem:[%s5254_s1 + $0x230] sm:$0xff] }
  0x30   : > { %3333 = vmatprep.subr.bf16.mxu1 %v5259_v3  ;;  %v3919_v43 = vsel %vm601_vm0, %v617_v18, %v618_v29  ;;  %693 = vst [vmem:[#allocation2 + $0x148] sm:$0x7f] %v618_v29  ;;  %v3921_v46 = vmax.f32 %v328_v33, 0.0  ;;  %v292_v40 = vmul.f32 %v3648_v30, %v252_v22  ;;  %v293_v49 = vmul.f32 %v3648_v30, %v253_v23  ;;  %v3936_v57 = vld [vmem:[%s5254_s1 + $0x238] sm:$0xff]  ;;  %v256_v10 = vld [vmem:[%s3635_s7 + $0xa0] sm:$0xff]  ;;  %v869_v11 = vld [vmem:[#allocation2 + $0x88] sm:$0xff] }
  0x31   : > { %3279 = vmatpush1.bf16.msra.mxu0 %v3278_v54  ;;  %v3340_v53 = vpack.c.bf16 %v3904_v28, %v3899_v26  ;;  %692 = vst [vmem:[#allocation2 + $0x130] sm:$0xff] %v3919_v43  ;;  %v621_v58 = vrot.slane %v3910_v35, 1  ;;  %437 = vst [vmem:[#allocation2 + $0x170] sm:$0xff] %v3910_v35  ;;  %v3941_v54 = vmax.f32 %v329_v38, 0.0  ;;  %v490_v59 = vrot.slane %v3696_v52, 7  ;;  %v257_v22 = vld [vmem:[%s3635_s7 + $0xa8] sm:$0xff] }
  0x32   : > { %569 = vst [vmem:[#allocation2 + $0x30] sm:$0xfe] %v489_v39  ;;  %3046 = vmatmul.mubr.f32.vlgmr.msra.gmra.mrb[0].mxu1 %v863_v34  ;;  %3280 = vmatprep.subr.bf16.mxu0 %v5259_v3  ;;  %v623_v62 = vrot.slane %v3921_v46, 1  ;;  %438 = vst [vmem:[#allocation2 + $0x188] sm:$0xff] %v3921_v46  ;;  %v330_v63 = vadd.f32 %v3653_v31, %v292_v40  ;;  %v331_v0 = vadd.f32 %v3653_v31, %v293_v49  ;;  %v3971_v44 = vld [vmem:[%s5254_s1 + $0x30] sm:$0xff]  ;;  %v3976_v45 = vld [vmem:[%s5254_s1 + $0x38] sm:$0xff] }
  0x33   : > { %v294_v2 = vmul.f32 %v3648_v30, %v254_v42  ;;  %3335 = vmatpush1.bf16.msra.mxu1 %v3334_v5  ;;  %3048 = vmatprep.mubr.f32.mxu1 %v3766_v27  ;;  %v3956_v17 = vsel %vm601_vm0, %v620_v37, %v621_v58  ;;  %695 = vst [vmem:[#allocation2 + $0x178] sm:$0x7f] %v621_v58  ;;  %v624_v18 = vrot.slane %v3941_v54, 1  ;;  %439 = vst [vmem:[#allocation2 + $0x1a0] sm:$0xff] %v3941_v54  ;;  %v259_v40 = vld [vmem:[%s3635_s7 + $0xb8] sm:$0xff]  ;;  %v4013_v58 = vld [vmem:[%s5254_s1 + $0x240] sm:$0xff] }
  0x34   : > { %v3961_v19 = vsel %vm488_vm1, %v489_v39, %v490_v59  ;;  %v295_v21 = vmul.f32 %v3648_v30, %v255_v50  ;;  %3336 = vmatprep.subr.bf16.mxu1 %v5259_v3  ;;  %v3287_v27 = vpack.c.bf16 %v3936_v57, %v3931_v51  ;;  %694 = vst [vmem:[#allocation2 + $0x160] sm:$0xff] %v3956_v17  ;;  %v3979_v5 = vmax.f32 %v330_v63, 0.0  ;;  %v258_v39 = vld [vmem:[%s3635_s7 + $0xb0] sm:$0xff]  ;;  %v875_v49 = vld [vmem:[#allocation2 + $0xb8] sm:$0xff]  ;;  %v4018_v59 = vld [vmem:[%s5254_s1 + $0x248] sm:$0xff] }
  0x35   : > { %v3981_v23 = vmax.f32 %v331_v0, 0.0  ;;  %v332_v29 = vadd.f32 %v3653_v31, %v294_v2  ;;  %3282 = vmatpush1.bf16.msra.mxu0 %v3281_v12  ;;  %v3988_v33 = vsel %vm601_vm0, %v623_v62, %v624_v18  ;;  %697 = vst [vmem:[#allocation2 + $0x1a8] sm:$0x7f] %v624_v18  ;;  %v492_v37 = vrot.slane %v3718_v1, 7  ;;  %v260_v2 = vld [vmem:[%s3635_s7 + $0xc0] sm:$0xff]  ;;  %v4108_v57 = vld [vmem:[%s5254_s1 + $0x50] sm:$0xff] }
  0x36   : > { %v333_v34 = vadd.f32 %v3653_v31, %v295_v21  ;;  %v296_v38 = vmul.f32 %v3648_v30, %v256_v10  ;;  %3049 = vmatmul.mubr.f32.gmra.mrb[2].mxu1 %v869_v11  ;;  %3283 = vmatprep.subr.bf16.mxu0 %v5259_v3  ;;  %696 = vst [vmem:[#allocation2 + $0x190] sm:$0xff] %v3988_v33  ;;  %v626_v55 = vrot.slane %v3979_v5, 1  ;;  %440 = vst [vmem:[#allocation2 + $0x1b8] sm:$0xff] %v3979_v5  ;;  %v4039_v10 = vld [vmem:[%s5254_s1 + $0x40] sm:$0xff]  ;;  %v4044_v11 = vld [vmem:[%s5254_s1 + $0x48] sm:$0xff] }
  0x37   : > { %v627_v56 = vrot.slane %v3981_v23, 1  ;;  %441 = vst [vmem:[#allocation2 + $0x1d0] sm:$0xff] %v3981_v23  ;;  %v4000_v12 = vmax.f32 %v332_v29, 0.0  ;;  %v297_v42 = vmul.f32 %v3648_v30, %v257_v22  ;;  %3338 = vmatpush1.bf16.msra.mxu1 %v3337_v24  ;;  %3051 = vmatprep.mubr.f32.mxu1 %v3795_v41  ;;  %v3343_v50 = vpack.c.bf16 %v3976_v45, %v3971_v44  ;;  %v265_v45 = vld [vmem:[%s3635_s7 + $0xe8] sm:$0xff] }
  0x38   : > { %v4020_v62 = vmax.f32 %v333_v34, 0.0  ;;  %571 = vst [vmem:[#allocation2 + $0x60] sm:$0xfe] %v492_v37  ;;  %v334_v41 = vadd.f32 %v3653_v31, %v296_v38  ;;  %v493_v60 = vrot.slane %v3724_v4, 7  ;;  %3339 = vmatprep.subr.bf16.mxu1 %v5259_v3  ;;  %v298_v0 = vmul.f32 %v3648_v30, %v258_v39  ;;  %v881_v39 = vld [vmem:[#allocation2 + $0xe8] sm:$0xff] }
  0x39   : > { %v4026_v6 = vsel %vm601_vm0, %v626_v55, %v627_v56  ;;  %699 = vst [vmem:[#allocation2 + $0x1d8] sm:$0x7f] %v627_v56  ;;  %v629_v24 = vrot.slane %v4000_v12, 1  ;;  %442 = vst [vmem:[#allocation2 + $0x1e8] sm:$0xff] %v4000_v12  ;;  %v335_v63 = vadd.f32 %v3653_v31, %v297_v42  ;;  %3285 = vmatpush1.bf16.msra.mxu0 %v3284_v25  ;;  %v261_v25 = vld [vmem:[%s3635_s7 + $0xc8] sm:$0xff]  ;;  %v495_v38 = vrot.slane %v3740_v15, 7 }
  0x3a   : > { %5270 = vst [vmem:[#allocation3_spill] sm:$0xff] %v4020_v62  ;;  %698 = vst [vmem:[#allocation2 + $0x1c0] sm:$0xff] %v4026_v6  ;;  %v630_v18 = vrot.slane %v4020_v62, 1  ;;  %v4049_v21 = vmax.f32 %v334_v41, 0.0  ;;  %v4052_v7 = vsel %vm488_vm1, %v492_v37, %v493_v60  ;;  %v299_v8 = vmul.f32 %v3648_v30, %v259_v40  ;;  %3052 = vmatmul.mubr.f32.gmra.mrb[4].mxu1 %v875_v49  ;;  %v262_v37 = vld [vmem:[%s3635_s7 + $0xd0] sm:$0xff]  ;;  %v263_v49 = vld [vmem:[%s3635_s7 + $0xd8] sm:$0xff] }
  0x3b   : > { %443 = vst [vmem:[#allocation2 + $0x200] sm:$0xff] %v4020_v62  ;;  %3286 = vmatprep.subr.bf16.mxu0 %v5259_v3  ;;  %v3290_v22 = vpack.c.bf16 %v4018_v59, %v4013_v58  ;;  %v4059_v29 = vmax.f32 %v335_v63, 0.0  ;;  %572 = vst [vmem:[#allocation2 + $0x78] sm:$0xff] %v4052_v7  ;;  %v336_v34 = vadd.f32 %v3653_v31, %v298_v0  ;;  %3341 = vmatpush1.bf16.msra.mxu1 %v3340_v53  ;;  %v4092_v58 = vld [vmem:[%s5254_s1 + $0x250] sm:$0xff]  ;;  %v4097_v59 = vld [vmem:[%s5254_s1 + $0x258] sm:$0xff] }
  0x3c   : > { %5271 = vst [vmem:[#allocation4_spill] sm:$0xff] %v4049_v21  ;;  %3054 = vmatprep.mubr.f32.mxu1 %v3843_v61  ;;  %v4070_v55 = vsel %vm601_vm0, %v629_v24, %v630_v18  ;;  %701 = vst [vmem:[#allocation2 + $0x208] sm:$0x7f] %v630_v18  ;;  %v632_v56 = vrot.slane %v4049_v21, 1  ;;  %v337_v42 = vadd.f32 %v3653_v31, %v299_v8  ;;  %3342 = vmatprep.subr.bf16.mxu1 %v5259_v3  ;;  %v4125_v18 = vld [vmem:[%s5254_s1 + $0x58] sm:$0xff] }
  0x3d   : > { %444 = vst [vmem:[#allocation2 + $0x218] sm:$0xff] %v4049_v21  ;;  %v300_v40 = vmul.f32 %v3648_v30, %v260_v2  ;;  %v3346_v26 = vpack.c.bf16 %v4044_v11, %v4039_v10  ;;  %700 = vst [vmem:[#allocation2 + $0x1f0] sm:$0xff] %v4070_v55  ;;  %v633_v61 = vrot.slane %v4059_v29, 1  ;;  %v4083_v28 = vmax.f32 %v336_v34, 0.0  ;;  %3288 = vmatpush1.bf16.msra.mxu0 %v3287_v27  ;;  %v264_v10 = vld [vmem:[%s3635_s7 + $0xe0] sm:$0xff]  ;;  %v887_v11 = vld [vmem:[#allocation2 + $0x118] sm:$0xff] }
  0x3e   : > { %445 = vst [vmem:[#allocation2 + $0x230] sm:$0xff] %v4059_v29  ;;  %573 = vst [vmem:[#allocation2 + $0x90] sm:$0xfe] %v495_v38  ;;  %v301_v53 = vmul.f32 %v3648_v30, %v261_v25  ;;  %v4099_v41 = vmax.f32 %v337_v42, 0.0  ;;  %v496_v24 = vrot.slane %v3742_v16, 7  ;;  %v302_v51 = vmul.f32 %v3648_v30, %v262_v37  ;;  %3055 = vmatmul.mubr.f32.gmra.mrb[6].mxu1 %v881_v39 }
  0x3f   : > { %5272 = vst [vmem:[#allocation5_spill] sm:$0xff] %v4083_v28  ;;  %v338_v60 = vadd.f32 %v3653_v31, %v300_v40  ;;  %3289 = vmatprep.subr.bf16.mxu0 %v5259_v3  ;;  %v4111_v27 = vsel %vm601_vm0, %v632_v56, %v633_v61  ;;  %703 = vst [vmem:[#allocation2 + $0x238] sm:$0x7f] %v633_v61  ;;  %v635_v63 = vrot.slane %v4083_v28, 1  ;;  %3344 = vmatpush1.bf16.msra.mxu1 %v3343_v50  ;;  %v266_v56 = vld [vmem:[%s3635_s7 + $0xf0] sm:$0xff]  ;;  %v267_v61 = vld [vmem:[%s3635_s7 + $0xf8] sm:$0xff] }
  0x40   : > { %446 = vst [vmem:[#allocation2 + $0x248] sm:$0xff] %v4083_v28  ;;  %v339_v0 = vadd.f32 %v3653_v31, %v301_v53  ;;  %v303_v2 = vmul.f32 %v3648_v30, %v263_v49  ;;  %3057 = vmatprep.mubr.f32.mxu1 %v3877_v13  ;;  %702 = vst [vmem:[#allocation2 + $0x220] sm:$0xff] %v4111_v27  ;;  %v636_v8 = vrot.slane %v4099_v41, 1  ;;  %3345 = vmatprep.subr.bf16.mxu1 %v5259_v3 }
  0x41   : > { %447 = vst [vmem:[#allocation2 + $0x260] sm:$0xff] %v4099_v41  ;;  %v4130_v25 = vmax.f32 %v338_v60, 0.0  ;;  %v4133_v44 = vsel %vm488_vm1, %v495_v38, %v496_v24  ;;  %v340_v13 = vadd.f32 %v3653_v31, %v302_v51  ;;  %v3293_v50 = vpack.c.bf16 %v4097_v59, %v4092_v58  ;;  %3291 = vmatpush1.bf16.msra.mxu0 %v3290_v22  ;;  %v2797_v22 = vld [vmem:[%s5254_s1 + $0x260] sm:$0xff]  ;;  %v2798_v58 = vld [vmem:[%s5254_s1 + $0x268] sm:$0xff] }
  0x42   : > { %v4140_v34 = vmax.f32 %v339_v0, 0.0  ;;  %574 = vst [vmem:[#allocation2 + $0xa8] sm:$0xff] %v4133_v44  ;;  %v341_v37 = vadd.f32 %v3653_v31, %v303_v2  ;;  %v498_v39 = vrot.slane %v3772_v32, 7  ;;  %v4147_v38 = vsel %vm601_vm0, %v635_v63, %v636_v8  ;;  %705 = vst [vmem:[#allocation2 + $0x268] sm:$0x7f] %v636_v8  ;;  %3058 = vmatmul.mubr.f32.gmra.mrb[8].mxu1 %v887_v11  ;;  %v893_v51 = vld [vmem:[#allocation2 + $0x148] sm:$0xff] }
  0x43   : > { %5273 = vst [vmem:[#allocation6_spill] sm:$0xff] %v4130_v25  ;;  %v638_v42 = vrot.slane %v4130_v25, 1  ;;  %448 = vst [vmem:[#allocation2 + $0x278] sm:$0xff] %v4130_v25  ;;  %v4151_v40 = vmax.f32 %v340_v13, 0.0  ;;  %v304_v49 = vmul.f32 %v3648_v30, %v264_v10  ;;  %3292 = vmatprep.subr.bf16.mxu0 %v5259_v3  ;;  %v3349_v53 = vpack.c.bf16 %v4125_v18, %v4108_v57  ;;  %v822_v10 = vld [vmem:[%s5254_s1 + $0x60] sm:$0xff] }
  0x44   : > { %704 = vst [vmem:[#allocation2 + $0x250] sm:$0xff] %v4147_v38  ;;  %v639_v59 = vrot.slane %v4140_v34, 1  ;;  %449 = vst [vmem:[#allocation2 + $0x290] sm:$0xff] %v4140_v34  ;;  %v4167_v60 = vmax.f32 %v341_v37, 0.0  ;;  %v305_v24 = vmul.f32 %v3648_v30, %v265_v45  ;;  %3347 = vmatpush1.bf16.msra.mxu1 %v3346_v26  ;;  %3060 = vmatprep.mubr.f32.mxu1 %v3919_v43  ;;  %v499_v0 = vrot.slane %v3787_v36, 7  ;;  %v823_v43 = vld [vmem:[%s5254_s1 + $0x68] sm:$0xff] }
  0x45   : > { %575 = vst [vmem:[#allocation2 + $0xc0] sm:$0xfe] %v498_v39  ;;  %v641_v57 = vrot.slane %v4151_v40, 1  ;;  %450 = vst [vmem:[#allocation2 + $0x2a8] sm:$0xff] %v4151_v40  ;;  %v342_v63 = vadd.f32 %v3653_v31, %v304_v49  ;;  %v306_v2 = vmul.f32 %v3648_v30, %v266_v56  ;;  %3348 = vmatprep.subr.bf16.mxu1 %v5259_v3  ;;  %3294 = vmatpush1.bf16.msra.mxu0 %v3293_v50  ;;  %v4193_v45 = vld [vmem:[%s5254_s1 + $0x270] sm:$0xff] }
  0x46   : > { %v4184_v26 = vsel %vm601_vm0, %v638_v42, %v639_v59  ;;  %707 = vst [vmem:[#allocation2 + $0x298] sm:$0x7f] %v639_v59  ;;  %v642_v11 = vrot.slane %v4167_v60, 1  ;;  %451 = vst [vmem:[#allocation2 + $0x2c0] sm:$0xff] %v4167_v60  ;;  %v343_v18 = vadd.f32 %v3653_v31, %v305_v24  ;;  %v307_v8 = vmul.f32 %v3648_v30, %v267_v61  ;;  %v2800_v30 = vld [vmem:[%s5254_s1 + $0x278] sm:$0xff]  ;;  %v842_v61 = vld [vmem:[%s5254_s1 + $0x100] sm:$0xff] }
  0x47   : > { %v3296_v13 = vpack.c.bf16 %v2798_v58, %v2797_v22  ;;  %706 = vst [vmem:[#allocation2 + $0x280] sm:$0xff] %v4184_v26  ;;  %v4196_v37 = vmax.f32 %v342_v63, 0.0  ;;  %v4199_v56 = vsel %vm488_vm1, %v498_v39, %v499_v0  ;;  %v344_v42 = vadd.f32 %v3653_v31, %v306_v2  ;;  %3061 = vmatmul.mubr.f32.gmra.mrb[10].mxu1 %v893_v51  ;;  %v843_v22 = vld [vmem:[%s5254_s1 + $0x108] sm:$0xff]  ;;  %v899_v58 = vld [vmem:[#allocation2 + $0x178] sm:$0xff] }
  0x48   : > { %3295 = vmatprep.subr.bf16.mxu0 %v5259_v3  ;;  %v4207_v50 = vsel %vm601_vm0, %v641_v57, %v642_v11  ;;  %709 = vst [vmem:[#allocation2 + $0x2c8] sm:$0x7f] %v642_v11  ;;  %v4209_v49 = vmax.f32 %v343_v18, 0.0  ;;  %576 = vst [vmem:[#allocation2 + $0xd8] sm:$0xff] %v4199_v56  ;;  %v345_v39 = vadd.f32 %v3653_v31, %v307_v8  ;;  %3350 = vmatpush1.bf16.msra.mxu1 %v3349_v53  ;;  %v824_v53 = vld [vmem:[%s5254_s1 + $0x70] sm:$0xff] }
  0x49   : > { %5274 = vst [vmem:[#allocation7_spill] sm:$0xff] %v4196_v37  ;;  %3063 = vmatprep.mubr.f32.mxu1 %v3956_v17  ;;  %v3352_v59 = vpack.c.bf16 %v823_v43, %v822_v10  ;;  %708 = vst [vmem:[#allocation2 + $0x2b0] sm:$0xff] %v4207_v50  ;;  %v644_v24 = vrot.slane %v4196_v37, 1  ;;  %v4223_v31 = vmax.f32 %v344_v42, 0.0  ;;  %v501_v51 = vrot.slane %v3813_v47, 7  ;;  %3351 = vmatprep.subr.bf16.mxu1 %v5259_v3  ;;  %v825_v17 = vld [vmem:[%s5254_s1 + $0x78] sm:$0xff] }
  0x4a   : > { %452 = vst [vmem:[#allocation2 + $0x2d8] sm:$0xff] %v4196_v37  ;;  %v645_v57 = vrot.slane %v4209_v49, 1  ;;  %453 = vst [vmem:[#allocation2 + $0x2f0] sm:$0xff] %v4209_v49  ;;  %v4235_v63 = vmax.f32 %v345_v39, 0.0  ;;  %v502_v0 = vrot.slane %v3815_v48, 7  ;;  %v504_v2 = vrot.slane %v3869_v9, 7  ;;  %3297 = vmatpush1.bf16.msra.mxu0 %v3296_v13 }
  0x4b   : > { %v3299_v10 = vpack.c.bf16 %v2800_v30, %v4193_v45  ;;  %v647_v43 = vrot.slane %v4223_v31, 1  ;;  %454 = vst [vmem:[#allocation2 + $0x308] sm:$0xff] %v4223_v31  ;;  %v4242_v11 = vpack.c.bf16 %v843_v22, %v842_v61  ;;  %577 = vst [vmem:[#allocation2 + $0xf0] sm:$0xfe] %v501_v51  ;;  %v505_v18 = vrot.slane %v3879_v14, 7  ;;  %3064 = vmatmul.mubr.f32.gmra.mrb[12].mxu1 %v899_v58  ;;  %v905_v30 = vld [vmem:[#allocation2 + $0x1a8] sm:$0xff] }
  0x4c   : > { %3298 = vmatprep.subr.bf16.mxu0 %v5259_v3  ;;  %v4247_v8 = vsel %vm601_vm0, %v644_v24, %v645_v57  ;;  %711 = vst [vmem:[#allocation2 + $0x2f8] sm:$0x7f] %v645_v57  ;;  %v648_v13 = vrot.slane %v4235_v63, 1  ;;  %455 = vst [vmem:[#allocation2 + $0x320] sm:$0xff] %v4235_v63  ;;  %v4252_v45 = vsel %vm488_vm1, %v501_v51, %v502_v0  ;;  %v507_v42 = vrot.slane %v3886_v20, 7  ;;  %v844_v22 = vld [vmem:[%s5254_s1 + $0x110] sm:$0xff] }
  0x4d   : > { %579 = vst [vmem:[#allocation2 + $0x120] sm:$0xfe] %v504_v2  ;;  %3353 = vmatpush1.bf16.msra.mxu1 %v3352_v59  ;;  %3066 = vmatprep.mubr.f32.mxu1 %v3988_v33  ;;  %v3355_v39 = vpack.c.bf16 %v825_v17, %v824_v53  ;;  %710 = vst [vmem:[#allocation2 + $0x2e0] sm:$0xff] %v4247_v8  ;;  %v4259_v61 = vsel %vm488_vm1, %v504_v2, %v505_v18  ;;  %v845_v58 = vld [vmem:[%s5254_s1 + $0x118] sm:$0xff]  ;;  %v508_v59 = vrot.slane %v3910_v35, 7  ;;  %v826_v24 = vld [vmem:[%s5254_s1 + $0x80] sm:$0xff] }
  0x4e   : > { %578 = vst [vmem:[#allocation2 + $0x108] sm:$0xff] %v4252_v45  ;;  %v510_v33 = vrot.slane %v3921_v46, 7  ;;  %3354 = vmatprep.subr.bf16.mxu1 %v5259_v3  ;;  %v827_v51 = vld [vmem:[%s5254_s1 + $0x88] sm:$0xff]  ;;  %v4277_v53 = vsel %vm601_vm0, %v647_v43, %v648_v13  ;;  %713 = vst [vmem:[#allocation2 + $0x328] sm:$0x7f] %v648_v13  ;;  %v511_v17 = vrot.slane %v3941_v54, 7  ;;  %3300 = vmatpush1.bf16.msra.mxu0 %v3299_v10 }
  0x4f   : > { %580 = vst [vmem:[#allocation2 + $0x138] sm:$0xff] %v4259_v61  ;;  %581 = vst [vmem:[#allocation2 + $0x150] sm:$0xfe] %v507_v42  ;;  %v4281_v57 = vld [vmem:[#allocation2 + $0x30] sm:$0xff]  ;;  %v4285_v0 = vsel %vm488_vm1, %v507_v42, %v508_v59  ;;  %v513_v2 = vrot.slane %v3979_v5, 7  ;;  %v514_v43 = vrot.slane %v3981_v23, 7  ;;  %3067 = vmatmul.mubr.f32.gmra.mrb[14].mxu1 %v905_v30  ;;  %3382 = vmatprep.subr.bf16.mxu0 %v4242_v11 }
  0x50   : > { %712 = vst [vmem:[#allocation2 + $0x310] sm:$0xff] %v4277_v53  ;;  %583 = vst [vmem:[#allocation2 + $0x180] sm:$0xfe] %v510_v33  ;;  %v3385_v18 = vpack.c.bf16 %v845_v58, %v844_v22  ;;  %v4292_v10 = vsel %vm488_vm1, %v510_v33, %v511_v17  ;;  %v516_v13 = vrot.slane %v4000_v12, 7  ;;  %v517_v3 = vrot.slane %v4020_v62, 7  ;;  %3069 = vmatprep.mubr.f32.mxu1 %v4026_v6  ;;  %v911_v42 = vld [vmem:[#allocation2 + $0x1d8] sm:$0xff] }
  0x51   : > { %582 = vst [vmem:[#allocation2 + $0x168] sm:$0xff] %v4285_v0  ;;  %3356 = vmatpush1.bf16.msra.mxu1 %v3355_v39  ;;  %v3358_v59 = vpack.c.bf16 %v827_v51, %v826_v24  ;;  %584 = vst [vmem:[#allocation2 + $0x198] sm:$0xff] %v4292_v10  ;;  %v846_v30 = vld [vmem:[%s5254_s1 + $0x120] sm:$0xff]  ;;  %v847_v22 = vld [vmem:[%s5254_s1 + $0x128] sm:$0xff]  ;;  %v4305_v58 = vsel %vm488_vm1, %v513_v2, %v514_v43  ;;  %v519_v39 = vrot.slane %v4049_v21, 7  ;;  %1068 = vmatmul.mubr.f32.vlgmr.msra.gmra.mrb[0].mxu0 %v4281_v57  ;;  %v5275_v6 = vmov 0.0|0.0  }
  0x52   : > { %585 = vst [vmem:[#allocation2 + $0x1b0] sm:$0xfe] %v513_v2  ;;  %3357 = vmatprep.subr.bf16.mxu1 %v5275_v6  ;;  %v828_v33 = vld [vmem:[%s5254_s1 + $0x90] sm:$0xff]  ;;  %v829_v24 = vld [vmem:[%s5254_s1 + $0x98] sm:$0xff]  ;;  %586 = vst [vmem:[#allocation2 + $0x1c8] sm:$0xff] %v4305_v58  ;;  %v4318_v51 = vsel %vm488_vm1, %v516_v13, %v517_v3  ;;  %v520_v17 = vrot.slane %v4059_v29, 7  ;;  %1072 = vmatprep.mubr.f32.mxu0 %v3696_v52  ;;  %v3389_v62 = vpack.c.bf16 %v847_v22, %v846_v30 }
  0x53   : > { %587 = vst [vmem:[#allocation2 + $0x1e0] sm:$0xfe] %v516_v13  ;;  %v522_v2 = vrot.slane %v4083_v28, 7  ;;  %3384 = vmatpush3.bf16.msra.mxu0 %v4242_v11  ;;  %588 = vst [vmem:[#allocation2 + $0x1f8] sm:$0xff] %v4318_v51  ;;  %v523_v43 = vrot.slane %v4099_v41, 7  ;;  %v525_v21 = vrot.slane %v4130_v25, 7  ;;  %3070 = vmatmul.mubr.f32.gmra.mrb[16].mxu1 %v911_v42  ;;  %v3361_v28 = vpack.c.bf16 %v829_v24, %v828_v33 }
  0x54   : > { %589 = vst [vmem:[#allocation2 + $0x210] sm:$0xfe] %v519_v39  ;;  %3386 = vmatprep.subr.bf16.mxu0 %v3385_v18  ;;  %v4328_v3 = vsel %vm488_vm1, %v519_v39, %v520_v17  ;;  %v526_v13 = vrot.slane %v4140_v34, 7  ;;  %v528_v52 = vrot.slane %v4151_v40, 7  ;;  %3072 = vmatprep.mubr.f32.mxu1 %v4070_v55  ;;  %v917_v11 = vld [vmem:[#allocation2 + $0x208] sm:$0xff]  ;;  %v848_v25 = vld [vmem:[%s5254_s1 + $0x130] sm:$0xff] }
  0x55   : > { %591 = vst [vmem:[#allocation2 + $0x240] sm:$0xfe] %v522_v2  ;;  %3359 = vmatpush1.bf16.msra.mxu1 %v3358_v59  ;;  %v849_v42 = vld [vmem:[%s5254_s1 + $0x138] sm:$0xff]  ;;  %590 = vst [vmem:[#allocation2 + $0x228] sm:$0xff] %v4328_v3  ;;  %v4341_v30 = vsel %vm488_vm1, %v522_v2, %v523_v43  ;;  %v529_v59 = vrot.slane %v4167_v60, 7  ;;  %v531_v55 = vrot.slane %v4196_v37, 7  ;;  %1073 = vmatmul.mubr.f32.gmra.mrb[2].mxu0 %v3961_v19 }
  0x56   : > { %593 = vst [vmem:[#allocation2 + $0x270] sm:$0xfe] %v525_v21  ;;  %3360 = vmatprep.subr.bf16.mxu1 %v5275_v6  ;;  %v830_v22 = vld [vmem:[%s5254_s1 + $0xa0] sm:$0xff]  ;;  %v831_v39 = vld [vmem:[%s5254_s1 + $0xa8] sm:$0xff]  ;;  %592 = vst [vmem:[#allocation2 + $0x258] sm:$0xff] %v4341_v30  ;;  %v4355_v33 = vsel %vm488_vm1, %v525_v21, %v526_v13  ;;  %v532_v24 = vrot.slane %v4209_v49, 7  ;;  %1077 = vmatprep.mubr.f32.mxu0 %v3718_v1  ;;  %v3393_v21 = vpack.c.bf16 %v849_v42, %v848_v25 }
  0x57   : > { %595 = vst [vmem:[#allocation2 + $0x2a0] sm:$0xfe] %v528_v52  ;;  %v534_v17 = vrot.slane %v4223_v31, 7  ;;  %v4360_v2 = vld [vmem:[#allocation2 + $0x60] sm:$0xff]  ;;  %3388 = vmatpush3.bf16.msra.mxu0 %v3385_v18  ;;  %594 = vst [vmem:[#allocation2 + $0x288] sm:$0xff] %v4355_v33  ;;  %v4364_v43 = vsel %vm488_vm1, %v528_v52, %v529_v59  ;;  %v535_v37 = vrot.slane %v4235_v63, 7  ;;  %3073 = vmatmul.mubr.f32.gmra.mrb[18].mxu1 %v917_v11 }
  0x58   : > { %597 = vst [vmem:[#allocation2 + $0x2d0] sm:$0xfe] %v531_v55  ;;  %3390 = vmatprep.subr.bf16.mxu0 %v3389_v62  ;;  %596 = vst [vmem:[#allocation2 + $0x2b8] sm:$0xff] %v4364_v43  ;;  %v4369_v13 = vsel %vm488_vm1, %v531_v55, %v532_v24  ;;  %3075 = vmatprep.mubr.f32.mxu1 %v4111_v27  ;;  %v923_v1 = vld [vmem:[#allocation2 + $0x238] sm:$0xff]  ;;  %v3364_v18 = vpack.c.bf16 %v831_v39, %v830_v22  ;;  %v850_v52 = vld [vmem:[%s5254_s1 + $0x140] sm:$0xff] }
  0x59   : > { %599 = vst [vmem:[#allocation2 + $0x300] sm:$0xfe] %v534_v17  ;;  %3362 = vmatpush1.bf16.msra.mxu1 %v3361_v28  ;;  %v851_v11 = vld [vmem:[%s5254_s1 + $0x148] sm:$0xff]  ;;  %598 = vst [vmem:[#allocation2 + $0x2e8] sm:$0xff] %v4369_v13  ;;  %v4380_v25 = vsel %vm488_vm1, %v534_v17, %v535_v37  ;;  %1078 = vmatmul.mubr.f32.gmra.mrb[4].mxu0 %v4360_v2  ;;  %v832_v28 = vld [vmem:[%s5254_s1 + $0xb0] sm:$0xff] }
  0x5a   : > { %3363 = vmatprep.subr.bf16.mxu1 %v5275_v6  ;;  %v833_v27 = vld [vmem:[%s5254_s1 + $0xb8] sm:$0xff]  ;;  %600 = vst [vmem:[#allocation2 + $0x318] sm:$0xff] %v4380_v25  ;;  %1082 = vmatprep.mubr.f32.mxu0 %v3724_v4  ;;  %v3397_v37 = vpack.c.bf16 %v851_v11, %v850_v52  ;;  %v929_v42 = vld [vmem:[#allocation2 + $0x268] sm:$0xff]  ;;  %v852_v55 = vld [vmem:[%s5254_s1 + $0x150] sm:$0xff] }
  0x5b   : > { %3392 = vmatpush3.bf16.msra.mxu0 %v3389_v62  ;;  %3076 = vmatmul.mubr.f32.gmra.mrb[20].mxu1 %v923_v1  ;;  %v3367_v59 = vpack.c.bf16 %v833_v27, %v832_v28  ;;  %v853_v22 = vld [vmem:[%s5254_s1 + $0x158] sm:$0xff]  ;;  %v834_v4 = vld [vmem:[%s5254_s1 + $0xc0] sm:$0xff]  ;;  %v835_v62 = vld [vmem:[%s5254_s1 + $0xc8] sm:$0xff] }
  0x5c   : > { %3394 = vmatprep.subr.bf16.mxu0 %v3393_v21  ;;  %3078 = vmatprep.mubr.f32.mxu1 %v4147_v38  ;;  %v4408_v38 = vld [vmem:[#allocation2 + $0x90] sm:$0xff]  ;;  %v3401_v39 = vpack.c.bf16 %v853_v22, %v852_v55  ;;  %v935_v24 = vld [vmem:[#allocation2 + $0x298] sm:$0xff]  ;;  %v3370_v17 = vpack.c.bf16 %v835_v62, %v834_v4  ;;  %v854_v1 = vld [vmem:[%s5254_s1 + $0x160] sm:$0xff] }
  0x5d   : > { %3365 = vmatpush1.bf16.msra.mxu1 %v3364_v18  ;;  %1083 = vmatmul.mubr.f32.gmra.mrb[6].mxu0 %v4052_v7  ;;  %v855_v18 = vld [vmem:[%s5254_s1 + $0x168] sm:$0xff]  ;;  %v856_v28 = vld [vmem:[%s5254_s1 + $0x170] sm:$0xff]  ;;  %v857_v27 = vld [vmem:[%s5254_s1 + $0x178] sm:$0xff] }
  0x5e   : > { %3366 = vmatprep.subr.bf16.mxu1 %v5275_v6  ;;  %1087 = vmatprep.mubr.f32.mxu0 %v3740_v15  ;;  %v836_v15 = vld [vmem:[%s5254_s1 + $0xd0] sm:$0xff]  ;;  %v941_v52 = vld [vmem:[#allocation2 + $0x2c8] sm:$0xff]  ;;  %v2817_v62 = vld [vmem:[%s5254_s1 + $0x300] sm:$0xff] }
  0x5f   : > { %3396 = vmatpush3.bf16.msra.mxu0 %v3393_v21  ;;  %3079 = vmatmul.mubr.f32.gmra.mrb[22].mxu1 %v929_v42  ;;  %v3405_v21 = vpack.c.bf16 %v855_v18, %v854_v1  ;;  %v3409_v42 = vpack.c.bf16 %v857_v27, %v856_v28  ;;  %v840_v22 = vld [vmem:[%s5254_s1 + $0xf0] sm:$0xff] }
  0x60   : > { %3398 = vmatprep.subr.bf16.mxu0 %v3397_v37  ;;  %3081 = vmatprep.mubr.f32.mxu1 %v4184_v26  ;;  %v837_v26 = vld [vmem:[%s5254_s1 + $0xd8] sm:$0xff]  ;;  %v724_v27 = vld [vmem:[#allocation2 + $0x50] sm:$0xff] }
  0x61   : > { %3368 = vmatpush1.bf16.msra.mxu1 %v3367_v59  ;;  %1088 = vmatmul.mubr.f32.gmra.mrb[8].mxu0 %v4408_v38  ;;  %v3373_v11 = vpack.c.bf16 %v837_v26, %v836_v15  ;;  %v947_v59 = vld [vmem:[#allocation2 + $0x2f8] sm:$0xff] }
  0x62   : > { %3369 = vmatprep.subr.bf16.mxu1 %v5275_v6  ;;  %1092 = vmatprep.mubr.f32.mxu0 %v3742_v16  ;;  %v838_v16 = vld [vmem:[%s5254_s1 + $0xe0] sm:$0xff]  ;;  %v2820_v15 = vld [vmem:[%s5254_s1 + $0x318] sm:$0xff] }
  0x63   : > { %3400 = vmatpush3.bf16.msra.mxu0 %v3397_v37  ;;  %3082 = vmatmul.mubr.f32.gmra.mrb[24].mxu1 %v935_v24  ;;  %v4442_v37 = vld [vmem:[#allocation2 + $0xc0] sm:$0xff]  ;;  %v2850_v24 = vld [vmem:[%s5254_s1 + $0x408] sm:$0xff] }
  0x64   : > { %3402 = vmatprep.subr.bf16.mxu0 %v3401_v39  ;;  %3084 = vmatprep.mubr.f32.mxu1 %v4207_v50  ;;  %v839_v50 = vld [vmem:[%s5254_s1 + $0xe8] sm:$0xff] }
  0x65   : > { %3371 = vmatpush1.bf16.msra.mxu1 %v3370_v17  ;;  %1093 = vmatmul.mubr.f32.gmra.mrb[10].mxu0 %v4133_v44  ;;  %v3376_v55 = vpack.c.bf16 %v839_v50, %v838_v16  ;;  %v4472_v17 = vld [vmem:[#allocation2] sm:$0xff]  ;;  %v2823_v16 = vld [vmem:[%s5254_s1 + $0x330] sm:$0xff] }
  0x66   : > { %3372 = vmatprep.subr.bf16.mxu1 %v5275_v6  ;;  %1097 = vmatprep.mubr.f32.mxu0 %v3772_v32  ;;  %v841_v32 = vld [vmem:[%s5254_s1 + $0xf8] sm:$0xff] }
  0x67   : > { %3404 = vmatpush3.bf16.msra.mxu0 %v3401_v39  ;;  %3085 = vmatmul.mubr.f32.gmra.mrb[26].mxu1 %v941_v52  ;;  %v3379_v4 = vpack.c.bf16 %v841_v32, %v840_v22  ;;  %v4464_v39 = vld [vmem:[#allocation2 + $0xf0] sm:$0xff]  ;;  %v2821_v52 = vld [vmem:[%s5254_s1 + $0x320] sm:$0xff] }
  0x68   : > { %3406 = vmatprep.subr.bf16.mxu0 %v3405_v21  ;;  %3087 = vmatprep.mubr.f32.mxu1 %v4247_v8  ;;  %v953_v8 = vld [vmem:[#allocation2 + $0x328] sm:$0xff]  ;;  %v4524_v22 = vld [vmem:[#allocation2 + $0x80] sm:$0xff]  ;;  %v2827_v32 = vld [vmem:[%s5254_s1 + $0x350] sm:$0xff] }
  0x69   : > { %3374 = vmatpush1.bf16.msra.mxu1 %v3373_v11  ;;  %1098 = vmatmul.mubr.f32.gmra.mrb[12].mxu0 %v4442_v37  ;;  %v4498_v11 = vld [vmem:[#allocation2 + $0x120] sm:$0xff] }
  0x6a   : > { %3375 = vmatprep.subr.bf16.mxu1 %v5275_v6  ;;  %1102 = vmatprep.mubr.f32.mxu0 %v3787_v36  ;;  %v2818_v36 = vld [vmem:[%s5254_s1 + $0x308] sm:$0xff] }
  0x6b   : > { %3408 = vmatpush3.bf16.msra.mxu0 %v3405_v21  ;;  %3088 = vmatmul.mubr.f32.gmra.mrb[28].mxu1 %v947_v59  ;;  %v3414_v1 = vpack.c.bf16 %v2818_v36, %v2817_v62  ;;  %v721_v21 = vld [vmem:[#allocation2 + $0x38] sm:$0xff]  ;;  %v2826_v59 = vld [vmem:[%s5254_s1 + $0x348] sm:$0xff]  ;;  %v4549_v36 = vld [vmem:[#allocation2 + $0xb0] sm:$0xff] }
  0x6c   : > { %3410 = vmatprep.subr.bf16.mxu0 %v3409_v42  ;;  %3090 = vmatprep.mubr.f32.mxu1 %v4277_v53  ;;  %v2849_v53 = vld [vmem:[%s5254_s1 + $0x400] sm:$0xff] }
  0x6d   : > { %3377 = vmatpush1.bf16.msra.mxu1 %v3376_v55  ;;  %1103 = vmatmul.mubr.f32.gmra.mrb[14].mxu0 %v4199_v56  ;;  %v4475_v18 = vpack.c.bf16 %v2850_v24, %v2849_v53  ;;  %v2831_v53 = vld [vmem:[%s5254_s1 + $0x370] sm:$0xff]  ;;  %v2833_v24 = vld [vmem:[%s5254_s1 + $0x380] sm:$0xff] }
  0x6e   : > { %3378 = vmatprep.subr.bf16.mxu1 %v5275_v6  ;;  %1107 = vmatprep.mubr.f32.mxu0 %v3813_v47  ;;  %v2819_v47 = vld [vmem:[%s5254_s1 + $0x310] sm:$0xff] }
  0x6f   : > { %3412 = vmatpush3.bf16.msra.mxu0 %v3409_v42  ;;  %3091 = vmatmul.mubr.f32.gmra.mrb[30].mxu1 %v953_v8  ;;  %v3417_v26 = vpack.c.bf16 %v2820_v15, %v2819_v47  ;;  %v2825_v42 = vld [vmem:[%s5254_s1 + $0x340] sm:$0xff] }
  0x70   : > { %1517 = vmatprep.mubr.f32.mxu1 %v4472_v17  ;;  %3462 = vmatprep.subr.bf16.mxu0 %v4475_v18  ;;  %v3426_v55 = vpack.c.bf16 %v2826_v59, %v2825_v42  ;;  %v2829_v8 = vld [vmem:[%s5254_s1 + $0x360] sm:$0xff]  ;;  %v5277_v42 = vld [vmem:[#allocation4_spill] sm:$0xff]  ;;  %v4617_v59 = vld [vmem:[#allocation2 + $0x210] sm:$0xff] }
  0x71   : > { %3380 = vmatpush1.bf16.msra.mxu1 %v3379_v4  ;;  %1108 = vmatmul.mubr.f32.gmra.mrb[16].mxu0 %v4464_v39  ;;  %v2830_v4 = vld [vmem:[%s5254_s1 + $0x368] sm:$0xff]  ;;  %v4574_v15 = vld [vmem:[#allocation2 + $0xe0] sm:$0xff] }
  0x72   : > { %3413 = vmatprep.subr.bf16.mxu1 %v5275_v6  ;;  %1112 = vmatprep.mubr.f32.mxu0 %v3815_v48  ;;  %v2822_v48 = vld [vmem:[%s5254_s1 + $0x328] sm:$0xff]  ;;  %v3432_v62 = vpack.c.bf16 %v2830_v4, %v2829_v8  ;;  %v5278_v4 = vld [vmem:[#allocation5_spill] sm:$0xff] }
  0x73   : > { %v3420_v28 = vpack.c.bf16 %v2822_v48, %v2821_v52  ;;  %v2838_v52 = vld [vmem:[%s5254_s1 + $0x3a8] sm:$0xff] }
  0x74   : > { %1518 = vmatmul.mubr.f32.vlgmr.msra.gmra.mrb[32].mxu1 %v4472_v17  ;;  %v2846_v8 = vld [vmem:[%s5254_s1 + $0x3e8] sm:$0xff] }
  0x75   : > { %3415 = vmatpush1.bf16.msra.mxu1 %v3414_v1  ;;  %1522 = vmatprep.mubr.f32.mxu1 %v4472_v17  ;;  %v2834_v1 = vld [vmem:[%s5254_s1 + $0x388] sm:$0xff] }
  0x76   : > { %1113 = vmatmul.mubr.f32.gmra.mrb[18].mxu0 %v4252_v45  ;;  %3416 = vmatprep.subr.bf16.mxu1 %v5275_v6  ;;  %v3438_v47 = vpack.c.bf16 %v2834_v1, %v2833_v24  ;;  %v5279_v24 = vld [vmem:[#allocation6_spill] sm:$0xff]  ;;  %v4658_v1 = vld [vmem:[#allocation2 + $0x270] sm:$0xff] }
  0x77   : > { %1117 = vmatprep.mubr.f32.mxu0 %v3869_v9  ;;  %v2824_v9 = vld [vmem:[%s5254_s1 + $0x338] sm:$0xff] }
  0x78   : > { %1523 = vmatmul.mubr.f32.gmra.mrb[34].mxu1 %v4472_v17  ;;  %v3423_v50 = vpack.c.bf16 %v2824_v9, %v2823_v16  ;;  %v2841_v9 = vld [vmem:[%s5254_s1 + $0x3c0] sm:$0xff] }
  0x79   : > { %1527 = vmatprep.mubr.f32.mxu1 %v721_v21  ;;  %3418 = vmatpush1.bf16.msra.mxu1 %v3417_v26  ;;  %v2835_v26 = vld [vmem:[%s5254_s1 + $0x390] sm:$0xff]  ;;  %v2837_v21 = vld [vmem:[%s5254_s1 + $0x3a0] sm:$0xff] }
  0x7a   : > { %1118 = vmatmul.mubr.f32.gmra.mrb[20].mxu0 %v4498_v11  ;;  %3419 = vmatprep.subr.bf16.mxu1 %v5275_v6  ;;  %v3444_v48 = vpack.c.bf16 %v2838_v52, %v2837_v21  ;;  %v3515_v21 = vld [vmem:[#allocation2 + $0x1e8] sm:$0xff]  ;;  %v4685_v52 = vld [vmem:[#allocation2 + $0x300] sm:$0xff] }
  0x7b   : > { %1122 = vmatprep.mubr.f32.mxu0 %v3879_v14  ;;  %v4520_v14 = vld [vmem:[#allocation2 + $0x150] sm:$0xff] }
  0x7c   : > { %1528 = vmatmul.mubr.f32.gmra.mrb[36].mxu1 %v4281_v57  ;;  %v3504_v57 = vld [vmem:[#allocation2 + $0x68] sm:$0xff] }
  0x7d   : > { %1532 = vmatprep.mubr.f32.mxu1 %v724_v27  ;;  %3421 = vmatpush1.bf16.msra.mxu1 %v3420_v28  ;;  %v2839_v28 = vld [vmem:[%s5254_s1 + $0x3b0] sm:$0xff]  ;;  %v5276_v27 = vld [vmem:[#allocation3_spill] sm:$0xff] }
  0x7e   : > { %1123 = vmatmul.mubr.f32.gmra.mrb[22].mxu0 %v4259_v61  ;;  %3422 = vmatprep.subr.bf16.mxu1 %v5275_v6 }
  0x7f   : > { %1127 = vmatprep.mubr.f32.mxu0 %v3886_v20  ;;  %v2828_v20 = vld [vmem:[%s5254_s1 + $0x358] sm:$0xff] }
  0x80   : > { %1533 = vmatmul.mubr.f32.gmra.mrb[38].mxu1 %v3961_v19  ;;  %v3429_v19 = vpack.c.bf16 %v2828_v20, %v2827_v32  ;;  %v2843_v32 = vld [vmem:[%s5254_s1 + $0x3d0] sm:$0xff]  ;;  %v2844_v20 = vld [vmem:[%s5254_s1 + $0x3d8] sm:$0xff] }
  0x81   : > { %1537 = vmatprep.mubr.f32.mxu1 %v3504_v57  ;;  %3424 = vmatpush1.bf16.msra.mxu1 %v3423_v50  ;;  %v2842_v50 = vld [vmem:[%s5254_s1 + $0x3c8] sm:$0xff] }
  0x82   : > { %1128 = vmatmul.mubr.f32.gmra.mrb[24].mxu0 %v4520_v14  ;;  %3425 = vmatprep.subr.bf16.mxu1 %v5275_v6  ;;  %v3450_v57 = vpack.c.bf16 %v2842_v50, %v2841_v9  ;;  %v4736_v9 = vld [vmem:[#allocation2 + $0xb8] sm:$0xff] }
  0x83   : > { %1132 = vmatprep.mubr.f32.mxu0 %v3910_v35  ;;  %v4545_v35 = vld [vmem:[#allocation2 + $0x180] sm:$0xff] }
  0x84   : > { %1538 = vmatmul.mubr.f32.gmra.mrb[40].mxu1 %v4360_v2  ;;  %v3505_v2 = vld [vmem:[#allocation2 + $0x98] sm:$0xff] }
  0x85   : > { %1542 = vmatprep.mubr.f32.mxu1 %v4524_v22  ;;  %3427 = vmatpush1.bf16.msra.mxu1 %v3426_v55  ;;  %v4621_v55 = vld [vmem:[#allocation2 + $0x140] sm:$0xff] }
  0x86   : > { %1133 = vmatmul.mubr.f32.gmra.mrb[26].mxu0 %v4285_v0  ;;  %3428 = vmatprep.subr.bf16.mxu1 %v5275_v6 }
  0x87   : > { %1137 = vmatprep.mubr.f32.mxu0 %v3921_v46  ;;  %v2832_v46 = vld [vmem:[%s5254_s1 + $0x378] sm:$0xff] }
  0x88   : > { %1543 = vmatmul.mubr.f32.gmra.mrb[42].mxu1 %v4052_v7  ;;  %v3435_v7 = vpack.c.bf16 %v2832_v46, %v2831_v53  ;;  %v2847_v53 = vld [vmem:[%s5254_s1 + $0x3f0] sm:$0xff]  ;;  %v2848_v46 = vld [vmem:[%s5254_s1 + $0x3f8] sm:$0xff] }
  0x89   : > { %1547 = vmatprep.mubr.f32.mxu1 %v3505_v2  ;;  %3430 = vmatpush1.bf16.msra.mxu1 %v3429_v19  ;;  %v2845_v19 = vld [vmem:[%s5254_s1 + $0x3e0] sm:$0xff] }
  0x8a   : > { %1138 = vmatmul.mubr.f32.gmra.mrb[28].mxu0 %v4545_v35  ;;  %3431 = vmatprep.subr.bf16.mxu1 %v5275_v6  ;;  %v4642_v2 = vld [vmem:[#allocation2 + $0x240] sm:$0xff] }
  0x8b   : > { %1142 = vmatprep.mubr.f32.mxu0 %v3941_v54  ;;  %v4570_v54 = vld [vmem:[#allocation2 + $0x1b0] sm:$0xff] }
  0x8c   : > { %1548 = vmatmul.mubr.f32.gmra.mrb[44].mxu1 %v4408_v38  ;;  %v3506_v38 = vld [vmem:[#allocation2 + $0xc8] sm:$0xff] }
  0x8d   : > { %1552 = vmatprep.mubr.f32.mxu1 %v4549_v36  ;;  %3433 = vmatpush1.bf16.msra.mxu1 %v3432_v62  ;;  %v3456_v62 = vpack.c.bf16 %v2846_v8, %v2845_v19  ;;  %v4764_v19 = vld [vmem:[#allocation2 + $0x118] sm:$0xff]  ;;  %v2863_v8 = vld [vmem:[%s5254_s1 + $0x470] sm:$0xff] }
  0x8e   : > { %1143 = vmatmul.mubr.f32.gmra.mrb[30].mxu0 %v4292_v10  ;;  %3434 = vmatprep.subr.bf16.mxu1 %v5275_v6 }
  0x8f   : > { %1147 = vmatprep.mubr.f32.mxu0 %v3979_v5  ;;  %v2836_v5 = vld [vmem:[%s5254_s1 + $0x398] sm:$0xff] }
  0x90   : > { %1553 = vmatmul.mubr.f32.gmra.mrb[46].mxu1 %v4133_v44  ;;  %v3441_v44 = vpack.c.bf16 %v2836_v5, %v2835_v26  ;;  %v3514_v26 = vld [vmem:[#allocation2 + $0x1d0] sm:$0xff]  ;;  %v5280_v5 = vld [vmem:[#allocation7_spill] sm:$0xff] }
  0x91   : > { %1557 = vmatprep.mubr.f32.mxu1 %v3506_v38  ;;  %3436 = vmatpush1.bf16.msra.mxu1 %v3435_v7  ;;  %v3459_v7 = vpack.c.bf16 %v2848_v46, %v2847_v53  ;;  %v3512_v38 = vld [vmem:[#allocation2 + $0x188] sm:$0xff]  ;;  %v4786_v53 = vld [vmem:[#allocation2 + $0x178] sm:$0xff]  ;;  %v4789_v46 = vld [vmem:[#allocation2 + $0x190] sm:$0xff] }
  0x92   : > { %1148 = vmatmul.mubr.f32.gmra.mrb[32].mxu0 %v4570_v54  ;;  %3437 = vmatprep.subr.bf16.mxu1 %v5275_v6 }
  0x93   : > { %1152 = vmatprep.mubr.f32.mxu0 %v3981_v23  ;;  %v4595_v23 = vld [vmem:[#allocation2 + $0x1e0] sm:$0xff] }
  0x94   : > { %1558 = vmatmul.mubr.f32.gmra.mrb[48].mxu1 %v4442_v37  ;;  %v3507_v37 = vld [vmem:[#allocation2 + $0xf8] sm:$0xff] }
  0x95   : > { %1562 = vmatprep.mubr.f32.mxu1 %v4574_v15  ;;  %3439 = vmatpush1.bf16.msra.mxu1 %v3438_v47  ;;  %v4662_v47 = vld [vmem:[#allocation2 + $0x1a0] sm:$0xff] }
  0x96   : > { %1153 = vmatmul.mubr.f32.gmra.mrb[34].mxu0 %v4305_v58  ;;  %3440 = vmatprep.subr.bf16.mxu1 %v5275_v6 }
  0x97   : > { %1157 = vmatprep.mubr.f32.mxu0 %v4000_v12  ;;  %v2840_v12 = vld [vmem:[%s5254_s1 + $0x3b8] sm:$0xff] }
  0x98   : > { %1563 = vmatmul.mubr.f32.gmra.mrb[50].mxu1 %v4199_v56  ;;  %v3508_v56 = vld [vmem:[#allocation2 + $0x110] sm:$0xff]  ;;  %v3447_v16 = vpack.c.bf16 %v2840_v12, %v2839_v28  ;;  %v2856_v12 = vld [vmem:[%s5254_s1 + $0x438] sm:$0xff] }
  0x99   : > { %1567 = vmatprep.mubr.f32.mxu1 %v3507_v37  ;;  %3442 = vmatpush1.bf16.msra.mxu1 %v3441_v44  ;;  %v4677_v44 = vld [vmem:[#allocation2 + $0x2d0] sm:$0xff]  ;;  %v2854_v37 = vld [vmem:[%s5254_s1 + $0x428] sm:$0xff] }
  0x9a   : > { %1158 = vmatmul.mubr.f32.gmra.mrb[36].mxu0 %v4595_v23  ;;  %3443 = vmatprep.subr.bf16.mxu1 %v5275_v6  ;;  %v2855_v28 = vld [vmem:[%s5254_s1 + $0x430] sm:$0xff] }
  0x9b   : > { %1162 = vmatprep.mubr.f32.mxu0 %v5276_v27  ;;  %v4725_v27 = vld [vmem:[#allocation2 + $0xa0] sm:$0xff] }
  0x9c   : > { %1568 = vmatmul.mubr.f32.gmra.mrb[52].mxu1 %v4464_v39  ;;  %v3509_v39 = vld [vmem:[#allocation2 + $0x128] sm:$0xff] }
  0x9d   : > { %1572 = vmatprep.mubr.f32.mxu1 %v3508_v56  ;;  %3445 = vmatpush1.bf16.msra.mxu1 %v3444_v48  ;;  %v2857_v56 = vld [vmem:[%s5254_s1 + $0x440] sm:$0xff] }
  0x9e   : > { %1163 = vmatmul.mubr.f32.gmra.mrb[38].mxu0 %v4318_v51  ;;  %3446 = vmatprep.subr.bf16.mxu1 %v5275_v6 }
  0x9f   : > { %1167 = vmatprep.mubr.f32.mxu0 %v5277_v42 }
  0xa0   : > { %1573 = vmatmul.mubr.f32.gmra.mrb[54].mxu1 %v4252_v45  ;;  %v3453_v45 = vpack.c.bf16 %v2844_v20, %v2843_v32  ;;  %v4753_v32 = vld [vmem:[#allocation2 + $0x100] sm:$0xff] }
  0xa1   : > { %1577 = vmatprep.mubr.f32.mxu1 %v3509_v39  ;;  %3448 = vmatpush1.bf16.msra.mxu1 %v3447_v16  ;;  %v2858_v16 = vld [vmem:[%s5254_s1 + $0x448] sm:$0xff]  ;;  %v2860_v39 = vld [vmem:[%s5254_s1 + $0x458] sm:$0xff]  ;;  %v2861_v20 = vld [vmem:[%s5254_s1 + $0x460] sm:$0xff] }
  0xa2   : > { %1168 = vmatmul.mubr.f32.gmra.mrb[40].mxu0 %v4617_v59  ;;  %3449 = vmatprep.subr.bf16.mxu1 %v5275_v6  ;;  %v3477_v50 = vpack.c.bf16 %v2858_v16, %v2857_v56  ;;  %v4838_v56 = vld [vmem:[#allocation2 + $0x2e0] sm:$0xff]  ;;  %v1922_v16 = vld [vmem:[#allocation2 + $0xf0] sm:$0xff] }
  0xa3   : > { %1172 = vmatprep.mubr.f32.mxu0 %v4059_v29 }
  0xa4   : > { %1578 = vmatmul.mubr.f32.gmra.mrb[56].mxu1 %v4498_v11  ;;  %v3510_v11 = vld [vmem:[#allocation2 + $0x158] sm:$0xff] }
  0xa5   : > { %1582 = vmatprep.mubr.f32.mxu1 %v4621_v55  ;;  %3451 = vmatpush1.bf16.msra.mxu1 %v3450_v57  ;;  %v4750_v57 = vld [vmem:[#allocation2 + $0xe8] sm:$0xff] }
  0xa6   : > { %1173 = vmatmul.mubr.f32.gmra.mrb[42].mxu0 %v4328_v3  ;;  %3452 = vmatprep.subr.bf16.mxu1 %v5275_v6 }
  0xa7   : > { %1177 = vmatprep.mubr.f32.mxu0 %v5278_v4 }
  0xa8   : > { %1583 = vmatmul.mubr.f32.gmra.mrb[58].mxu1 %v4259_v61  ;;  %v3511_v61 = vld [vmem:[#allocation2 + $0x170] sm:$0xff] }
  0xa9   : > { %1587 = vmatprep.mubr.f32.mxu1 %v3510_v11  ;;  %3454 = vmatpush1.bf16.msra.mxu1 %v3453_v45  ;;  %v2862_v45 = vld [vmem:[%s5254_s1 + $0x468] sm:$0xff] }
  0xaa   : > { %1178 = vmatmul.mubr.f32.gmra.mrb[44].mxu0 %v4642_v2  ;;  %3455 = vmatprep.subr.bf16.mxu1 %v5275_v6  ;;  %v4778_v11 = vld [vmem:[#allocation2 + $0x148] sm:$0xff] }
  0xab   : > { %1182 = vmatprep.mubr.f32.mxu0 %v4099_v41 }
  0xac   : > { %1588 = vmatmul.mubr.f32.gmra.mrb[60].mxu1 %v4520_v14 }
  0xad   : > { %1592 = vmatprep.mubr.f32.mxu1 %v3511_v61  ;;  %3457 = vmatpush1.bf16.msra.mxu1 %v3456_v62  ;;  %v4781_v62 = vld [vmem:[#allocation2 + $0x160] sm:$0xff]  ;;  %v4794_v61 = vld [vmem:[#allocation2 + $0x1a8] sm:$0xff] }
  0xae   : > { %1183 = vmatmul.mubr.f32.gmra.mrb[46].mxu0 %v4341_v30  ;;  %3458 = vmatprep.subr.bf16.mxu1 %v5275_v6  ;;  %v4669_v6 = vld [vmem:[#allocation2 + $0x2a0] sm:$0xff] }
  0xaf   : > { %1187 = vmatprep.mubr.f32.mxu0 %v5279_v24 }
  0xb0   : > { %1593 = vmatmul.mubr.f32.gmra.mrb[62].mxu1 %v4285_v0  ;;  %v3513_v0 = vld [vmem:[#allocation2 + $0x1b8] sm:$0xff] }
  0xb1   : > { %1597 = vmatprep.mubr.f32.mxu1 %v3512_v38  ;;  %3460 = vmatpush1.bf16.msra.mxu1 %v3459_v7  ;;  %v4797_v7 = vld [vmem:[#allocation2 + $0x1c0] sm:$0xff]  ;;  %v4801_v38 = vld [vmem:[#allocation2 + $0x1d8] sm:$0xff] }
  0xb2   : > { %1188 = vmatmul.mubr.f32.gmra.mrb[48].mxu0 %v4658_v1 }
  0xb3   : > { %1192 = vmatprep.mubr.f32.mxu0 %v4140_v34 }
  0xb4   : > { %1598 = vmatmul.mubr.f32.gmra.mrb[64].mxu1 %v4545_v35 }
  0xb5   : > { %1602 = vmatprep.mubr.f32.mxu1 %v4662_v47 }
  0xb6   : > { %1193 = vmatmul.mubr.f32.gmra.mrb[50].mxu0 %v4355_v33 }
  0xb7   : > { %1197 = vmatprep.mubr.f32.mxu0 %v4151_v40 }
  0xb8   : > { %1603 = vmatmul.mubr.f32.gmra.mrb[66].mxu1 %v4292_v10  ;;  %v3516_v10 = vld [vmem:[#allocation2 + $0x200] sm:$0xff] }
  0xb9   : > { %1607 = vmatprep.mubr.f32.mxu1 %v3513_v0  ;;  %v1907_v0 = vld [vmem:[#allocation2 + $0x78] sm:$0xff] }
  0xba   : > { %1198 = vmatmul.mubr.f32.gmra.mrb[52].mxu0 %v4669_v6 }
  0xbb   : > { %1202 = vmatprep.mubr.f32.mxu0 %v4167_v60 }
  0xbc   : > { %1608 = vmatmul.mubr.f32.gmra.mrb[68].mxu1 %v4570_v54 }
  0xbd   : > { %1612 = vmatprep.mubr.f32.mxu1 %v3514_v26  ;;  %v1911_v26 = vld [vmem:[#allocation2 + $0x98] sm:$0xff] }
  0xbe   : > { %1203 = vmatmul.mubr.f32.gmra.mrb[54].mxu0 %v4364_v43 }
  0xbf   : > { %1207 = vmatprep.mubr.f32.mxu0 %v5280_v5 }
  0xc0   : > { %1613 = vmatmul.mubr.f32.gmra.mrb[70].mxu1 %v4305_v58  ;;  %v2851_v58 = vld [vmem:[%s5254_s1 + $0x410] sm:$0xff] }
  0xc1   : > { %1617 = vmatprep.mubr.f32.mxu1 %v3515_v21  ;;  %v1910_v21 = vld [vmem:[#allocation2 + $0x90] sm:$0xff] }
  0xc2   : > { %1208 = vmatmul.mubr.f32.gmra.mrb[56].mxu0 %v4677_v44 }
  0xc3   : > { %1212 = vmatprep.mubr.f32.mxu0 %v4209_v49 }
  0xc4   : > { %1618 = vmatmul.mubr.f32.gmra.mrb[72].mxu1 %v4595_v23 }
  0xc5   : > { %1622 = vmatprep.mubr.f32.mxu1 %v3516_v10  ;;  %v4814_v10 = vld [vmem:[#allocation2 + $0x238] sm:$0xff] }
  0xc6   : > { %1213 = vmatmul.mubr.f32.gmra.mrb[58].mxu0 %v4369_v13 }
  0xc7   : > { %1217 = vmatprep.mubr.f32.mxu0 %v4223_v31  ;;  %v2852_v31 = vld [vmem:[%s5254_s1 + $0x418] sm:$0xff] }
  0xc8   : > { %1623 = vmatmul.mubr.f32.gmra.mrb[74].mxu1 %v4318_v51  ;;  %v722_v51 = vld [vmem:[#allocation2 + $0x40] sm:$0xff] }
  0xc9   : > { %1627 = vmatprep.mubr.f32.mxu1 %v5277_v42  ;;  %v2859_v42 = vld [vmem:[%s5254_s1 + $0x450] sm:$0xff] }
  0xca   : > { %1218 = vmatmul.mubr.f32.gmra.mrb[60].mxu0 %v4685_v52 }
  0xcb   : > { %1222 = vmatprep.mubr.f32.mxu0 %v4235_v63  ;;  %v3465_v63 = vpack.c.bf16 %v2852_v31, %v2851_v58  ;;  %v1913_v58 = vld [vmem:[#allocation2 + $0xa8] sm:$0xff] }
  0xcc   : > { %1628 = vmatmul.mubr.f32.gmra.mrb[76].mxu1 %v4617_v59  ;;  %v1917_v31 = vld [vmem:[#allocation2 + $0xc8] sm:$0xff] }
  0xcd   : > { %1632 = vmatprep.mubr.f32.mxu1 %v4059_v29  ;;  %v2853_v29 = vld [vmem:[%s5254_s1 + $0x420] sm:$0xff] }
  0xce   : > { %1223 = vmatmul.mubr.f32.gmra.mrb[62].mxu0 %v4380_v25  ;;  %v725_v25 = vld [vmem:[#allocation2 + $0x58] sm:$0xff]  ;;  %v3469_v48 = vpack.c.bf16 %v2854_v37, %v2853_v29  ;;  %v1916_v29 = vld [vmem:[#allocation2 + $0xc0] sm:$0xff] }
  0xcf   : > { %3125 = vmatprep.mubr.f32.mxu0 %v4472_v17  ;;  %v4827_v37 = vld [vmem:[#allocation2 + $0x298] sm:$0xff] }
  0xd0   : > { %1633 = vmatmul.mubr.f32.gmra.mrb[78].mxu1 %v4328_v3  ;;  %v4712_v3 = vld [vmem:[#allocation2 + $0x70] sm:$0xff] }
  0xd1   : > { %1637 = vmatprep.mubr.f32.mxu1 %v5278_v4  ;;  %v2864_v4 = vld [vmem:[%s5254_s1 + $0x478] sm:$0xff] }
  0xd2   : > { %3126 = vmatmul.mubr.f32.vlgmr.msra.gmra.mrb[64].mxu0 %v4472_v17 }
  0xd3   : > { %3128 = vmatprep.mubr.f32.mxu0 %v722_v51  ;;  %3464 = vmatpush3.bf16.msra.mxu0 %v4475_v18  ;;  %v4722_v18 = vld [vmem:[#allocation2 + $0x88] sm:$0xff] }
  0xd4   : > { %1638 = vmatmul.mubr.f32.gmra.mrb[80].mxu1 %v4642_v2  ;;  %3466 = vmatprep.subr.bf16.mxu0 %v3465_v63  ;;  %v4821_v51 = vld [vmem:[#allocation2 + $0x268] sm:$0xff] }
  0xd5   : > { %1642 = vmatprep.mubr.f32.mxu1 %v4099_v41  ;;  %v3473_v41 = vpack.c.bf16 %v2856_v12, %v2855_v28  ;;  %v4836_v12 = vld [vmem:[#allocation2 + $0x2c8] sm:$0xff] }
  0xd6   : > { %3129 = vmatmul.mubr.f32.gmra.mrb[66].mxu0 %v725_v25  ;;  %v1919_v25 = vld [vmem:[#allocation2 + $0xd8] sm:$0xff] }
  0xd7   : > { %3131 = vmatprep.mubr.f32.mxu0 %v4712_v3  ;;  %3468 = vmatpush3.bf16.msra.mxu0 %v3465_v63  ;;  %v4823_v63 = vld [vmem:[#allocation2 + $0x280] sm:$0xff] }
  0xd8   : > { %1643 = vmatmul.mubr.f32.gmra.mrb[82].mxu1 %v4341_v30  ;;  %3470 = vmatprep.subr.bf16.mxu0 %v3469_v48  ;;  %v4739_v30 = vld [vmem:[#allocation2 + $0xd0] sm:$0xff] }
  0xd9   : > { %1647 = vmatprep.mubr.f32.mxu1 %v5279_v24  ;;  %v1904_v24 = vld [vmem:[#allocation2 + $0x60] sm:$0xff] }
  0xda   : > { %3132 = vmatmul.mubr.f32.gmra.mrb[68].mxu0 %v4722_v18 }
  0xdb   : > { %3134 = vmatprep.mubr.f32.mxu0 %v4725_v27  ;;  %3472 = vmatpush3.bf16.msra.mxu0 %v3469_v48  ;;  %v1923_v48 = vld [vmem:[#allocation2 + $0xf8] sm:$0xff] }
  0xdc   : > { %1648 = vmatmul.mubr.f32.gmra.mrb[84].mxu1 %v4658_v1  ;;  %3474 = vmatprep.subr.bf16.mxu0 %v3473_v41 }
  0xdd   : > { %1652 = vmatprep.mubr.f32.mxu1 %v4140_v34  ;;  %v3481_v34 = vpack.c.bf16 %v2860_v39, %v2859_v42  ;;  %v4844_v42 = vld [vmem:[#allocation2 + $0x2f8] sm:$0xff] }
  0xde   : > { %3135 = vmatmul.mubr.f32.gmra.mrb[70].mxu0 %v4736_v9 }
  0xdf   : > { %3137 = vmatprep.mubr.f32.mxu0 %v4739_v30  ;;  %3476 = vmatpush3.bf16.msra.mxu0 %v3473_v41 }
  0xe0   : > { %1653 = vmatmul.mubr.f32.gmra.mrb[86].mxu1 %v4355_v33  ;;  %3478 = vmatprep.subr.bf16.mxu0 %v3477_v50  ;;  %v4767_v33 = vld [vmem:[#allocation2 + $0x130] sm:$0xff] }
  0xe1   : > { %1657 = vmatprep.mubr.f32.mxu1 %v4151_v40  ;;  %v3485_v40 = vpack.c.bf16 %v2862_v45, %v2861_v20  ;;  %v1929_v20 = vld [vmem:[#allocation2 + $0x128] sm:$0xff] }
  0xe2   : > { %3138 = vmatmul.mubr.f32.gmra.mrb[72].mxu0 %v4750_v57 }
  0xe3   : > { %3140 = vmatprep.mubr.f32.mxu0 %v4753_v32  ;;  %3480 = vmatpush3.bf16.msra.mxu0 %v3477_v50  ;;  %v1926_v50 = vld [vmem:[#allocation2 + $0x110] sm:$0xff] }
  0xe4   : > { %1658 = vmatmul.mubr.f32.gmra.mrb[88].mxu1 %v4669_v6  ;;  %3482 = vmatprep.subr.bf16.mxu0 %v3481_v34 }
  0xe5   : > { %1662 = vmatprep.mubr.f32.mxu1 %v4167_v60  ;;  %v3489_v60 = vpack.c.bf16 %v2864_v4, %v2863_v8  ;;  %v1928_v8 = vld [vmem:[#allocation2 + $0x120] sm:$0xff] }
  0xe6   : > { %3141 = vmatmul.mubr.f32.gmra.mrb[74].mxu0 %v4764_v19 }
  0xe7   : > { %3143 = vmatprep.mubr.f32.mxu0 %v4767_v33  ;;  %3484 = vmatpush3.bf16.msra.mxu0 %v3481_v34  ;;  %v1925_v34 = vld [vmem:[#allocation2 + $0x108] sm:$0xff] }
  0xe8   : > { %1663 = vmatmul.mubr.f32.gmra.mrb[90].mxu1 %v4364_v43  ;;  %3486 = vmatprep.subr.bf16.mxu0 %v3485_v40  ;;  %v1905_v43 = vld [vmem:[#allocation2 + $0x68] sm:$0xff] }
  0xe9   : > { %1667 = vmatprep.mubr.f32.mxu1 %v5280_v5  ;;  %v4810_v5 = vld [vmem:[#allocation2 + $0x220] sm:$0xff] }
  0xea   : > { %3144 = vmatmul.mubr.f32.gmra.mrb[76].mxu0 %v4778_v11 }
  0xeb   : > { %3146 = vmatprep.mubr.f32.mxu0 %v4781_v62  ;;  %3488 = vmatpush3.bf16.msra.mxu0 %v3485_v40 }
  0xec   : > { %1668 = vmatmul.mubr.f32.gmra.mrb[92].mxu1 %v4677_v44  ;;  %3490 = vmatprep.subr.bf16.mxu0 %v3489_v60 }
  0xed   : > { %1672 = vmatprep.mubr.f32.mxu1 %v4209_v49  ;;  %v4803_v49 = vld [vmem:[#allocation2 + $0x1f0] sm:$0xff] }
  0xee   : > { %3147 = vmatmul.mubr.f32.gmra.mrb[78].mxu0 %v4786_v53 }
  0xef   : > { %3149 = vmatprep.mubr.f32.mxu0 %v4789_v46  ;;  %3492 = vmatpush3.bf16.msra.mxu0 %v3489_v60 }
  0xf0   : > { %1673 = vmatmul.mubr.f32.gmra.mrb[94].mxu1 %v4369_v13  ;;  %v4808_v13 = vld [vmem:[#allocation2 + $0x208] sm:$0xff] }
  0xf1   : > { %2113 = vmatprep.mubr.f32.mxu1 %v1905_v43  ;;  %v1931_v43 = vld [vmem:[#allocation2 + $0x138] sm:$0xff] }
  0xf2   : > { %3150 = vmatmul.mubr.f32.gmra.mrb[80].mxu0 %v4794_v61 }
  0xf3   : > { %3152 = vmatprep.mubr.f32.mxu0 %v4797_v7 }
  0xf4   : > { %2114 = vmatmul.mubr.f32.vlgmr.msra.gmra.mrb[96].mxu1 %v1904_v24 }
  0xf5   : > { %2118 = vmatprep.mubr.f32.mxu1 %v4524_v22  ;;  %v4816_v22 = vld [vmem:[#allocation2 + $0x250] sm:$0xff] }
  0xf6   : > { %3153 = vmatmul.mubr.f32.gmra.mrb[82].mxu0 %v4801_v38 }
  0xf7   : > { %3155 = vmatprep.mubr.f32.mxu0 %v4803_v49 }
  0xf8   : > { %2119 = vmatmul.mubr.f32.gmra.mrb[98].mxu1 %v1907_v0 }
  0xf9   : > { %2123 = vmatprep.mubr.f32.mxu1 %v1911_v26 }
  0xfa   : > { %3156 = vmatmul.mubr.f32.gmra.mrb[84].mxu0 %v4808_v13 }
  0xfb   : > { %3158 = vmatprep.mubr.f32.mxu0 %v4810_v5 }
  0xfc   : > { %2124 = vmatmul.mubr.f32.gmra.mrb[100].mxu1 %v1910_v21 }
  0xfd   : > { %2128 = vmatprep.mubr.f32.mxu1 %v4549_v36  ;;  %v4829_v36 = vld [vmem:[#allocation2 + $0x2b0] sm:$0xff] }
  0xfe   : > { %3159 = vmatmul.mubr.f32.gmra.mrb[86].mxu0 %v4814_v10 }
  0xff   : > { %3161 = vmatprep.mubr.f32.mxu0 %v4816_v22 }
 0x100   : > { %2129 = vmatmul.mubr.f32.gmra.mrb[102].mxu1 %v1913_v58  ;;  %v1947_v58 = vld [vmem:[#allocation2 + $0x1b8] sm:$0xff] }
 0x101   : > { %2133 = vmatprep.mubr.f32.mxu1 %v1917_v31 }
 0x102   : > { %3162 = vmatmul.mubr.f32.gmra.mrb[88].mxu0 %v4821_v51 }
 0x103   : > { %3164 = vmatprep.mubr.f32.mxu0 %v4823_v63 }
 0x104   : > { %2134 = vmatmul.mubr.f32.gmra.mrb[104].mxu1 %v1916_v29 }
 0x105   : > { %2138 = vmatprep.mubr.f32.mxu1 %v4574_v15  ;;  %v4833_v28 = vpop.f32.mrb[0].mxu1 }
 0x106   : > { %3165 = vmatmul.mubr.f32.gmra.mrb[90].mxu0 %v4827_v37  ;;  %v1294_v41 = vpop.f32.mrb[1].mxu1 }
 0x107   : > { %3167 = vmatprep.mubr.f32.mxu0 %v4829_v36 }
 0x108   : > { %2139 = vmatmul.mubr.f32.gmra.mrb[106].mxu1 %v1919_v25  ;;  %v1950_v25 = vld [vmem:[#allocation2 + $0x1d0] sm:$0xff] }
 0x109   : > { %2143 = vmatprep.mubr.f32.mxu1 %v1923_v48  ;;  %v4841_v15 = vpop.f32.mrb[2].mxu1 }
 0x10a   : > { %3168 = vmatmul.mubr.f32.gmra.mrb[92].mxu0 %v4836_v12  ;;  %v4846_v39 = vpop.f32.mrb[3].mxu1 }
 0x10b   : > { %3170 = vmatprep.mubr.f32.mxu0 %v4838_v56 }
 0x10c   : > { %2144 = vmatmul.mubr.f32.gmra.mrb[108].mxu1 %v1922_v16  ;;  %v1953_v16 = vld [vmem:[#allocation2 + $0x1e8] sm:$0xff] }
 0x10d   : > { %2148 = vmatprep.mubr.f32.mxu1 %v1926_v50  ;;  %v4849_v45 = vpop.f32.mrb[4].mxu1 }
 0x10e   : > { %3171 = vmatmul.mubr.f32.gmra.mrb[94].mxu0 %v4844_v42  ;;  %v4852_v40 = vpop.f32.mrb[5].mxu1 }
 0x10f   : > { %3205 = vmatprep.mubr.f32.mxu0 %v4712_v3  ;;  %v1935_v3 = vld [vmem:[#allocation2 + $0x158] sm:$0xff] }
 0x110   : > { %2149 = vmatmul.mubr.f32.gmra.mrb[110].mxu1 %v1925_v34 }
 0x111   : > { %2153 = vmatprep.mubr.f32.mxu1 %v1929_v20  ;;  %v4855_v4 = vpop.f32.mrb[6].mxu1  ;;  %v1956_v20 = vld [vmem:[#allocation2 + $0x200] sm:$0xff] }
 0x112   : > { %3206 = vmatmul.mubr.f32.vlgmr.msra.gmra.mrb[96].mxu0 %v4722_v18  ;;  %v4858_v60 = vpop.f32.mrb[7].mxu1  ;;  %v1938_v18 = vld [vmem:[#allocation2 + $0x170] sm:$0xff] }
 0x113   : > { %3208 = vmatprep.mubr.f32.mxu0 %v4725_v27 }
 0x114   : > { %2154 = vmatmul.mubr.f32.gmra.mrb[112].mxu1 %v1928_v8 }
 0x115   : > { %2158 = vmatprep.mubr.f32.mxu1 %v4621_v55  ;;  %v4862_v24 = vpop.f32.mrb[8].mxu1 }
 0x116   : > { %3209 = vmatmul.mubr.f32.gmra.mrb[98].mxu0 %v4736_v9  ;;  %v4865_v0 = vpop.f32.mrb[9].mxu1  ;;  %v1941_v9 = vld [vmem:[#allocation2 + $0x188] sm:$0xff] }
 0x117   : > { %3211 = vmatprep.mubr.f32.mxu0 %v4739_v30 }
 0x118   : > { %2159 = vmatmul.mubr.f32.gmra.mrb[114].mxu1 %v1931_v43 }
 0x119   : > { %2163 = vmatprep.mubr.f32.mxu1 %v1935_v3 }
 0x11a   : > { %3212 = vmatmul.mubr.f32.gmra.mrb[100].mxu0 %v4750_v57  ;;  %v4868_v27 = vpop.f32.mrb[10].mxu1  ;;  %v3517_v57 = vld [vmem:[#allocation2 + $0x168] sm:$0xff] }
 0x11b   : > { %3214 = vmatprep.mubr.f32.mxu0 %v4753_v32  ;;  %v4871_v55 = vpop.f32.mrb[11].mxu1 }
 0x11c   : > { %2164 = vmatmul.mubr.f32.gmra.mrb[116].mxu1 %v4520_v14 }
 0x11d   : > { %2168 = vmatprep.mubr.f32.mxu1 %v1938_v18 }
 0x11e   : > { %3215 = vmatmul.mubr.f32.gmra.mrb[102].mxu0 %v4764_v19  ;;  %v4875_v30 = vpop.f32.mrb[12].mxu1 }
 0x11f   : > { %3217 = vmatprep.mubr.f32.mxu0 %v4767_v33  ;;  %v4878_v26 = vpop.f32.mrb[13].mxu1 }
 0x120   : > { %2169 = vmatmul.mubr.f32.gmra.mrb[118].mxu1 %v3517_v57 }
 0x121   : > { %2173 = vmatprep.mubr.f32.mxu1 %v1941_v9 }
 0x122   : > { %3218 = vmatmul.mubr.f32.gmra.mrb[104].mxu0 %v4778_v11  ;;  %v4881_v32 = vpop.f32.mrb[14].mxu1 }
 0x123   : > { %3220 = vmatprep.mubr.f32.mxu0 %v4781_v62  ;;  %v4884_v14 = vpop.f32.mrb[15].mxu1  ;;  %v3518_v62 = vld [vmem:[#allocation2 + $0x198] sm:$0xff] }
 0x124   : > { %2174 = vmatmul.mubr.f32.gmra.mrb[120].mxu1 %v4545_v35  ;;  %v1069_v19 = vpop.f32.mrb[0].mxu0 }
 0x125   : > { %2178 = vmatprep.mubr.f32.mxu1 %v4662_v47  ;;  %v4888_v21 = vadd.f32 %v1294_v41, %v1069_v19  ;;  %v1071_v33 = vpop.f32.mrb[1].mxu0 }
 0x126   : > { %3221 = vmatmul.mubr.f32.gmra.mrb[106].mxu0 %v4786_v53  ;;  %v4891_v31 = vpop.f32.mrb[16].mxu1 }
 0x127   : > { %3223 = vmatprep.mubr.f32.mxu0 %v4789_v46  ;;  %v4894_v11 = vpop.f32.mrb[17].mxu1 }
 0x128   : > { %2179 = vmatmul.mubr.f32.gmra.mrb[122].mxu1 %v3518_v62  ;;  %v1074_v29 = vpop.f32.mrb[2].mxu0 }
 0x129   : > { %2183 = vmatprep.mubr.f32.mxu1 %v1947_v58  ;;  %v4897_v35 = vadd.f32 %v4833_v28, %v1074_v29  ;;  %v1076_v47 = vpop.f32.mrb[3].mxu0 }
 0x12a   : > { %3224 = vmatmul.mubr.f32.gmra.mrb[108].mxu0 %v4794_v61  ;;  %v4900_v53 = vpop.f32.mrb[18].mxu1 }
 0x12b   : > { %3226 = vmatprep.mubr.f32.mxu0 %v4797_v7  ;;  %v4903_v48 = vpop.f32.mrb[19].mxu1  ;;  %v3519_v7 = vld [vmem:[#allocation2 + $0x1c8] sm:$0xff] }
 0x12c   : > { %2184 = vmatmul.mubr.f32.gmra.mrb[124].mxu1 %v4570_v54  ;;  %v1079_v46 = vpop.f32.mrb[4].mxu0 }
 0x12d   : > { %2188 = vmatprep.mubr.f32.mxu1 %v1950_v25  ;;  %v4907_v41 = vadd.f32 %v4846_v39, %v1079_v46  ;;  %v1081_v28 = vpop.f32.mrb[5].mxu0 }
 0x12e   : > { %3227 = vmatmul.mubr.f32.gmra.mrb[110].mxu0 %v4801_v38  ;;  %v4910_v61 = vpop.f32.mrb[20].mxu1 }
 0x12f   : > { %3229 = vmatprep.mubr.f32.mxu0 %v4803_v49  ;;  %v4913_v50 = vpop.f32.mrb[21].mxu1 }
 0x130   : > { %2189 = vmatmul.mubr.f32.gmra.mrb[126].mxu1 %v3519_v7  ;;  %v1084_v34 = vpop.f32.mrb[6].mxu0 }
 0x131   : > { %2193 = vmatprep.mubr.f32.mxu1 %v1953_v16  ;;  %v4916_v54 = vadd.f32 %v4841_v15, %v1084_v34  ;;  %v1086_v39 = vpop.f32.mrb[7].mxu0  ;;  %v1959_v15 = vld [vmem:[#allocation2 + $0x218] sm:$0xff] }
 0x132   : > { %3230 = vmatmul.mubr.f32.gmra.mrb[112].mxu0 %v4808_v13  ;;  %v4919_v38 = vpop.f32.mrb[22].mxu1  ;;  %v1971_v16 = vld [vmem:[#allocation2 + $0x278] sm:$0xff] }
 0x133   : > { %3232 = vmatprep.mubr.f32.mxu0 %v4810_v5  ;;  %v4922_v8 = vpop.f32.mrb[23].mxu1  ;;  %v3520_v5 = vld [vmem:[#allocation2 + $0x1f8] sm:$0xff] }
 0x134   : > { %2194 = vmatmul.mubr.f32.gmra.mrb[128].mxu1 %v4595_v23  ;;  %v1089_v49 = vpop.f32.mrb[8].mxu0  ;;  %v3522_v39 = vld [vmem:[#allocation2 + $0x258] sm:$0xff] }
 0x135   : > { %2198 = vmatprep.mubr.f32.mxu1 %v1956_v20  ;;  %v4926_v43 = vadd.f32 %v4852_v40, %v1089_v49  ;;  %v1091_v3 = vpop.f32.mrb[9].mxu0  ;;  %v1962_v40 = vld [vmem:[#allocation2 + $0x230] sm:$0xff] }
 0x136   : > { %3233 = vmatmul.mubr.f32.gmra.mrb[114].mxu0 %v4814_v10  ;;  %v4929_v13 = vpop.f32.mrb[24].mxu1  ;;  %v1974_v49 = vld [vmem:[#allocation2 + $0x290] sm:$0xff] }
 0x137   : > { %3235 = vmatprep.mubr.f32.mxu0 %v4816_v22  ;;  %v4932_v18 = vpop.f32.mrb[25].mxu1 }
 0x138   : > { %2199 = vmatmul.mubr.f32.gmra.mrb[130].mxu1 %v3520_v5  ;;  %v1094_v9 = vpop.f32.mrb[10].mxu0 }
 0x139   : > { %2203 = vmatprep.mubr.f32.mxu1 %v1959_v15  ;;  %v4935_v23 = vadd.f32 %v4849_v45, %v1094_v9  ;;  %v1096_v57 = vpop.f32.mrb[11].mxu0  ;;  %v1965_v45 = vld [vmem:[#allocation2 + $0x248] sm:$0xff] }
 0x13a   : > { %3236 = vmatmul.mubr.f32.gmra.mrb[116].mxu0 %v4821_v51  ;;  %v4938_v19 = vpop.f32.mrb[26].mxu1 }
 0x13b   : > { %3238 = vmatprep.mubr.f32.mxu0 %v4823_v63  ;;  %v4941_v10 = vpop.f32.mrb[27].mxu1  ;;  %v3521_v63 = vld [vmem:[#allocation2 + $0x228] sm:$0xff] }
 0x13c   : > { %2204 = vmatmul.mubr.f32.gmra.mrb[132].mxu1 %v4617_v59  ;;  %v1099_v22 = vpop.f32.mrb[12].mxu0 }
 0x13d   : > { %2208 = vmatprep.mubr.f32.mxu1 %v1962_v40  ;;  %v4945_v33 = vadd.f32 %v4858_v60, %v1099_v22  ;;  %v1101_v58 = vpop.f32.mrb[13].mxu0  ;;  %v1968_v60 = vld [vmem:[#allocation2 + $0x260] sm:$0xff] }
 0x13e   : > { %3239 = vmatmul.mubr.f32.gmra.mrb[118].mxu0 %v4827_v37  ;;  %v4948_v62 = vpop.f32.mrb[28].mxu1  ;;  %v3523_v58 = vld [vmem:[#allocation2 + $0x288] sm:$0xff] }
 0x13f   : > { %3241 = vmatprep.mubr.f32.mxu0 %v4829_v36  ;;  %v4951_v51 = vpop.f32.mrb[29].mxu1  ;;  %v1990_v36 = vld [vmem:[#allocation2 + $0x310] sm:$0xff] }
 0x140   : > { %2209 = vmatmul.mubr.f32.gmra.mrb[134].mxu1 %v3521_v63  ;;  %v1104_v29 = vpop.f32.mrb[14].mxu0  ;;  %v1980_v63 = vld [vmem:[#allocation2 + $0x2c0] sm:$0xff] }
 0x141   : > { %2213 = vmatprep.mubr.f32.mxu1 %v1965_v45  ;;  %v4954_v59 = vadd.f32 %v4855_v4, %v1104_v29  ;;  %v1106_v47 = vpop.f32.mrb[15].mxu0 }
 0x142   : > { %3242 = vmatmul.mubr.f32.gmra.mrb[120].mxu0 %v4836_v12  ;;  %v4957_v25 = vpop.f32.mrb[30].mxu1  ;;  %v1993_v12 = vld [vmem:[#allocation2 + $0x328] sm:$0xff] }
 0x143   : > { %3244 = vmatprep.mubr.f32.mxu0 %v4838_v56  ;;  %v4960_v37 = vpop.f32.mrb[31].mxu1 }
 0x144   : > { %2214 = vmatmul.mubr.f32.gmra.mrb[136].mxu1 %v4642_v2  ;;  %v1109_v46 = vpop.f32.mrb[16].mxu0 }
 0x145   : > { %2218 = vmatprep.mubr.f32.mxu1 %v1968_v60  ;;  %v4964_v28 = vadd.f32 %v4865_v0, %v1109_v46  ;;  %v1111_v4 = vpop.f32.mrb[17].mxu0 }
 0x146   : > { %3245 = vmatmul.mubr.f32.gmra.mrb[122].mxu0 %v4844_v42 }
 0x147   : > { %v1519_v7 = vpop.f32.mrb[32].mxu1  ;;  %3247 = vmatprep.mubr.f32.mxu0 %v1990_v36  ;;  %v1983_v36 = vld [vmem:[#allocation2 + $0x2d8] sm:$0xff] }
 0x148   : > { %v4968_v34 = vadd.f32 %v1519_v7, %v4888_v21  ;;  %v1521_v56 = vpop.f32.mrb[33].mxu1  ;;  %2219 = vmatmul.mubr.f32.gmra.mrb[138].mxu1 %v3522_v39 }
 0x149   : > { %v1114_v2 = vpop.f32.mrb[18].mxu0  ;;  %2223 = vmatprep.mubr.f32.mxu1 %v1971_v16  ;;  %v3524_v16 = vld [vmem:[#allocation2 + $0x2b8] sm:$0xff] }
 0x14a   : > { %v4971_v20 = vadd.f32 %v4862_v24, %v1114_v2  ;;  %v1116_v0 = vpop.f32.mrb[19].mxu0  ;;  %3248 = vmatmul.mubr.f32.gmra.mrb[124].mxu0 %v1993_v12  ;;  %v1977_v24 = vld [vmem:[#allocation2 + $0x2a8] sm:$0xff]  ;;  %v1986_v12 = vld [vmem:[#allocation2 + $0x2f0] sm:$0xff] }
 0x14b   : > { %v1524_v3 = vpop.f32.mrb[34].mxu1  ;;  %3250 = vmatprep.mubr.f32.mxu0 %v4472_v17 }
 0x14c   : > { %v4975_v42 = vadd.f32 %v1524_v3, %v4897_v35  ;;  %v1526_v15 = vpop.f32.mrb[35].mxu1  ;;  %2224 = vmatmul.mubr.f32.gmra.mrb[140].mxu1 %v4658_v1 }
 0x14d   : > { %v1119_v21 = vpop.f32.mrb[20].mxu0  ;;  %2228 = vmatprep.mubr.f32.mxu1 %v1974_v49  ;;  %v1989_v49 = vld [vmem:[#allocation2 + $0x308] sm:$0xff] }
 0x14e   : > { %v4979_v5 = vadd.f32 %v4871_v55, %v1119_v21  ;;  %v1121_v9 = vpop.f32.mrb[21].mxu0  ;;  %3251 = vmatmul.mubr.f32.gmra.mrb[126].mxu0 %v4472_v17  ;;  %v3525_v21 = vld [vmem:[#allocation2 + $0x2e8] sm:$0xff] }
 0x14f   : > { %v1529_v57 = vpop.f32.mrb[36].mxu1 }
 0x150   : > { %v4983_v40 = vadd.f32 %v1529_v57, %v4907_v41  ;;  %v1531_v22 = vpop.f32.mrb[37].mxu1  ;;  %2229 = vmatmul.mubr.f32.gmra.mrb[142].mxu1 %v3523_v58 }
 0x151   : > { %v1124_v35 = vpop.f32.mrb[22].mxu0  ;;  %2233 = vmatprep.mubr.f32.mxu1 %v1977_v24 }
 0x152   : > { %v4986_v1 = vadd.f32 %v4868_v27, %v1124_v35  ;;  %v1126_v45 = vpop.f32.mrb[23].mxu0 }
 0x153   : > { %v1534_v55 = vpop.f32.mrb[38].mxu1 }
 0x154   : > { %v4989_v29 = vadd.f32 %v1534_v55, %v4916_v54  ;;  %v1536_v47 = vpop.f32.mrb[39].mxu1  ;;  %2234 = vmatmul.mubr.f32.gmra.mrb[144].mxu1 %v4669_v6 }
 0x155   : > { %v1129_v17 = vpop.f32.mrb[24].mxu0  ;;  %2238 = vmatprep.mubr.f32.mxu1 %v1980_v63 }
 0x156   : > { %v4993_v41 = vadd.f32 %v4878_v26, %v1129_v17  ;;  %v1131_v60 = vpop.f32.mrb[25].mxu0  ;;  %v3527_v17 = vld [vmem:[#allocation2] sm:$0xff] }
 0x157   : > { %v1539_v46 = vpop.f32.mrb[40].mxu1 }
 0x158   : > { %v4996_v27 = vadd.f32 %v1539_v46, %v4926_v43  ;;  %v1541_v4 = vpop.f32.mrb[41].mxu1  ;;  %2239 = vmatmul.mubr.f32.gmra.mrb[146].mxu1 %v3524_v16 }
 0x159   : > { %v1134_v7 = vpop.f32.mrb[26].mxu0  ;;  %2243 = vmatprep.mubr.f32.mxu1 %v1983_v36 }
 0x15a   : > { %v4999_v54 = vadd.f32 %v4875_v30, %v1134_v7  ;;  %v1136_v6 = vpop.f32.mrb[27].mxu0 }
 0x15b   : > { %v1544_v56 = vpop.f32.mrb[42].mxu1 }
 0x15c   : > { %v5002_v26 = vadd.f32 %v1544_v56, %v4935_v23  ;;  %v1546_v39 = vpop.f32.mrb[43].mxu1  ;;  %2244 = vmatmul.mubr.f32.gmra.mrb[148].mxu1 %v4677_v44  ;;  %v1992_v44 = vld [vmem:[#allocation2 + $0x320] sm:$0xff] }
 0x15d   : > { %v1139_v2 = vpop.f32.mrb[28].mxu0  ;;  %2248 = vmatprep.mubr.f32.mxu1 %v1986_v12 }
 0x15e   : > { %v5006_v43 = vadd.f32 %v4884_v14, %v1139_v2  ;;  %v1141_v0 = vpop.f32.mrb[29].mxu0 }
 0x15f   : > { %v1549_v3 = vpop.f32.mrb[44].mxu1 }
 0x160   : > { %v5009_v30 = vadd.f32 %v1549_v3, %v4945_v33  ;;  %v1551_v15 = vpop.f32.mrb[45].mxu1  ;;  %2249 = vmatmul.mubr.f32.gmra.mrb[150].mxu1 %v3525_v21 }
 0x161   : > { %v1144_v9 = vpop.f32.mrb[30].mxu0  ;;  %2253 = vmatprep.mubr.f32.mxu1 %v1989_v49 }
 0x162   : > { %v1370_v23 = vadd.f32 %v4881_v32, %v1144_v9  ;;  %v1146_v24 = vpop.f32.mrb[31].mxu0  ;;  %v3526_v32 = vld [vmem:[#allocation2 + $0x318] sm:$0xff] }
 0x163   : > { %v1554_v57 = vpop.f32.mrb[46].mxu1 }
 0x164   : > { %v5013_v22 = vadd.f32 %v1554_v57, %v4954_v59  ;;  %v1556_v14 = vpop.f32.mrb[47].mxu1  ;;  %2254 = vmatmul.mubr.f32.gmra.mrb[152].mxu1 %v4685_v52 }
 0x165   : > { %v1149_v58 = vpop.f32.mrb[32].mxu0  ;;  %2258 = vmatprep.mubr.f32.mxu1 %v1992_v44 }
 0x166   : > { %v1375_v33 = vadd.f32 %v4894_v11, %v1149_v58  ;;  %v1151_v35 = vpop.f32.mrb[33].mxu0 }
 0x167   : > { %v1559_v45 = vpop.f32.mrb[48].mxu1 }
 0x168   : > { %v5018_v63 = vadd.f32 %v1559_v45, %v4964_v28  ;;  %v1561_v55 = vpop.f32.mrb[49].mxu1  ;;  %2259 = vmatmul.mubr.f32.gmra.mrb[154].mxu1 %v3526_v32 }
 0x169   : > { %v1154_v47 = vpop.f32.mrb[34].mxu0  ;;  %2263 = vmatprep.mubr.f32.mxu1 %v3527_v17 }
 0x16a   : > { %v1380_v59 = vadd.f32 %v4891_v31, %v1154_v47  ;;  %v1156_v60 = vpop.f32.mrb[35].mxu0 }
 0x16b   : > { %v1564_v36 = vpop.f32.mrb[50].mxu1 }
 0x16c   : > { %v5022_v52 = vadd.f32 %v1564_v36, %v4971_v20  ;;  %v1566_v46 = vpop.f32.mrb[51].mxu1  ;;  %2264 = vmatmul.mubr.f32.gmra.mrb[156].mxu1 %v3527_v17 }
 0x16d   : > { %v1159_v11 = vpop.f32.mrb[36].mxu0  ;;  %2268 = vmatprep.mubr.f32.mxu1 %v3527_v17 }
 0x16e   : > { %v1385_v28 = vadd.f32 %v4903_v48, %v1159_v11  ;;  %v1161_v4 = vpop.f32.mrb[37].mxu0 }
 0x16f   : > { %v1569_v16 = vpop.f32.mrb[52].mxu1 }
 0x170   : > { %v5026_v7 = vadd.f32 %v1569_v16, %v4979_v5  ;;  %v1571_v6 = vpop.f32.mrb[53].mxu1  ;;  %2269 = vmatmul.mubr.f32.gmra.mrb[158].mxu1 %v3527_v17 }
 0x171   : > { %v1164_v12 = vpop.f32.mrb[38].mxu0 }
 0x172   : > { %v1390_v31 = vadd.f32 %v4900_v53, %v1164_v12  ;;  %v1166_v56 = vpop.f32.mrb[39].mxu0 }
 0x173   : > { %v1574_v39 = vpop.f32.mrb[54].mxu1 }
 0x174   : > { %v5030_v20 = vadd.f32 %v1574_v39, %v4986_v1  ;;  %v1576_v2 = vpop.f32.mrb[55].mxu1 }
 0x175   : > { %v1169_v0 = vpop.f32.mrb[40].mxu0 }
 0x176   : > { %v1395_v49 = vadd.f32 %v4913_v50, %v1169_v0  ;;  %v1171_v48 = vpop.f32.mrb[41].mxu0 }
 0x177   : > { %v1579_v3 = vpop.f32.mrb[56].mxu1 }
 0x178   : > { %v5034_v15 = vadd.f32 %v1579_v3, %v4993_v41  ;;  %v1581_v5 = vpop.f32.mrb[57].mxu1 }
 0x179   : > { %v1174_v21 = vpop.f32.mrb[42].mxu0 }
 0x17a   : > { %v1400_v9 = vadd.f32 %v4910_v61, %v1174_v21  ;;  %v1176_v24 = vpop.f32.mrb[43].mxu0 }
 0x17b   : > { %v1584_v53 = vpop.f32.mrb[58].mxu1 }
 0x17c   : > { %v5038_v44 = vadd.f32 %v1584_v53, %v4999_v54  ;;  %v1586_v1 = vpop.f32.mrb[59].mxu1 }
 0x17d   : > { %v1179_v57 = vpop.f32.mrb[44].mxu0 }
 0x17e   : > { %v1405_v14 = vadd.f32 %v4922_v8, %v1179_v57  ;;  %v1181_v58 = vpop.f32.mrb[45].mxu0 }
 0x17f   : > { %v1589_v50 = vpop.f32.mrb[60].mxu1 }
 0x180   : > { %v5042_v35 = vadd.f32 %v1589_v50, %v5006_v43  ;;  %v1591_v41 = vpop.f32.mrb[61].mxu1 }
 0x181   : > { %v1184_v45 = vpop.f32.mrb[46].mxu0 }
 0x182   : > { %v1410_v55 = vadd.f32 %v4919_v38, %v1184_v45  ;;  %v1186_v32 = vpop.f32.mrb[47].mxu0 }
 0x183   : > { %v1594_v61 = vpop.f32.mrb[62].mxu1 }
 0x184   : > { %v5045_v47 = vadd.f32 %v1594_v61, %v1370_v23  ;;  %v1596_v17 = vpop.f32.mrb[63].mxu1 }
 0x185   : > { %v1189_v54 = vpop.f32.mrb[48].mxu0 }
 0x186   : > { %v1415_v60 = vadd.f32 %v4932_v18, %v1189_v54  ;;  %v1191_v36 = vpop.f32.mrb[49].mxu0 }
 0x187   : > { %v1599_v46 = vpop.f32.mrb[64].mxu1 }
 0x188   : > { %v5048_v8 = vadd.f32 %v1599_v46, %v1375_v33  ;;  %v1601_v11 = vpop.f32.mrb[65].mxu1 }
 0x189   : > { %v1194_v4 = vpop.f32.mrb[50].mxu0 }
 0x18a   : > { %v1420_v43 = vadd.f32 %v4929_v13, %v1194_v4  ;;  %v1196_v16 = vpop.f32.mrb[51].mxu0 }
 0x18b   : > { %v1604_v6 = vpop.f32.mrb[66].mxu1 }
 0x18c   : > { %v5051_v12 = vadd.f32 %v1604_v6, %v1380_v59  ;;  %v1606_v38 = vpop.f32.mrb[67].mxu1 }
 0x18d   : > { %v1199_v56 = vpop.f32.mrb[52].mxu0 }
 0x18e   : > { %v1425_v23 = vadd.f32 %v4941_v10, %v1199_v56  ;;  %v1201_v39 = vpop.f32.mrb[53].mxu0 }
 0x18f   : > { %v1609_v2 = vpop.f32.mrb[68].mxu1 }
 0x190   : > { %v5054_v0 = vadd.f32 %v1609_v2, %v1385_v28  ;;  %v1611_v18 = vpop.f32.mrb[69].mxu1 }
 0x191   : > { %v1204_v48 = vpop.f32.mrb[54].mxu0 }
 0x192   : > { %v1430_v33 = vadd.f32 %v4938_v19, %v1204_v48  ;;  %v1206_v3 = vpop.f32.mrb[55].mxu0 }
 0x193   : > { %v1614_v5 = vpop.f32.mrb[70].mxu1 }
 0x194   : > { %v5057_v21 = vadd.f32 %v1614_v5, %v1390_v31  ;;  %v1616_v13 = vpop.f32.mrb[71].mxu1 }
 0x195   : > { %v1209_v24 = vpop.f32.mrb[56].mxu0 }
 0x196   : > { %v1435_v59 = vadd.f32 %v4951_v51, %v1209_v24  ;;  %v1211_v53 = vpop.f32.mrb[57].mxu0 }
 0x197   : > { %v1619_v1 = vpop.f32.mrb[72].mxu1 }
 0x198   : > { %v5060_v57 = vadd.f32 %v1619_v1, %v1395_v49  ;;  %v1621_v10 = vpop.f32.mrb[73].mxu1 }
 0x199   : > { %v1214_v58 = vpop.f32.mrb[58].mxu0 }
 0x19a   : > { %v1440_v28 = vadd.f32 %v4948_v62, %v1214_v58  ;;  %v1216_v50 = vpop.f32.mrb[59].mxu0 }
 0x19b   : > { %v1624_v41 = vpop.f32.mrb[74].mxu1 }
 0x19c   : > { %v5063_v45 = vadd.f32 %v1624_v41, %v1400_v9  ;;  %v1626_v19 = vpop.f32.mrb[75].mxu1 }
 0x19d   : > { %v1219_v32 = vpop.f32.mrb[60].mxu0 }
 0x19e   : > { %v1445_v31 = vadd.f32 %v4960_v37, %v1219_v32  ;;  %v1221_v61 = vpop.f32.mrb[61].mxu0 }
 0x19f   : > { %v1629_v17 = vpop.f32.mrb[76].mxu1 }
 0x1a0   : > { %v5066_v54 = vadd.f32 %v1629_v17, %v1405_v14  ;;  %v1631_v51 = vpop.f32.mrb[77].mxu1 }
 0x1a1   : > { %v1224_v36 = vpop.f32.mrb[62].mxu0 }
 0x1a2   : > { %v1450_v49 = vadd.f32 %v4957_v25, %v1224_v36  ;;  %v1226_v46 = vpop.f32.mrb[63].mxu0 }
 0x1a3   : > { %v1634_v11 = vpop.f32.mrb[78].mxu1 }
 0x1a4   : > { %v5069_v4 = vadd.f32 %v1634_v11, %v1410_v55  ;;  %v1636_v62 = vpop.f32.mrb[79].mxu1 }
 0x1a5   : > { %v3127_v16 = vpop.f32.mrb[64].mxu0 }
 0x1a6   : > { %v5072_v9 = vadd.f32 %v3127_v16, %v4975_v42  ;;  %v1744_v6 = vpop.f32.mrb[65].mxu0 }
 0x1a7   : > { %v1639_v38 = vpop.f32.mrb[80].mxu1  ;;  %v5075_v37 = vadd.f32 %v1744_v6, %v4968_v34 }
 0x1a8   : > { %v5077_v14 = vadd.f32 %v1639_v38, %v1415_v60  ;;  %v1641_v56 = vpop.f32.mrb[81].mxu1 }
 0x1a9   : > { %v3130_v39 = vpop.f32.mrb[66].mxu0 }
 0x1aa   : > { %v5080_v25 = vadd.f32 %v3130_v39, %v4989_v29  ;;  %v1754_v2 = vpop.f32.mrb[67].mxu0 }
 0x1ab   : > { %v1644_v55 = vpop.f32.mrb[82].mxu1  ;;  %v5083_v18 = vadd.f32 %v1754_v2, %v4983_v40 }
 0x1ac   : > { %v5085_v48 = vadd.f32 %v1644_v55, %v1420_v43  ;;  %v1646_v42 = vpop.f32.mrb[83].mxu1 }
 0x1ad   : > { %v3133_v3 = vpop.f32.mrb[68].mxu0 }
 0x1ae   : > { %v5088_v5 = vadd.f32 %v3133_v3, %v5002_v26  ;;  %v1764_v34 = vpop.f32.mrb[69].mxu0 }
 0x1af   : > { %v1649_v60 = vpop.f32.mrb[84].mxu1  ;;  %v5091_v13 = vadd.f32 %v1764_v34, %v4996_v27 }
 0x1b0   : > { %v5093_v24 = vadd.f32 %v1649_v60, %v1425_v23  ;;  %v1651_v29 = vpop.f32.mrb[85].mxu1 }
 0x1b1   : > { %v3136_v53 = vpop.f32.mrb[70].mxu0 }
 0x1b2   : > { %v5096_v1 = vadd.f32 %v3136_v53, %v5013_v22  ;;  %v1774_v40 = vpop.f32.mrb[71].mxu0 }
 0x1b3   : > { %v1654_v43 = vpop.f32.mrb[86].mxu1  ;;  %v5099_v10 = vadd.f32 %v1774_v40, %v5009_v30 }
 0x1b4   : > { %v1655_v58 = vadd.f32 %v1654_v43, %v1430_v33  ;;  %v1656_v26 = vpop.f32.mrb[87].mxu1 }
 0x1b5   : > { %v3139_v50 = vpop.f32.mrb[72].mxu0 }
 0x1b6   : > { %v5102_v41 = vadd.f32 %v3139_v50, %v5022_v52  ;;  %v1784_v27 = vpop.f32.mrb[73].mxu0 }
 0x1b7   : > { %v1659_v19 = vpop.f32.mrb[88].mxu1  ;;  %v5105_v23 = vadd.f32 %v1784_v27, %v5018_v63 }
 0x1b8   : > { %v1660_v32 = vadd.f32 %v1659_v19, %v1435_v59  ;;  %v1661_v61 = vpop.f32.mrb[89].mxu1 }
 0x1b9   : > { %v3142_v22 = vpop.f32.mrb[74].mxu0 }
 0x1ba   : > { %v5108_v17 = vadd.f32 %v3142_v22, %v5030_v20  ;;  %v1794_v51 = vpop.f32.mrb[75].mxu0 }
 0x1bb   : > { %v1664_v30 = vpop.f32.mrb[90].mxu1  ;;  %v5111_v33 = vadd.f32 %v1794_v51, %v5026_v7 }
 0x1bc   : > { %v1665_v36 = vadd.f32 %v1664_v30, %v1440_v28  ;;  %v1666_v46 = vpop.f32.mrb[91].mxu1 }
 0x1bd   : > { %v3145_v52 = vpop.f32.mrb[76].mxu0 }
 0x1be   : > { %v5114_v11 = vadd.f32 %v3145_v52, %v5038_v44  ;;  %v1804_v62 = vpop.f32.mrb[77].mxu0 }
 0x1bf   : > { %v1669_v63 = vpop.f32.mrb[92].mxu1  ;;  %v5117_v59 = vadd.f32 %v1804_v62, %v5034_v15 }
 0x1c0   : > { %v1670_v16 = vadd.f32 %v1669_v63, %v1445_v31  ;;  %v1671_v6 = vpop.f32.mrb[93].mxu1 }
 0x1c1   : > { %v3148_v20 = vpop.f32.mrb[78].mxu0 }
 0x1c2   : > { %v5120_v38 = vadd.f32 %v3148_v20, %v5045_v47  ;;  %v1814_v56 = vpop.f32.mrb[79].mxu0 }
 0x1c3   : > { %v1674_v7 = vpop.f32.mrb[94].mxu1  ;;  %v5123_v28 = vadd.f32 %v1814_v56, %v5042_v35 }
 0x1c4   : > { %v1675_v39 = vadd.f32 %v1674_v7, %v1450_v49  ;;  %v1676_v2 = vpop.f32.mrb[95].mxu1 }
 0x1c5   : > { %v3151_v44 = vpop.f32.mrb[80].mxu0 }
 0x1c6   : > { %v5126_v55 = vadd.f32 %v3151_v44, %v5051_v12  ;;  %v1824_v42 = vpop.f32.mrb[81].mxu0 }
 0x1c7   : > { %v5129_v15 = vadd.f32 %v1824_v42, %v5048_v8  ;;  %v2115_v31 = vpop.f32.mrb[96].mxu1 }
 0x1c8   : > { %v2117_v3 = vpop.f32.mrb[97].mxu1 }
 0x1c9   : > { %v3154_v34 = vpop.f32.mrb[82].mxu0 }
 0x1ca   : > { %v5132_v47 = vadd.f32 %v3154_v34, %v5057_v21  ;;  %v1834_v60 = vpop.f32.mrb[83].mxu0 }
 0x1cb   : > { %v5135_v35 = vadd.f32 %v1834_v60, %v5054_v0  ;;  %v2120_v49 = vpop.f32.mrb[98].mxu1 }
 0x1cc   : > { %v2122_v29 = vpop.f32.mrb[99].mxu1 }
 0x1cd   : > { %v3157_v53 = vpop.f32.mrb[84].mxu0 }
 0x1ce   : > { %v5138_v12 = vadd.f32 %v3157_v53, %v5063_v45  ;;  %v1844_v40 = vpop.f32.mrb[85].mxu0 }
 0x1cf   : > { %v5141_v8 = vadd.f32 %v1844_v40, %v5060_v57  ;;  %v2125_v43 = vpop.f32.mrb[100].mxu1 }
 0x1d0   : > { %v2127_v26 = vpop.f32.mrb[101].mxu1 }
 0x1d1   : > { %v3160_v50 = vpop.f32.mrb[86].mxu0 }
 0x1d2   : > { %v5144_v21 = vadd.f32 %v3160_v50, %v5069_v4  ;;  %v1854_v27 = vpop.f32.mrb[87].mxu0 }
 0x1d3   : > { %v5147_v0 = vadd.f32 %v1854_v27, %v5066_v54  ;;  %v2130_v19 = vpop.f32.mrb[102].mxu1 }
 0x1d4   : > { %v2132_v61 = vpop.f32.mrb[103].mxu1 }
 0x1d5   : > { %v3163_v22 = vpop.f32.mrb[88].mxu0 }
 0x1d6   : > { %v5150_v45 = vadd.f32 %v3163_v22, %v5085_v48  ;;  %v1864_v51 = vpop.f32.mrb[89].mxu0 }
 0x1d7   : > { %v5153_v57 = vadd.f32 %v1864_v51, %v5077_v14  ;;  %v2135_v30 = vpop.f32.mrb[104].mxu1 }
 0x1d8   : > { %v2137_v46 = vpop.f32.mrb[105].mxu1 }
 0x1d9   : > { %v3166_v52 = vpop.f32.mrb[90].mxu0 }
 0x1da   : > { %v5155_v62 = vadd.f32 %v3166_v52, %v1655_v58  ;;  %v1874_v4 = vpop.f32.mrb[91].mxu0 }
 0x1db   : > { %v5158_v63 = vadd.f32 %v1874_v4, %v5093_v24  ;;  %v2140_v54 = vpop.f32.mrb[106].mxu1 }
 0x1dc   : > { %v2142_v6 = vpop.f32.mrb[107].mxu1 }
 0x1dd   : > { %v3169_v20 = vpop.f32.mrb[92].mxu0 }
 0x1de   : > { %v5160_v56 = vadd.f32 %v3169_v20, %v1665_v36  ;;  %v1884_v48 = vpop.f32.mrb[93].mxu0 }
 0x1df   : > { %v5162_v7 = vadd.f32 %v1884_v48, %v1660_v32  ;;  %v2145_v14 = vpop.f32.mrb[108].mxu1 }
 0x1e0   : > { %v2147_v2 = vpop.f32.mrb[109].mxu1 }
 0x1e1   : > { %v3172_v44 = vpop.f32.mrb[94].mxu0 }
 0x1e2   : > { %v5164_v42 = vadd.f32 %v3172_v44, %v1675_v39  ;;  %v1894_v58 = vpop.f32.mrb[95].mxu0 }
 0x1e3   : > { %v5166_v3 = vadd.f32 %v1894_v58, %v1670_v16  ;;  %v2150_v34 = vpop.f32.mrb[110].mxu1 }
 0x1e4   : > { %v2152_v24 = vpop.f32.mrb[111].mxu1 }
 0x1e5   : > { %v3207_v60 = vpop.f32.mrb[96].mxu0 }
 0x1e6   : > { %v2346_v29 = vadd.f32 %v3207_v60, %v2120_v49  ;;  %v2340_v53 = vpop.f32.mrb[97].mxu0 }
 0x1e7   : > { %v2155_v32 = vpop.f32.mrb[112].mxu1  ;;  %v2341_v36 = vadd.f32 %v2340_v53, %v2115_v31 }
 0x1e8   : > { %v2500_v39 = vadd.f32 %v2346_v29, %v5072_v9  ;;  %v2157_v40 = vpop.f32.mrb[113].mxu1 }
 0x1e9   : > { %v2499_v16 = vadd.f32 %v2341_v36, %v5075_v37  ;;  %v3210_v26 = vpop.f32.mrb[98].mxu0 }
 0x1ea   : > { %2532 = vst [vmem:[%s5173_s10 + $0x8] sm:$0xff] %v2500_v39  ;;  %v2601_v49 = vmul.f32 %v2500_v39, %v2500_v39  ;;  %v2356_v50 = vadd.f32 %v3210_v26, %v2130_v19  ;;  %v2350_v27 = vpop.f32.mrb[99].mxu0 }
 0x1eb   : > { %2531 = vst [vmem:[%s5173_s10] sm:$0xff] %v2499_v16  ;;  %v2563_v61 = vadd.f32 %v2500_v39, %v2499_v16  ;;  %v2600_v22 = vmul.f32 %v2499_v16, %v2499_v16  ;;  %v2160_v51 = vpop.f32.mrb[114].mxu1  ;;  %v2351_v46 = vadd.f32 %v2350_v27, %v2125_v43 }
 0x1ec   : > { %v2502_v52 = vadd.f32 %v2356_v50, %v5080_v25  ;;  %v2162_v31 = vpop.f32.mrb[115].mxu1 }
 0x1ed   : > { %v2632_v4 = vadd.f32 %v2601_v49, %v2600_v22  ;;  %v2501_v9 = vadd.f32 %v2351_v46, %v5083_v18  ;;  %v3213_v6 = vpop.f32.mrb[100].mxu0 }
 0x1ee   : > { %2534 = vst [vmem:[%s5173_s10 + $0x18] sm:$0xff] %v2502_v52  ;;  %v2366_v37 = vadd.f32 %v3213_v6, %v2140_v54  ;;  %v2360_v20 = vpop.f32.mrb[101].mxu0  ;;  %v2603_v24 = vmul.f32 %v2502_v52, %v2502_v52 }
 0x1ef   : > { %2533 = vst [vmem:[%s5173_s10 + $0x10] sm:$0xff] %v2501_v9  ;;  %v2564_v19 = vadd.f32 %v2563_v61, %v2501_v9  ;;  %v2602_v48 = vmul.f32 %v2501_v9, %v2501_v9  ;;  %v2165_v2 = vpop.f32.mrb[116].mxu1  ;;  %v2361_v44 = vadd.f32 %v2360_v20, %v2135_v30 }
 0x1f0   : > { %v2504_v58 = vadd.f32 %v2366_v37, %v5088_v5  ;;  %v2167_v43 = vpop.f32.mrb[117].mxu1 }
 0x1f1   : > { %v2633_v25 = vadd.f32 %v2632_v4, %v2602_v48  ;;  %v2503_v60 = vadd.f32 %v2361_v44, %v5091_v13  ;;  %v2565_v29 = vadd.f32 %v2564_v19, %v2502_v52  ;;  %v3216_v18 = vpop.f32.mrb[102].mxu0 }
 0x1f2   : > { %2536 = vst [vmem:[%s5173_s10 + $0x28] sm:$0xff] %v2504_v58  ;;  %v2376_v53 = vadd.f32 %v3216_v18, %v2150_v34  ;;  %v2370_v54 = vpop.f32.mrb[103].mxu0  ;;  %v2605_v49 = vmul.f32 %v2504_v58, %v2504_v58 }
 0x1f3   : > { %2535 = vst [vmem:[%s5173_s10 + $0x20] sm:$0xff] %v2503_v60  ;;  %v2566_v36 = vadd.f32 %v2565_v29, %v2503_v60  ;;  %v2604_v39 = vmul.f32 %v2503_v60, %v2503_v60  ;;  %v2634_v40 = vadd.f32 %v2633_v25, %v2603_v24  ;;  %v2170_v16 = vpop.f32.mrb[118].mxu1  ;;  %v2371_v30 = vadd.f32 %v2370_v54, %v2145_v14 }
 0x1f4   : > { %v2506_v5 = vadd.f32 %v2376_v53, %v5096_v1  ;;  %v2172_v26 = vpop.f32.mrb[119].mxu1 }
 0x1f5   : > { %v2635_v50 = vadd.f32 %v2634_v40, %v2604_v39  ;;  %v2505_v13 = vadd.f32 %v2371_v30, %v5099_v10  ;;  %v2567_v27 = vadd.f32 %v2566_v36, %v2504_v58  ;;  %v3219_v61 = vpop.f32.mrb[104].mxu0 }
 0x1f6   : > { %2538 = vst [vmem:[%s5173_s10 + $0x38] sm:$0xff] %v2506_v5  ;;  %v2386_v34 = vadd.f32 %v3219_v61, %v2160_v51  ;;  %v2380_v22 = vpop.f32.mrb[105].mxu0  ;;  %v2607_v6 = vmul.f32 %v2506_v5, %v2506_v5 }
 0x1f7   : > { %2537 = vst [vmem:[%s5173_s10 + $0x30] sm:$0xff] %v2505_v13  ;;  %v2568_v46 = vadd.f32 %v2567_v27, %v2505_v13  ;;  %v2606_v52 = vmul.f32 %v2505_v13, %v2505_v13  ;;  %v2636_v31 = vadd.f32 %v2635_v50, %v2605_v49  ;;  %v2175_v4 = vpop.f32.mrb[120].mxu1  ;;  %v2381_v14 = vadd.f32 %v2380_v22, %v2155_v32 }
 0x1f8   : > { %v2508_v1 = vadd.f32 %v2386_v34, %v5102_v41  ;;  %v2177_v9 = vpop.f32.mrb[121].mxu1 }
 0x1f9   : > { %v2637_v37 = vadd.f32 %v2636_v31, %v2606_v52  ;;  %v2507_v10 = vadd.f32 %v2381_v14, %v5105_v23  ;;  %v2569_v20 = vadd.f32 %v2568_v46, %v2506_v5  ;;  %v3222_v19 = vpop.f32.mrb[106].mxu0 }
 0x1fa   : > { %2540 = vst [vmem:[%s5173_s10 + $0x48] sm:$0xff] %v2508_v1  ;;  %v2396_v51 = vadd.f32 %v3222_v19, %v2170_v16  ;;  %v2390_v48 = vpop.f32.mrb[107].mxu0  ;;  %v2609_v60 = vmul.f32 %v2508_v1, %v2508_v1 }
 0x1fb   : > { %2539 = vst [vmem:[%s5173_s10 + $0x40] sm:$0xff] %v2507_v10  ;;  %v2570_v44 = vadd.f32 %v2569_v20, %v2507_v10  ;;  %v2608_v58 = vmul.f32 %v2507_v10, %v2507_v10  ;;  %v2638_v43 = vadd.f32 %v2637_v37, %v2607_v6  ;;  %v2180_v24 = vpop.f32.mrb[122].mxu1  ;;  %v2391_v32 = vadd.f32 %v2390_v48, %v2165_v2 }
 0x1fc   : > { %v2510_v41 = vadd.f32 %v2396_v51, %v5108_v17  ;;  %v2182_v25 = vpop.f32.mrb[123].mxu1 }
 0x1fd   : > { %v2639_v29 = vadd.f32 %v2638_v43, %v2608_v58  ;;  %v2509_v23 = vadd.f32 %v2391_v32, %v5111_v33  ;;  %v2571_v18 = vadd.f32 %v2570_v44, %v2508_v1  ;;  %v3225_v53 = vpop.f32.mrb[108].mxu0 }
 0x1fe   : > { %2542 = vst [vmem:[%s5173_s10 + $0x58] sm:$0xff] %v2510_v41  ;;  %v2406_v54 = vadd.f32 %v3225_v53, %v2180_v24  ;;  %v2400_v36 = vpop.f32.mrb[109].mxu0  ;;  %v2611_v26 = vmul.f32 %v2510_v41, %v2510_v41 }
 0x1ff   : > { %2541 = vst [vmem:[%s5173_s10 + $0x50] sm:$0xff] %v2509_v23  ;;  %v2572_v39 = vadd.f32 %v2571_v18, %v2509_v23  ;;  %v2610_v40 = vmul.f32 %v2509_v23, %v2509_v23  ;;  %v2640_v16 = vadd.f32 %v2639_v29, %v2609_v60  ;;  %v2185_v30 = vpop.f32.mrb[124].mxu1  ;;  %v2401_v2 = vadd.f32 %v2400_v36, %v2175_v4 }
 0x200   : > { %v2512_v17 = vadd.f32 %v2406_v54, %v5114_v11  ;;  %v2187_v5 = vpop.f32.mrb[125].mxu1 }
 0x201   : > { %v2641_v49 = vadd.f32 %v2640_v16, %v2610_v40  ;;  %v2511_v33 = vadd.f32 %v2401_v2, %v5117_v59  ;;  %v2573_v50 = vadd.f32 %v2572_v39, %v2510_v41  ;;  %v3228_v13 = vpop.f32.mrb[110].mxu0 }
 0x202   : > { %2544 = vst [vmem:[%s5173_s10 + $0x68] sm:$0xff] %v2512_v17  ;;  %v2410_v27 = vpop.f32.mrb[111].mxu0  ;;  %v2613_v11 = vmul.f32 %v2512_v17, %v2512_v17 }
 0x203   : > { %2543 = vst [vmem:[%s5173_s10 + $0x60] sm:$0xff] %v2511_v33  ;;  %v2574_v61 = vadd.f32 %v2573_v50, %v2511_v33  ;;  %v2612_v34 = vmul.f32 %v2511_v33, %v2511_v33  ;;  %v2642_v22 = vadd.f32 %v2641_v49, %v2611_v26  ;;  %v2190_v46 = vpop.f32.mrb[126].mxu1  ;;  %v2411_v52 = vadd.f32 %v2410_v27, %v2185_v30 }
 0x204   : > { %v2416_v31 = vadd.f32 %v3228_v13, %v2190_v46  ;;  %v2192_v4 = vpop.f32.mrb[127].mxu1 }
 0x205   : > { %v2643_v14 = vadd.f32 %v2642_v22, %v2612_v34  ;;  %v2513_v1 = vadd.f32 %v2411_v52, %v5123_v28  ;;  %v2575_v9 = vadd.f32 %v2574_v61, %v2512_v17  ;;  %v3231_v59 = vpop.f32.mrb[112].mxu0 }
 0x206   : > { %v2514_v6 = vadd.f32 %v2416_v31, %v5120_v38  ;;  %v2420_v37 = vpop.f32.mrb[113].mxu0 }
 0x207   : > { %2545 = vst [vmem:[%s5173_s10 + $0x70] sm:$0xff] %v2513_v1  ;;  %v2576_v10 = vadd.f32 %v2575_v9, %v2513_v1  ;;  %v2614_v20 = vmul.f32 %v2513_v1, %v2513_v1  ;;  %v2644_v19 = vadd.f32 %v2643_v14, %v2613_v11  ;;  %v2195_v51 = vpop.f32.mrb[128].mxu1 }
 0x208   : > { %2546 = vst [vmem:[%s5173_s10 + $0x78] sm:$0xff] %v2514_v6  ;;  %v2421_v48 = vadd.f32 %v2420_v37, %v2195_v51  ;;  %v2197_v44 = vpop.f32.mrb[129].mxu1  ;;  %v2615_v58 = vmul.f32 %v2514_v6, %v2514_v6 }
 0x209   : > { %v2645_v43 = vadd.f32 %v2644_v19, %v2614_v20  ;;  %v2577_v24 = vadd.f32 %v2576_v10, %v2514_v6  ;;  %v3234_v32 = vpop.f32.mrb[114].mxu0 }
 0x20a   : > { %v2515_v28 = vadd.f32 %v2421_v48, %v5129_v15  ;;  %v2430_v41 = vpop.f32.mrb[115].mxu0 }
 0x20b   : > { %v2646_v25 = vadd.f32 %v2645_v43, %v2615_v58  ;;  %v2200_v38 = vpop.f32.mrb[130].mxu1 }
 0x20c   : > { %2547 = vst [vmem:[%s5173_s10 + $0x80] sm:$0xff] %v2515_v28  ;;  %v2578_v60 = vadd.f32 %v2577_v24, %v2515_v28  ;;  %v2616_v29 = vmul.f32 %v2515_v28, %v2515_v28  ;;  %v2426_v23 = vadd.f32 %v3231_v59, %v2200_v38  ;;  %v2202_v18 = vpop.f32.mrb[131].mxu1 }
 0x20d   : > { %v3237_v53 = vpop.f32.mrb[116].mxu0 }
 0x20e   : > { %v2647_v54 = vadd.f32 %v2646_v25, %v2616_v29  ;;  %v2516_v36 = vadd.f32 %v2426_v23, %v5126_v55  ;;  %v2440_v39 = vpop.f32.mrb[117].mxu0 }
 0x20f   : > { %v2205_v40 = vpop.f32.mrb[132].mxu1 }
 0x210   : > { %2548 = vst [vmem:[%s5173_s10 + $0x88] sm:$0xff] %v2516_v36  ;;  %v2579_v16 = vadd.f32 %v2578_v60, %v2516_v36  ;;  %v2617_v30 = vmul.f32 %v2516_v36, %v2516_v36  ;;  %v2431_v2 = vadd.f32 %v2430_v41, %v2205_v40  ;;  %v2207_v15 = vpop.f32.mrb[133].mxu1 }
 0x211   : > { %v3240_v17 = vpop.f32.mrb[118].mxu0 }
 0x212   : > { %v2648_v5 = vadd.f32 %v2647_v54, %v2617_v30  ;;  %v2517_v26 = vadd.f32 %v2431_v2, %v5135_v35  ;;  %v2450_v49 = vpop.f32.mrb[119].mxu0 }
 0x213   : > { %v2210_v33 = vpop.f32.mrb[134].mxu1 }
 0x214   : > { %2549 = vst [vmem:[%s5173_s10 + $0x90] sm:$0xff] %v2517_v26  ;;  %v2580_v50 = vadd.f32 %v2579_v16, %v2517_v26  ;;  %v2618_v13 = vmul.f32 %v2517_v26, %v2517_v26  ;;  %v2436_v27 = vadd.f32 %v3234_v32, %v2210_v33  ;;  %v2212_v61 = vpop.f32.mrb[135].mxu1 }
 0x215   : > { %v3243_v55 = vpop.f32.mrb[120].mxu0 }
 0x216   : > { %v2649_v34 = vadd.f32 %v2648_v5, %v2618_v13  ;;  %v2518_v22 = vadd.f32 %v2436_v27, %v5132_v47  ;;  %v2460_v46 = vpop.f32.mrb[121].mxu0 }
 0x217   : > { %v2215_v52 = vpop.f32.mrb[136].mxu1 }
 0x218   : > { %2550 = vst [vmem:[%s5173_s10 + $0x98] sm:$0xff] %v2518_v22  ;;  %v2581_v31 = vadd.f32 %v2580_v50, %v2518_v22  ;;  %v2619_v4 = vmul.f32 %v2518_v22, %v2518_v22  ;;  %v2441_v11 = vadd.f32 %v2440_v39, %v2215_v52  ;;  %v2217_v14 = vpop.f32.mrb[137].mxu1 }
 0x219   : > { %v3246_v35 = vpop.f32.mrb[122].mxu0 }
 0x21a   : > { %v2650_v1 = vadd.f32 %v2649_v34, %v2619_v4  ;;  %v2519_v9 = vadd.f32 %v2441_v11, %v5141_v8  ;;  %v2470_v59 = vpop.f32.mrb[123].mxu0 }
 0x21b   : > { %v2220_v6 = vpop.f32.mrb[138].mxu1 }
 0x21c   : > { %2551 = vst [vmem:[%s5173_s10 + $0xa0] sm:$0xff] %v2519_v9  ;;  %v2582_v37 = vadd.f32 %v2581_v31, %v2519_v9  ;;  %v2620_v10 = vmul.f32 %v2519_v9, %v2519_v9  ;;  %v2446_v20 = vadd.f32 %v3237_v53, %v2220_v6  ;;  %v2222_v19 = vpop.f32.mrb[139].mxu1 }
 0x21d   : > { %v5217_v47 = vpop.f32.mrb[124].mxu0 }
 0x21e   : > { %v2651_v51 = vadd.f32 %v2650_v1, %v2620_v10  ;;  %v2520_v48 = vadd.f32 %v2446_v20, %v5138_v12  ;;  %v2480_v44 = vpop.f32.mrb[125].mxu0 }
 0x21f   : > { %v2225_v58 = vpop.f32.mrb[140].mxu1 }
 0x220   : > { %2552 = vst [vmem:[%s5173_s10 + $0xa8] sm:$0xff] %v2520_v48  ;;  %v2583_v43 = vadd.f32 %v2582_v37, %v2520_v48  ;;  %v2621_v24 = vmul.f32 %v2520_v48, %v2520_v48  ;;  %v2451_v8 = vadd.f32 %v2450_v49, %v2225_v58  ;;  %v2227_v32 = vpop.f32.mrb[141].mxu1 }
 0x221   : > { %v5221_v28 = vpop.f32.mrb[126].mxu0 }
 0x222   : > { %v2652_v41 = vadd.f32 %v2651_v51, %v2621_v24  ;;  %v2521_v25 = vadd.f32 %v2451_v8, %v5147_v0  ;;  %v2490_v38 = vpop.f32.mrb[127].mxu0 }
 0x223   : > { %v2230_v60 = vpop.f32.mrb[142].mxu1 }
 0x224   : > { %2553 = vst [vmem:[%s5173_s10 + $0xb0] sm:$0xff] %v2521_v25  ;;  %v2584_v29 = vadd.f32 %v2583_v43, %v2521_v25  ;;  %v2622_v23 = vmul.f32 %v2521_v25, %v2521_v25  ;;  %v2456_v12 = vadd.f32 %v3240_v17, %v2230_v60  ;;  %v2232_v18 = vpop.f32.mrb[143].mxu1 }
 0x226   : > { %v2653_v53 = vadd.f32 %v2652_v41, %v2622_v23  ;;  %v2522_v54 = vadd.f32 %v2456_v12, %v5144_v21 }
 0x227   : > { %v2235_v36 = vpop.f32.mrb[144].mxu1 }
 0x228   : > { %2554 = vst [vmem:[%s5173_s10 + $0xb8] sm:$0xff] %v2522_v54  ;;  %v2585_v39 = vadd.f32 %v2584_v29, %v2522_v54  ;;  %v2623_v40 = vmul.f32 %v2522_v54, %v2522_v54  ;;  %v2461_v16 = vadd.f32 %v2460_v46, %v2235_v36  ;;  %v2237_v30 = vpop.f32.mrb[145].mxu1 }
 0x22a   : > { %v2654_v2 = vadd.f32 %v2653_v53, %v2623_v40  ;;  %v2523_v0 = vadd.f32 %v2461_v16, %v5153_v57 }
 0x22b   : > { %v2240_v15 = vpop.f32.mrb[146].mxu1 }
 0x22c   : > { %2555 = vst [vmem:[%s5173_s10 + $0xc0] sm:$0xff] %v2523_v0  ;;  %v2586_v5 = vadd.f32 %v2585_v39, %v2523_v0  ;;  %v2624_v26 = vmul.f32 %v2523_v0, %v2523_v0  ;;  %v2466_v17 = vadd.f32 %v3243_v55, %v2240_v15  ;;  %v2242_v49 = vpop.f32.mrb[147].mxu1 }
 0x22e   : > { %v2655_v33 = vadd.f32 %v2654_v2, %v2624_v26  ;;  %v2524_v21 = vadd.f32 %v2466_v17, %v5150_v45 }
 0x22f   : > { %v2245_v50 = vpop.f32.mrb[148].mxu1 }
 0x230   : > { %2556 = vst [vmem:[%s5173_s10 + $0xc8] sm:$0xff] %v2524_v21  ;;  %v2587_v13 = vadd.f32 %v2586_v5, %v2524_v21  ;;  %v2625_v27 = vmul.f32 %v2524_v21, %v2524_v21  ;;  %v2471_v61 = vadd.f32 %v2470_v59, %v2245_v50  ;;  %v2247_v34 = vpop.f32.mrb[149].mxu1 }
 0x232   : > { %v2656_v22 = vadd.f32 %v2655_v33, %v2625_v27  ;;  %v2525_v57 = vadd.f32 %v2471_v61, %v5158_v63 }
 0x233   : > { %v2250_v46 = vpop.f32.mrb[150].mxu1 }
 0x234   : > { %2557 = vst [vmem:[%s5173_s10 + $0xd0] sm:$0xff] %v2525_v57  ;;  %v2588_v52 = vadd.f32 %v2587_v13, %v2525_v57  ;;  %v2626_v31 = vmul.f32 %v2525_v57, %v2525_v57  ;;  %v2476_v55 = vadd.f32 %v3246_v35, %v2250_v46  ;;  %v2252_v4 = vpop.f32.mrb[151].mxu1 }
 0x236   : > { %v2657_v11 = vadd.f32 %v2656_v22, %v2626_v31  ;;  %v2526_v45 = vadd.f32 %v2476_v55, %v5155_v62 }
 0x237   : > { %v2255_v14 = vpop.f32.mrb[152].mxu1 }
 0x238   : > { %2558 = vst [vmem:[%s5173_s10 + $0xd8] sm:$0xff] %v2526_v45  ;;  %v2589_v1 = vadd.f32 %v2588_v52, %v2526_v45  ;;  %v2627_v9 = vmul.f32 %v2526_v45, %v2526_v45  ;;  %v2481_v59 = vadd.f32 %v2480_v44, %v2255_v14  ;;  %v2257_v6 = vpop.f32.mrb[153].mxu1 }
 0x23a   : > { %v2658_v37 = vadd.f32 %v2657_v11, %v2627_v9  ;;  %v2527_v63 = vadd.f32 %v2481_v59, %v5162_v7 }
 0x23b   : > { %v2260_v10 = vpop.f32.mrb[154].mxu1 }
 0x23c   : > { %2559 = vst [vmem:[%s5173_s10 + $0xe0] sm:$0xff] %v2527_v63  ;;  %v2590_v20 = vadd.f32 %v2589_v1, %v2527_v63  ;;  %v2628_v19 = vmul.f32 %v2527_v63, %v2527_v63  ;;  %v2486_v35 = vadd.f32 %v5217_v47, %v2260_v10  ;;  %v2262_v51 = vpop.f32.mrb[155].mxu1 }
 0x23e   : > { %v2659_v48 = vadd.f32 %v2658_v37, %v2628_v19  ;;  %v2528_v62 = vadd.f32 %v2486_v35, %v5160_v56 }
 0x23f   : > { %v2265_v58 = vpop.f32.mrb[156].mxu1 }
 0x240   : > { %2560 = vst [vmem:[%s5173_s10 + $0xe8] sm:$0xff] %v2528_v62  ;;  %v2591_v43 = vadd.f32 %v2590_v20, %v2528_v62  ;;  %v2629_v44 = vmul.f32 %v2528_v62, %v2528_v62  ;;  %v2491_v24 = vadd.f32 %v2490_v38, %v2265_v58  ;;  %v2267_v8 = vpop.f32.mrb[157].mxu1 }
 0x242   : > { %v2660_v32 = vadd.f32 %v2659_v48, %v2629_v44  ;;  %v2529_v7 = vadd.f32 %v2491_v24, %v5166_v3 }
 0x243   : > { %v2270_v41 = vpop.f32.mrb[158].mxu1 }
 0x244   : > { %2561 = vst [vmem:[%s5173_s10 + $0xf0] sm:$0xff] %v2529_v7  ;;  %v2592_v25 = vadd.f32 %v2591_v43, %v2529_v7  ;;  %v2630_v60 = vmul.f32 %v2529_v7, %v2529_v7  ;;  %v2496_v47 = vadd.f32 %v5221_v28, %v2270_v41  ;;  %v2272_v29 = vpop.f32.mrb[159].mxu1 }
 0x246   : > { %v2661_v23 = vadd.f32 %v2660_v32, %v2630_v60  ;;  %v2530_v56 = vadd.f32 %v2496_v47, %v5164_v42 }
 0x248   : > { %2562 = vst [vmem:[%s5173_s10 + $0xf8] sm:$0xff] %v2530_v56  ;;  %v2593_v12 = vadd.f32 %v2592_v25, %v2530_v56  ;;  %v2631_v18 = vmul.f32 %v2530_v56, %v2530_v56 }
 0x24a   : > { %v2594_v53 = vrot.slane %v2593_v12, 4  ;;  %v2662_v38 = vadd.f32 %v2661_v23, %v2631_v18 }
 0x24c   : > { %v2595_v54 = vadd.f32 %v2594_v53, %v2593_v12  ;;  %v2663_v36 = vrot.slane %v2662_v38, 4 }
 0x24e   : > { %v2596_v39 = vrot.slane %v2595_v54, 2  ;;  %v2664_v3 = vadd.f32 %v2663_v36, %v2662_v38 }
 0x250   : > { %v2597_v40 = vadd.f32 %v2596_v39, %v2595_v54  ;;  %v2665_v16 = vrot.slane %v2664_v3, 2 }
 0x252   : > { %v2598_v30 = vrot.slane %v2597_v40, 1  ;;  %v2666_v2 = vadd.f32 %v2665_v16, %v2664_v3 }
 0x254   : > { %v2667_v28 = vrot.slane %v2666_v2, 1  ;;  %v2599_v42 = vadd.f32 %v2598_v30, %v2597_v40 }
 0x256   : > { %v2668_v0 = vadd.f32 %v2667_v28, %v2666_v2 }
 0x258   : > { %v2669_v15 = vsel %vm488_vm1, %v2599_v42, %v2668_v0 }
 0x259   : > { %2670 = vst [vmem:[%s235_s12] sm:$0x3] %v2669_v15 }
 0x25a PF: > { %s16_s18 = sadd.s32 1, %s3534_s18  }
 0x25b   : > { %p13_p4 = scmp.ge.s32.totalorder %s16_s18, 4  }
 0x25d   :  { %15 = sbr.rel (!%p13_p4) target bundleno = 1 (0x1), region = 83 }

</bundles_post_ra>
